<compile_context>
chip_gen: v6e
topology: v6e:2x2x1
jax: 0.10.0
libtpu: 0.0.40
codegen_flags: <defaults>
</compile_context>

<pallas_src>
import numpy as np
import jax
import jax.numpy as jnp
from jax import lax
from jax.experimental import pallas as pl
from jax.experimental.pallas import tpu as pltpu

BN_EPS = 1e-5


# ------------------------- HarDBlock static structure ------------------------

def get_links(layer, base_ch, k, m):
    """Exact port of HarDBlock.get_links."""
    if layer == 0:
        return 0, base_ch, []
    out_ch = k
    links = []
    for i in range(10):
        check = 2 ** i
        if layer % check == 0:
            link = layer - check
            links.append(link)
            if i > 0:
                out_ch *= m
    out_ch = int(int(out_ch + 1) / 2) * 2
    in_ch = 0
    for j in links:
        _, ch, _ = get_links(j, base_ch, k, m)
        in_ch += ch
    return in_ch, out_ch, links


def block_structure(in_channels, k, m, n_layers, keepbase=False):
    channels = [in_channels]
    links_all = []
    for i in range(n_layers):
        _, out_ch, links = get_links(i + 1, in_channels, k, m)
        links_all.append(links)
        channels.append(out_ch)
    t = n_layers + 1
    keep = [i for i in range(t)
            if (keepbase and i == 0) or i == t - 1 or i % 2 == 1]
    out_offsets, off = {}, 0
    for i in keep:
        out_offsets[i] = off
        off += channels[i]
    out_channels = off
    # layers (>=1) whose output is read by a later layer live in the VMEM slab
    linked_later = sorted({j for links in links_all for j in links if j >= 1})
    slab_off, soff = {}, 0
    for i in linked_later:
        slab_off[i] = soff
        soff += ((channels[i] + 7) // 8) * 8          # sublane-aligned slots
    slab_rows = max(soff, 8)
    return channels, links_all, out_offsets, out_channels, slab_off, slab_rows


# ------------------------------- parameters ----------------------------------

def fold_bn(gamma, beta, mean, var):
    scale = gamma / jnp.sqrt(var + BN_EPS)
    return scale, beta - mean * scale


def init_hardblock_params(key, channels, links_all):
    """Deterministic synthetic parameters (shapes match the PyTorch module)."""
    params = []
    for li, links in enumerate(links_all):
        in_ch = sum(channels[j] for j in links)
        out_ch = channels[li + 1]
        key, *ks = jax.random.split(key, 11)
        # 1x1 conv weight: torch (out, in, 1, 1) -> (out, in)
        w1 = 0.1 * jax.random.normal(ks[0], (out_ch, in_ch), jnp.float32)
        g1 = 1.0 + 0.1 * jax.random.normal(ks[1], (out_ch,), jnp.float32)
        b1 = 0.05 * jax.random.normal(ks[2], (out_ch,), jnp.float32)
        mu1 = 0.05 * jax.random.normal(ks[3], (out_ch,), jnp.float32)
        v1 = 0.5 + jax.random.uniform(ks[4], (out_ch,), jnp.float32)
        s1, bb1 = fold_bn(g1, b1, mu1, v1)
        # depthwise weight: torch (out, 1, 3, 3) -> (out, 9) row-major (ky,kx)
        wdw = 0.1 * jax.random.normal(ks[5], (out_ch, 9), jnp.float32)
        g2 = 1.0 + 0.1 * jax.random.normal(ks[6], (out_ch,), jnp.float32)
        b2 = 0.05 * jax.random.normal(ks[7], (out_ch,), jnp.float32)
        mu2 = 0.05 * jax.random.normal(ks[8], (out_ch,), jnp.float32)
        v2 = 0.5 + jax.random.uniform(ks[9], (out_ch,), jnp.float32)
        s2, bb2 = fold_bn(g2, b2, mu2, v2)
        params.append(dict(w1=w1, s1=s1, b1=bb1, wdw=wdw, s2=s2, b2=bb2))
    return params


# ------------------------------ fused kernel ----------------------------------

def build_edge_masks(H, W):
    """Per-tap validity masks for the zero-padded 3x3 depthwise conv."""
    m = np.ones((9, 1, H, W), np.float32)
    for ky in range(3):
        for kx in range(3):
            t = ky * 3 + kx
            if ky == 0:
                m[t, :, 0, :] = 0.0
            if ky == 2:
                m[t, :, H - 1, :] = 0.0
            if kx == 0:
                m[t, :, :, 0] = 0.0
            if kx == 2:
                m[t, :, :, W - 1] = 0.0
    return jnp.asarray(m.reshape(9, 1, H * W))


def _make_kernel(channels, links_all, out_offsets, slab_off, H, W):
    n_layers = len(links_all)
    HW = H * W

    def kernel(*refs):
        it = iter(refs)
        x_ref = next(it)                       # (C_in0, HW)
        masks_ref = next(it)                   # (9, 1, HW)
        layer_refs = []
        for links in links_all:
            w1_parts = [next(it) for _ in links]
            s1, b1, wdw, s2, b2 = [next(it) for _ in range(5)]
            layer_refs.append((w1_parts, s1, b1, wdw, s2, b2))
        out_ref = next(it)                     # (C_out_total, HW)
        slab = next(it)                        # VMEM scratch feature slab

        x = x_ref[...]                         # base features (link 0)

        if 0 in out_offsets:                   # keepbase=True path
            o = out_offsets[0]
            out_ref[o:o + channels[0], :] = x

        for li in range(n_layers):
            links = links_all[li]
            cout = channels[li + 1]
            w1_parts, s1_ref, b1_ref, wdw_ref, s2_ref, b2_ref = layer_refs[li]

            # -- 1x1 conv + BN + ReLU over linked features (no concat:
            #    sum of per-link partial matmuls on the MXU)
            acc = None
            for j, w_ref in zip(links, w1_parts):
                chj = channels[j]
                feat = x if j == 0 else slab[slab_off[j]:slab_off[j] + chj, :]
                part = jnp.dot(w_ref[...], feat,
                               preferred_element_type=jnp.float32)
                acc = part if acc is None else acc + part
            y = jnp.maximum(acc * s1_ref[...] + b1_ref[...], 0.0)  # (cout, HW)

            # -- 3x3 depthwise conv (stride 1, zero pad 1) via lane rolls
            dacc = None
            for ky in range(3):
                for kx in range(3):
                    tap = ky * 3 + kx
                    shift = (ky - 1) * W + (kx - 1)
                    src = y if shift == 0 else pltpu.roll(
                        y, (-shift) % HW, axis=1)
                    contrib = src * wdw_ref[tap]            # (cout,1) bcast
                    if tap != 4:                            # center: no edges
                        contrib = contrib * masks_ref[tap]  # (1,HW) bcast
                    dacc = contrib if dacc is None else dacc + contrib
            z = dacc * s2_ref[...] + b2_ref[...]            # depthwise BN

            layer_idx = li + 1
            if layer_idx in slab_off:          # needed by a later layer
                o = slab_off[layer_idx]
                slab[o:o + cout, :] = z
            if layer_idx in out_offsets:       # part of the block output
                o = out_offsets[layer_idx]
                out_ref[o:o + cout, :] = z

    return kernel


def hardblock_forward(x_nchw, params, *, in_channels, k, m, n_layers,
                      keepbase=False):
    N, C, H, W = x_nchw.shape
    assert C == in_channels
    (channels, links_all, out_offsets, out_channels,
     slab_off, slab_rows) = block_structure(in_channels, k, m, n_layers,
                                            keepbase)
    HW = H * W
    x = x_nchw.reshape(N, C, HW)               # free reshape, no transpose

    inputs = [x, build_edge_masks(H, W)]
    in_specs = [
        pl.BlockSpec((None, C, HW), lambda n: (n, 0, 0)),
        pl.BlockSpec((9, 1, HW), lambda n: (0, 0, 0)),
    ]

    def _const_spec(a):
        nd = a.ndim
        return pl.BlockSpec(a.shape, lambda n, _nd=nd: (0,) * _nd)

    for li, p in enumerate(params):
        links = links_all[li]
        out_ch = channels[li + 1]
        col = 0
        for j in links:                        # split w1 per link (no concat)
            chj = channels[j]
            w_part = p["w1"][:, col:col + chj]
            inputs.append(w_part)
            in_specs.append(_const_spec(w_part))
            col += chj
        s1 = p["s1"].reshape(out_ch, 1)
        b1 = p["b1"].reshape(out_ch, 1)
        wdw = jnp.transpose(p["wdw"], (1, 0)).reshape(9, out_ch, 1)
        s2 = p["s2"].reshape(out_ch, 1)
        b2 = p["b2"].reshape(out_ch, 1)
        for a in (s1, b1, wdw, s2, b2):
            inputs.append(a)
            in_specs.append(_const_spec(a))

    kernel = _make_kernel(channels, links_all, out_offsets, slab_off, H, W)

    flops = 0
    for li, links in enumerate(links_all):
        cin = sum(channels[j] for j in links)
        cout = channels[li + 1]
        flops += N * HW * (2 * cin * cout + 30 * cout)
    bytes_accessed = (sum(int(np.prod(a.shape)) for a in inputs) * 4
                      + N * out_channels * HW * 4)

    out = pl.pallas_call(
        kernel,
        grid=(N,),
        in_specs=in_specs,
        out_specs=pl.BlockSpec((None, out_channels, HW), lambda n: (n, 0, 0)),
        out_shape=jax.ShapeDtypeStruct((N, out_channels, HW), jnp.float32),
        scratch_shapes=[pltpu.VMEM((slab_rows, HW), jnp.float32)],
        compiler_params=pltpu.CompilerParams(
            dimension_semantics=("parallel",),
            vmem_limit_bytes=32 * 1024 * 1024),
        cost_estimate=pl.CostEstimate(flops=int(flops), transcendentals=0,
                                      bytes_accessed=int(bytes_accessed)),
    )(*inputs)
    return out.reshape(N, out_channels, H, W)


# ----------------------------- pure-JAX reference -----------------------------

def hardblock_reference(x_nchw, params, links_all, keepbase=False):
    feats = [x_nchw]
    for li, p in enumerate(params):
        link = links_all[li]
        tin = [feats[j] for j in link]
        xin = tin[0] if len(tin) == 1 else jnp.concatenate(tin, axis=1)
        y = jnp.einsum("nchw,oc->nohw", xin, p["w1"],
                       precision=lax.Precision.HIGHEST)
        y = y * p["s1"][None, :, None, None] + p["b1"][None, :, None, None]
        y = jnp.maximum(y, 0.0)
        Cc = y.shape[1]
        wdw = p["wdw"].reshape(Cc, 1, 3, 3)
        y = lax.conv_general_dilated(
            y, wdw, window_strides=(1, 1), padding=((1, 1), (1, 1)),
            dimension_numbers=("NCHW", "OIHW", "NCHW"),
            feature_group_count=Cc, precision=lax.Precision.HIGHEST)
        y = y * p["s2"][None, :, None, None] + p["b2"][None, :, None, None]
        feats.append(y)
    t = len(feats)
    outs = [feats[i] for i in range(t)
            if (keepbase and i == 0) or i == t - 1 or i % 2 == 1]
    return jnp.concatenate(outs, axis=1)


# ----------------------------------- main -------------------------------------

if __name__ == "__main__":
    in_channels, k, m, n_layers = 16, 10, 1.6, 4
    N, H, W = 2, 16, 16

    key = jax.random.PRNGKey(0)
    key, kx = jax.random.split(key)
    x = jax.random.normal(kx, (N, in_channels, H, W), jnp.float32)  # NCHW

    channels, links_all, *_ = block_structure(in_channels, k, m, n_layers)
    params = init_hardblock_params(key, channels, links_all)

    out = hardblock_forward(x, params, in_channels=in_channels, k=k, m=m,
                            n_layers=n_layers)
    out = jax.block_until_ready(out)

    ref = jax.block_until_ready(hardblock_reference(x, params, links_all))
    assert out.shape == ref.shape, (out.shape, ref.shape)
    assert jnp.allclose(out, ref, rtol=1e-2, atol=1e-2), (
        "mismatch vs JAX reference, max abs diff "
        + str(float(jnp.max(jnp.abs(out - ref)))))

    print("KERNEL_OK")
</pallas_src>

<mosaic_0001>
module attributes {stable_mosaic.version = 11 : i64} {
  func.func @kernel(%arg0: i32, %arg1: memref<1x16x256xf32, #tpu.memory_space<vmem>>, %arg2: memref<9x1x256xf32, #tpu.memory_space<vmem>>, %arg3: memref<10x16xf32, #tpu.memory_space<vmem>>, %arg4: memref<10x1xf32, #tpu.memory_space<vmem>>, %arg5: memref<10x1xf32, #tpu.memory_space<vmem>>, %arg6: memref<9x10x1xf32, #tpu.memory_space<vmem>>, %arg7: memref<10x1xf32, #tpu.memory_space<vmem>>, %arg8: memref<10x1xf32, #tpu.memory_space<vmem>>, %arg9: memref<16x10xf32, #tpu.memory_space<vmem>>, %arg10: memref<16x16xf32, #tpu.memory_space<vmem>>, %arg11: memref<16x1xf32, #tpu.memory_space<vmem>>, %arg12: memref<16x1xf32, #tpu.memory_space<vmem>>, %arg13: memref<9x16x1xf32, #tpu.memory_space<vmem>>, %arg14: memref<16x1xf32, #tpu.memory_space<vmem>>, %arg15: memref<16x1xf32, #tpu.memory_space<vmem>>, %arg16: memref<10x16xf32, #tpu.memory_space<vmem>>, %arg17: memref<10x1xf32, #tpu.memory_space<vmem>>, %arg18: memref<10x1xf32, #tpu.memory_space<vmem>>, %arg19: memref<9x10x1xf32, #tpu.memory_space<vmem>>, %arg20: memref<10x1xf32, #tpu.memory_space<vmem>>, %arg21: memref<10x1xf32, #tpu.memory_space<vmem>>, %arg22: memref<26x10xf32, #tpu.memory_space<vmem>>, %arg23: memref<26x16xf32, #tpu.memory_space<vmem>>, %arg24: memref<26x16xf32, #tpu.memory_space<vmem>>, %arg25: memref<26x1xf32, #tpu.memory_space<vmem>>, %arg26: memref<26x1xf32, #tpu.memory_space<vmem>>, %arg27: memref<9x26x1xf32, #tpu.memory_space<vmem>>, %arg28: memref<26x1xf32, #tpu.memory_space<vmem>>, %arg29: memref<26x1xf32, #tpu.memory_space<vmem>>, %arg30: memref<1x46x256xf32, #tpu.memory_space<vmem>>, %arg31: memref<48x256xf32, #tpu.memory_space<vmem>>) attributes {dimension_semantics = [#tpu.dimension_semantics<parallel>], iteration_bounds = array<i64: 2>, scalar_prefetch = 0 : i64, scratch_operands = 1 : i64, tpu.core_type = #tpu.core_type<tc>, window_params = [{transform_indices = @transform_0, window_bounds = array<i64: 1, 16, 256>}, {pipeline_mode = #tpu.pipeline_mode<synchronous>, transform_indices = @transform_1, window_bounds = array<i64: 9, 1, 256>}, {pipeline_mode = #tpu.pipeline_mode<synchronous>, transform_indices = @transform_2, window_bounds = array<i64: 10, 16>}, {pipeline_mode = #tpu.pipeline_mode<synchronous>, transform_indices = @transform_3, window_bounds = array<i64: 10, 1>}, {pipeline_mode = #tpu.pipeline_mode<synchronous>, transform_indices = @transform_4, window_bounds = array<i64: 10, 1>}, {pipeline_mode = #tpu.pipeline_mode<synchronous>, transform_indices = @transform_5, window_bounds = array<i64: 9, 10, 1>}, {pipeline_mode = #tpu.pipeline_mode<synchronous>, transform_indices = @transform_6, window_bounds = array<i64: 10, 1>}, {pipeline_mode = #tpu.pipeline_mode<synchronous>, transform_indices = @transform_7, window_bounds = array<i64: 10, 1>}, {pipeline_mode = #tpu.pipeline_mode<synchronous>, transform_indices = @transform_8, window_bounds = array<i64: 16, 10>}, {pipeline_mode = #tpu.pipeline_mode<synchronous>, transform_indices = @transform_9, window_bounds = array<i64: 16, 16>}, {pipeline_mode = #tpu.pipeline_mode<synchronous>, transform_indices = @transform_10, window_bounds = array<i64: 16, 1>}, {pipeline_mode = #tpu.pipeline_mode<synchronous>, transform_indices = @transform_11, window_bounds = array<i64: 16, 1>}, {pipeline_mode = #tpu.pipeline_mode<synchronous>, transform_indices = @transform_12, window_bounds = array<i64: 9, 16, 1>}, {pipeline_mode = #tpu.pipeline_mode<synchronous>, transform_indices = @transform_13, window_bounds = array<i64: 16, 1>}, {pipeline_mode = #tpu.pipeline_mode<synchronous>, transform_indices = @transform_14, window_bounds = array<i64: 16, 1>}, {pipeline_mode = #tpu.pipeline_mode<synchronous>, transform_indices = @transform_15, window_bounds = array<i64: 10, 16>}, {pipeline_mode = #tpu.pipeline_mode<synchronous>, transform_indices = @transform_16, window_bounds = array<i64: 10, 1>}, {pipeline_mode = #tpu.pipeline_mode<synchronous>, transform_indices = @transform_17, window_bounds = array<i64: 10, 1>}, {pipeline_mode = #tpu.pipeline_mode<synchronous>, transform_indices = @transform_18, window_bounds = array<i64: 9, 10, 1>}, {pipeline_mode = #tpu.pipeline_mode<synchronous>, transform_indices = @transform_19, window_bounds = array<i64: 10, 1>}, {pipeline_mode = #tpu.pipeline_mode<synchronous>, transform_indices = @transform_20, window_bounds = array<i64: 10, 1>}, {pipeline_mode = #tpu.pipeline_mode<synchronous>, transform_indices = @transform_21, window_bounds = array<i64: 26, 10>}, {pipeline_mode = #tpu.pipeline_mode<synchronous>, transform_indices = @transform_22, window_bounds = array<i64: 26, 16>}, {pipeline_mode = #tpu.pipeline_mode<synchronous>, transform_indices = @transform_23, window_bounds = array<i64: 26, 16>}, {pipeline_mode = #tpu.pipeline_mode<synchronous>, transform_indices = @transform_24, window_bounds = array<i64: 26, 1>}, {pipeline_mode = #tpu.pipeline_mode<synchronous>, transform_indices = @transform_25, window_bounds = array<i64: 26, 1>}, {pipeline_mode = #tpu.pipeline_mode<synchronous>, transform_indices = @transform_26, window_bounds = array<i64: 9, 26, 1>}, {pipeline_mode = #tpu.pipeline_mode<synchronous>, transform_indices = @transform_27, window_bounds = array<i64: 26, 1>}, {pipeline_mode = #tpu.pipeline_mode<synchronous>, transform_indices = @transform_28, window_bounds = array<i64: 26, 1>}, {transform_indices = @transform_29, window_bounds = array<i64: 1, 46, 256>}]} {
    %c0 = arith.constant 0 : index
    %c0_0 = arith.constant 0 : index
    %c0_1 = arith.constant 0 : index
    %0 = vector.load %arg1[%c0, %c0_0, %c0_1] : memref<1x16x256xf32, #tpu.memory_space<vmem>>, vector<1x16x256xf32>
    %1 = vector.shape_cast %0 : vector<1x16x256xf32> to vector<16x256xf32>
    %c0_2 = arith.constant 0 : index
    %c0_3 = arith.constant 0 : index
    %2 = vector.load %arg3[%c0_2, %c0_3] : memref<10x16xf32, #tpu.memory_space<vmem>>, vector<10x16xf32>
    %cst = arith.constant dense<0.000000e+00> : vector<10x256xf32>
    %3 = tpu.matmul %2, %1, %cst {dimension_numbers = #tpu.dot_dimension_numbers<[1], [0], [0], [1], [0, 0, 1, 1], [], []>} : vector<10x16xf32>, vector<16x256xf32>, vector<10x256xf32> -> vector<10x256xf32>
    %c0_4 = arith.constant 0 : index
    %c0_5 = arith.constant 0 : index
    %4 = vector.load %arg4[%c0_4, %c0_5] : memref<10x1xf32, #tpu.memory_space<vmem>>, vector<10x1xf32>
    %5 = vector.broadcast %4 : vector<10x1xf32> to vector<10x256xf32>
    %6 = arith.mulf %3, %5 : vector<10x256xf32>
    %c0_6 = arith.constant 0 : index
    %c0_7 = arith.constant 0 : index
    %7 = vector.load %arg5[%c0_6, %c0_7] : memref<10x1xf32, #tpu.memory_space<vmem>>, vector<10x1xf32>
    %8 = vector.broadcast %7 : vector<10x1xf32> to vector<10x256xf32>
    %9 = arith.addf %6, %8 : vector<10x256xf32>
    %cst_8 = arith.constant 0.000000e+00 : f32
    %10 = vector.broadcast %cst_8 : f32 to vector<10x256xf32>
    %11 = arith.maximumf %9, %10 : vector<10x256xf32>
    %c17_i32 = arith.constant 17 : i32
    %12 = tpu.dynamic_rotate %11 by %c17_i32 dim 1 : vector<10x256xf32>, i32 -> vector<10x256xf32>
    %c0_9 = arith.constant 0 : index
    %c0_10 = arith.constant 0 : index
    %c0_11 = arith.constant 0 : index
    %13 = vector.load %arg6[%c0_9, %c0_10, %c0_11] : memref<9x10x1xf32, #tpu.memory_space<vmem>>, vector<1x10x1xf32>
    %14 = vector.shape_cast %13 : vector<1x10x1xf32> to vector<10x1xf32>
    %15 = vector.broadcast %14 : vector<10x1xf32> to vector<10x256xf32>
    %16 = arith.mulf %12, %15 : vector<10x256xf32>
    %c0_12 = arith.constant 0 : index
    %c0_13 = arith.constant 0 : index
    %c0_14 = arith.constant 0 : index
    %17 = vector.load %arg2[%c0_12, %c0_13, %c0_14] : memref<9x1x256xf32, #tpu.memory_space<vmem>>, vector<1x1x256xf32>
    %18 = vector.shape_cast %17 : vector<1x1x256xf32> to vector<1x256xf32>
    %19 = vector.broadcast %18 : vector<1x256xf32> to vector<10x256xf32>
    %20 = arith.mulf %16, %19 : vector<10x256xf32>
    %c16_i32 = arith.constant 16 : i32
    %21 = tpu.dynamic_rotate %11 by %c16_i32 dim 1 : vector<10x256xf32>, i32 -> vector<10x256xf32>
    %c1 = arith.constant 1 : index
    %c0_15 = arith.constant 0 : index
    %c0_16 = arith.constant 0 : index
    %22 = vector.load %arg6[%c1, %c0_15, %c0_16] : memref<9x10x1xf32, #tpu.memory_space<vmem>>, vector<1x10x1xf32>
    %23 = vector.shape_cast %22 : vector<1x10x1xf32> to vector<10x1xf32>
    %24 = vector.broadcast %23 : vector<10x1xf32> to vector<10x256xf32>
    %25 = arith.mulf %21, %24 : vector<10x256xf32>
    %c1_17 = arith.constant 1 : index
    %c0_18 = arith.constant 0 : index
    %c0_19 = arith.constant 0 : index
    %26 = vector.load %arg2[%c1_17, %c0_18, %c0_19] : memref<9x1x256xf32, #tpu.memory_space<vmem>>, vector<1x1x256xf32>
    %27 = vector.shape_cast %26 : vector<1x1x256xf32> to vector<1x256xf32>
    %28 = vector.broadcast %27 : vector<1x256xf32> to vector<10x256xf32>
    %29 = arith.mulf %25, %28 : vector<10x256xf32>
    %30 = arith.addf %20, %29 : vector<10x256xf32>
    %c15_i32 = arith.constant 15 : i32
    %31 = tpu.dynamic_rotate %11 by %c15_i32 dim 1 : vector<10x256xf32>, i32 -> vector<10x256xf32>
    %c2 = arith.constant 2 : index
    %c0_20 = arith.constant 0 : index
    %c0_21 = arith.constant 0 : index
    %32 = vector.load %arg6[%c2, %c0_20, %c0_21] : memref<9x10x1xf32, #tpu.memory_space<vmem>>, vector<1x10x1xf32>
    %33 = vector.shape_cast %32 : vector<1x10x1xf32> to vector<10x1xf32>
    %34 = vector.broadcast %33 : vector<10x1xf32> to vector<10x256xf32>
    %35 = arith.mulf %31, %34 : vector<10x256xf32>
    %c2_22 = arith.constant 2 : index
    %c0_23 = arith.constant 0 : index
    %c0_24 = arith.constant 0 : index
    %36 = vector.load %arg2[%c2_22, %c0_23, %c0_24] : memref<9x1x256xf32, #tpu.memory_space<vmem>>, vector<1x1x256xf32>
    %37 = vector.shape_cast %36 : vector<1x1x256xf32> to vector<1x256xf32>
    %38 = vector.broadcast %37 : vector<1x256xf32> to vector<10x256xf32>
    %39 = arith.mulf %35, %38 : vector<10x256xf32>
    %40 = arith.addf %30, %39 : vector<10x256xf32>
    %c1_i32 = arith.constant 1 : i32
    %41 = tpu.dynamic_rotate %11 by %c1_i32 dim 1 : vector<10x256xf32>, i32 -> vector<10x256xf32>
    %c3 = arith.constant 3 : index
    %c0_25 = arith.constant 0 : index
    %c0_26 = arith.constant 0 : index
    %42 = vector.load %arg6[%c3, %c0_25, %c0_26] : memref<9x10x1xf32, #tpu.memory_space<vmem>>, vector<1x10x1xf32>
    %43 = vector.shape_cast %42 : vector<1x10x1xf32> to vector<10x1xf32>
    %44 = vector.broadcast %43 : vector<10x1xf32> to vector<10x256xf32>
    %45 = arith.mulf %41, %44 : vector<10x256xf32>
    %c3_27 = arith.constant 3 : index
    %c0_28 = arith.constant 0 : index
    %c0_29 = arith.constant 0 : index
    %46 = vector.load %arg2[%c3_27, %c0_28, %c0_29] : memref<9x1x256xf32, #tpu.memory_space<vmem>>, vector<1x1x256xf32>
    %47 = vector.shape_cast %46 : vector<1x1x256xf32> to vector<1x256xf32>
    %48 = vector.broadcast %47 : vector<1x256xf32> to vector<10x256xf32>
    %49 = arith.mulf %45, %48 : vector<10x256xf32>
    %50 = arith.addf %40, %49 : vector<10x256xf32>
    %c4 = arith.constant 4 : index
    %c0_30 = arith.constant 0 : index
    %c0_31 = arith.constant 0 : index
    %51 = vector.load %arg6[%c4, %c0_30, %c0_31] : memref<9x10x1xf32, #tpu.memory_space<vmem>>, vector<1x10x1xf32>
    %52 = vector.shape_cast %51 : vector<1x10x1xf32> to vector<10x1xf32>
    %53 = vector.broadcast %52 : vector<10x1xf32> to vector<10x256xf32>
    %54 = arith.mulf %11, %53 : vector<10x256xf32>
    %55 = arith.addf %50, %54 : vector<10x256xf32>
    %c255_i32 = arith.constant 255 : i32
    %56 = tpu.dynamic_rotate %11 by %c255_i32 dim 1 : vector<10x256xf32>, i32 -> vector<10x256xf32>
    %c5 = arith.constant 5 : index
    %c0_32 = arith.constant 0 : index
    %c0_33 = arith.constant 0 : index
    %57 = vector.load %arg6[%c5, %c0_32, %c0_33] : memref<9x10x1xf32, #tpu.memory_space<vmem>>, vector<1x10x1xf32>
    %58 = vector.shape_cast %57 : vector<1x10x1xf32> to vector<10x1xf32>
    %59 = vector.broadcast %58 : vector<10x1xf32> to vector<10x256xf32>
    %60 = arith.mulf %56, %59 : vector<10x256xf32>
    %c5_34 = arith.constant 5 : index
    %c0_35 = arith.constant 0 : index
    %c0_36 = arith.constant 0 : index
    %61 = vector.load %arg2[%c5_34, %c0_35, %c0_36] : memref<9x1x256xf32, #tpu.memory_space<vmem>>, vector<1x1x256xf32>
    %62 = vector.shape_cast %61 : vector<1x1x256xf32> to vector<1x256xf32>
    %63 = vector.broadcast %62 : vector<1x256xf32> to vector<10x256xf32>
    %64 = arith.mulf %60, %63 : vector<10x256xf32>
    %65 = arith.addf %55, %64 : vector<10x256xf32>
    %c241_i32 = arith.constant 241 : i32
    %66 = tpu.dynamic_rotate %11 by %c241_i32 dim 1 : vector<10x256xf32>, i32 -> vector<10x256xf32>
    %c6 = arith.constant 6 : index
    %c0_37 = arith.constant 0 : index
    %c0_38 = arith.constant 0 : index
    %67 = vector.load %arg6[%c6, %c0_37, %c0_38] : memref<9x10x1xf32, #tpu.memory_space<vmem>>, vector<1x10x1xf32>
    %68 = vector.shape_cast %67 : vector<1x10x1xf32> to vector<10x1xf32>
    %69 = vector.broadcast %68 : vector<10x1xf32> to vector<10x256xf32>
    %70 = arith.mulf %66, %69 : vector<10x256xf32>
    %c6_39 = arith.constant 6 : index
    %c0_40 = arith.constant 0 : index
    %c0_41 = arith.constant 0 : index
    %71 = vector.load %arg2[%c6_39, %c0_40, %c0_41] : memref<9x1x256xf32, #tpu.memory_space<vmem>>, vector<1x1x256xf32>
    %72 = vector.shape_cast %71 : vector<1x1x256xf32> to vector<1x256xf32>
    %73 = vector.broadcast %72 : vector<1x256xf32> to vector<10x256xf32>
    %74 = arith.mulf %70, %73 : vector<10x256xf32>
    %75 = arith.addf %65, %74 : vector<10x256xf32>
    %c240_i32 = arith.constant 240 : i32
    %76 = tpu.dynamic_rotate %11 by %c240_i32 dim 1 : vector<10x256xf32>, i32 -> vector<10x256xf32>
    %c7 = arith.constant 7 : index
    %c0_42 = arith.constant 0 : index
    %c0_43 = arith.constant 0 : index
    %77 = vector.load %arg6[%c7, %c0_42, %c0_43] : memref<9x10x1xf32, #tpu.memory_space<vmem>>, vector<1x10x1xf32>
    %78 = vector.shape_cast %77 : vector<1x10x1xf32> to vector<10x1xf32>
    %79 = vector.broadcast %78 : vector<10x1xf32> to vector<10x256xf32>
    %80 = arith.mulf %76, %79 : vector<10x256xf32>
    %c7_44 = arith.constant 7 : index
    %c0_45 = arith.constant 0 : index
    %c0_46 = arith.constant 0 : index
    %81 = vector.load %arg2[%c7_44, %c0_45, %c0_46] : memref<9x1x256xf32, #tpu.memory_space<vmem>>, vector<1x1x256xf32>
    %82 = vector.shape_cast %81 : vector<1x1x256xf32> to vector<1x256xf32>
    %83 = vector.broadcast %82 : vector<1x256xf32> to vector<10x256xf32>
    %84 = arith.mulf %80, %83 : vector<10x256xf32>
    %85 = arith.addf %75, %84 : vector<10x256xf32>
    %c239_i32 = arith.constant 239 : i32
    %86 = tpu.dynamic_rotate %11 by %c239_i32 dim 1 : vector<10x256xf32>, i32 -> vector<10x256xf32>
    %c8 = arith.constant 8 : index
    %c0_47 = arith.constant 0 : index
    %c0_48 = arith.constant 0 : index
    %87 = vector.load %arg6[%c8, %c0_47, %c0_48] : memref<9x10x1xf32, #tpu.memory_space<vmem>>, vector<1x10x1xf32>
    %88 = vector.shape_cast %87 : vector<1x10x1xf32> to vector<10x1xf32>
    %89 = vector.broadcast %88 : vector<10x1xf32> to vector<10x256xf32>
    %90 = arith.mulf %86, %89 : vector<10x256xf32>
    %c8_49 = arith.constant 8 : index
    %c0_50 = arith.constant 0 : index
    %c0_51 = arith.constant 0 : index
    %91 = vector.load %arg2[%c8_49, %c0_50, %c0_51] : memref<9x1x256xf32, #tpu.memory_space<vmem>>, vector<1x1x256xf32>
    %92 = vector.shape_cast %91 : vector<1x1x256xf32> to vector<1x256xf32>
    %93 = vector.broadcast %92 : vector<1x256xf32> to vector<10x256xf32>
    %94 = arith.mulf %90, %93 : vector<10x256xf32>
    %95 = arith.addf %85, %94 : vector<10x256xf32>
    %c0_52 = arith.constant 0 : index
    %c0_53 = arith.constant 0 : index
    %96 = vector.load %arg7[%c0_52, %c0_53] : memref<10x1xf32, #tpu.memory_space<vmem>>, vector<10x1xf32>
    %97 = vector.broadcast %96 : vector<10x1xf32> to vector<10x256xf32>
    %98 = arith.mulf %95, %97 : vector<10x256xf32>
    %c0_54 = arith.constant 0 : index
    %c0_55 = arith.constant 0 : index
    %99 = vector.load %arg8[%c0_54, %c0_55] : memref<10x1xf32, #tpu.memory_space<vmem>>, vector<10x1xf32>
    %100 = vector.broadcast %99 : vector<10x1xf32> to vector<10x256xf32>
    %101 = arith.addf %98, %100 : vector<10x256xf32>
    %c0_56 = arith.constant 0 : index
    %c0_57 = arith.constant 0 : index
    %102 = vector.load %arg31[%c0_56, %c0_57] : memref<48x256xf32, #tpu.memory_space<vmem>>, vector<10x256xf32>
    tpu.vector_store %arg31[%c0_56, %c0_57], %101 {strides = array<i32>} : memref<48x256xf32, #tpu.memory_space<vmem>>, vector<10x256xf32>,
    %c0_58 = arith.constant 0 : index
    %c0_59 = arith.constant 0 : index
    %c0_60 = arith.constant 0 : index
    %103 = vector.load %arg30[%c0_58, %c0_59, %c0_60] : memref<1x46x256xf32, #tpu.memory_space<vmem>>, vector<1x10x256xf32>
    %104 = vector.shape_cast %103 : vector<1x10x256xf32> to vector<10x256xf32>
    %105 = vector.shape_cast %101 : vector<10x256xf32> to vector<1x10x256xf32>
    tpu.vector_store %arg30[%c0_58, %c0_59, %c0_60], %105 {strides = array<i32>} : memref<1x46x256xf32, #tpu.memory_space<vmem>>, vector<1x10x256xf32>,
    %c0_61 = arith.constant 0 : index
    %c0_62 = arith.constant 0 : index
    %106 = vector.load %arg31[%c0_61, %c0_62] : memref<48x256xf32, #tpu.memory_space<vmem>>, vector<10x256xf32>
    %c0_63 = arith.constant 0 : index
    %c0_64 = arith.constant 0 : index
    %107 = vector.load %arg9[%c0_63, %c0_64] : memref<16x10xf32, #tpu.memory_space<vmem>>, vector<16x10xf32>
    %cst_65 = arith.constant dense<0.000000e+00> : vector<16x256xf32>
    %108 = tpu.matmul %107, %106, %cst_65 {dimension_numbers = #tpu.dot_dimension_numbers<[1], [0], [0], [1], [0, 0, 1, 1], [], []>} : vector<16x10xf32>, vector<10x256xf32>, vector<16x256xf32> -> vector<16x256xf32>
    %c0_66 = arith.constant 0 : index
    %c0_67 = arith.constant 0 : index
    %109 = vector.load %arg10[%c0_66, %c0_67] : memref<16x16xf32, #tpu.memory_space<vmem>>, vector<16x16xf32>
    %cst_68 = arith.constant dense<0.000000e+00> : vector<16x256xf32>
    %110 = tpu.matmul %109, %1, %cst_68 {dimension_numbers = #tpu.dot_dimension_numbers<[1], [0], [0], [1], [0, 0, 1, 1], [], []>} : vector<16x16xf32>, vector<16x256xf32>, vector<16x256xf32> -> vector<16x256xf32>
    %111 = arith.addf %108, %110 : vector<16x256xf32>
    %c0_69 = arith.constant 0 : index
    %c0_70 = arith.constant 0 : index
    %112 = vector.load %arg11[%c0_69, %c0_70] : memref<16x1xf32, #tpu.memory_space<vmem>>, vector<16x1xf32>
    %113 = vector.broadcast %112 : vector<16x1xf32> to vector<16x256xf32>
    %114 = arith.mulf %111, %113 : vector<16x256xf32>
    %c0_71 = arith.constant 0 : index
    %c0_72 = arith.constant 0 : index
    %115 = vector.load %arg12[%c0_71, %c0_72] : memref<16x1xf32, #tpu.memory_space<vmem>>, vector<16x1xf32>
    %116 = vector.broadcast %115 : vector<16x1xf32> to vector<16x256xf32>
    %117 = arith.addf %114, %116 : vector<16x256xf32>
    %cst_73 = arith.constant 0.000000e+00 : f32
    %118 = vector.broadcast %cst_73 : f32 to vector<16x256xf32>
    %119 = arith.maximumf %117, %118 : vector<16x256xf32>
    %c17_i32_74 = arith.constant 17 : i32
    %120 = tpu.dynamic_rotate %119 by %c17_i32_74 dim 1 : vector<16x256xf32>, i32 -> vector<16x256xf32>
    %c0_75 = arith.constant 0 : index
    %c0_76 = arith.constant 0 : index
    %c0_77 = arith.constant 0 : index
    %121 = vector.load %arg13[%c0_75, %c0_76, %c0_77] : memref<9x16x1xf32, #tpu.memory_space<vmem>>, vector<1x16x1xf32>
    %122 = vector.shape_cast %121 : vector<1x16x1xf32> to vector<16x1xf32>
    %123 = vector.broadcast %122 : vector<16x1xf32> to vector<16x256xf32>
    %124 = arith.mulf %120, %123 : vector<16x256xf32>
    %c0_78 = arith.constant 0 : index
    %c0_79 = arith.constant 0 : index
    %c0_80 = arith.constant 0 : index
    %125 = vector.load %arg2[%c0_78, %c0_79, %c0_80] : memref<9x1x256xf32, #tpu.memory_space<vmem>>, vector<1x1x256xf32>
    %126 = vector.shape_cast %125 : vector<1x1x256xf32> to vector<1x256xf32>
    %127 = vector.broadcast %126 : vector<1x256xf32> to vector<16x256xf32>
    %128 = arith.mulf %124, %127 : vector<16x256xf32>
    %c16_i32_81 = arith.constant 16 : i32
    %129 = tpu.dynamic_rotate %119 by %c16_i32_81 dim 1 : vector<16x256xf32>, i32 -> vector<16x256xf32>
    %c1_82 = arith.constant 1 : index
    %c0_83 = arith.constant 0 : index
    %c0_84 = arith.constant 0 : index
    %130 = vector.load %arg13[%c1_82, %c0_83, %c0_84] : memref<9x16x1xf32, #tpu.memory_space<vmem>>, vector<1x16x1xf32>
    %131 = vector.shape_cast %130 : vector<1x16x1xf32> to vector<16x1xf32>
    %132 = vector.broadcast %131 : vector<16x1xf32> to vector<16x256xf32>
    %133 = arith.mulf %129, %132 : vector<16x256xf32>
    %c1_85 = arith.constant 1 : index
    %c0_86 = arith.constant 0 : index
    %c0_87 = arith.constant 0 : index
    %134 = vector.load %arg2[%c1_85, %c0_86, %c0_87] : memref<9x1x256xf32, #tpu.memory_space<vmem>>, vector<1x1x256xf32>
    %135 = vector.shape_cast %134 : vector<1x1x256xf32> to vector<1x256xf32>
    %136 = vector.broadcast %135 : vector<1x256xf32> to vector<16x256xf32>
    %137 = arith.mulf %133, %136 : vector<16x256xf32>
    %138 = arith.addf %128, %137 : vector<16x256xf32>
    %c15_i32_88 = arith.constant 15 : i32
    %139 = tpu.dynamic_rotate %119 by %c15_i32_88 dim 1 : vector<16x256xf32>, i32 -> vector<16x256xf32>
    %c2_89 = arith.constant 2 : index
    %c0_90 = arith.constant 0 : index
    %c0_91 = arith.constant 0 : index
    %140 = vector.load %arg13[%c2_89, %c0_90, %c0_91] : memref<9x16x1xf32, #tpu.memory_space<vmem>>, vector<1x16x1xf32>
    %141 = vector.shape_cast %140 : vector<1x16x1xf32> to vector<16x1xf32>
    %142 = vector.broadcast %141 : vector<16x1xf32> to vector<16x256xf32>
    %143 = arith.mulf %139, %142 : vector<16x256xf32>
    %c2_92 = arith.constant 2 : index
    %c0_93 = arith.constant 0 : index
    %c0_94 = arith.constant 0 : index
    %144 = vector.load %arg2[%c2_92, %c0_93, %c0_94] : memref<9x1x256xf32, #tpu.memory_space<vmem>>, vector<1x1x256xf32>
    %145 = vector.shape_cast %144 : vector<1x1x256xf32> to vector<1x256xf32>
    %146 = vector.broadcast %145 : vector<1x256xf32> to vector<16x256xf32>
    %147 = arith.mulf %143, %146 : vector<16x256xf32>
    %148 = arith.addf %138, %147 : vector<16x256xf32>
    %c1_i32_95 = arith.constant 1 : i32
    %149 = tpu.dynamic_rotate %119 by %c1_i32_95 dim 1 : vector<16x256xf32>, i32 -> vector<16x256xf32>
    %c3_96 = arith.constant 3 : index
    %c0_97 = arith.constant 0 : index
    %c0_98 = arith.constant 0 : index
    %150 = vector.load %arg13[%c3_96, %c0_97, %c0_98] : memref<9x16x1xf32, #tpu.memory_space<vmem>>, vector<1x16x1xf32>
    %151 = vector.shape_cast %150 : vector<1x16x1xf32> to vector<16x1xf32>
    %152 = vector.broadcast %151 : vector<16x1xf32> to vector<16x256xf32>
    %153 = arith.mulf %149, %152 : vector<16x256xf32>
    %c3_99 = arith.constant 3 : index
    %c0_100 = arith.constant 0 : index
    %c0_101 = arith.constant 0 : index
    %154 = vector.load %arg2[%c3_99, %c0_100, %c0_101] : memref<9x1x256xf32, #tpu.memory_space<vmem>>, vector<1x1x256xf32>
    %155 = vector.shape_cast %154 : vector<1x1x256xf32> to vector<1x256xf32>
    %156 = vector.broadcast %155 : vector<1x256xf32> to vector<16x256xf32>
    %157 = arith.mulf %153, %156 : vector<16x256xf32>
    %158 = arith.addf %148, %157 : vector<16x256xf32>
    %c4_102 = arith.constant 4 : index
    %c0_103 = arith.constant 0 : index
    %c0_104 = arith.constant 0 : index
    %159 = vector.load %arg13[%c4_102, %c0_103, %c0_104] : memref<9x16x1xf32, #tpu.memory_space<vmem>>, vector<1x16x1xf32>
    %160 = vector.shape_cast %159 : vector<1x16x1xf32> to vector<16x1xf32>
    %161 = vector.broadcast %160 : vector<16x1xf32> to vector<16x256xf32>
    %162 = arith.mulf %119, %161 : vector<16x256xf32>
    %163 = arith.addf %158, %162 : vector<16x256xf32>
    %c255_i32_105 = arith.constant 255 : i32
    %164 = tpu.dynamic_rotate %119 by %c255_i32_105 dim 1 : vector<16x256xf32>, i32 -> vector<16x256xf32>
    %c5_106 = arith.constant 5 : index
    %c0_107 = arith.constant 0 : index
    %c0_108 = arith.constant 0 : index
    %165 = vector.load %arg13[%c5_106, %c0_107, %c0_108] : memref<9x16x1xf32, #tpu.memory_space<vmem>>, vector<1x16x1xf32>
    %166 = vector.shape_cast %165 : vector<1x16x1xf32> to vector<16x1xf32>
    %167 = vector.broadcast %166 : vector<16x1xf32> to vector<16x256xf32>
    %168 = arith.mulf %164, %167 : vector<16x256xf32>
    %c5_109 = arith.constant 5 : index
    %c0_110 = arith.constant 0 : index
    %c0_111 = arith.constant 0 : index
    %169 = vector.load %arg2[%c5_109, %c0_110, %c0_111] : memref<9x1x256xf32, #tpu.memory_space<vmem>>, vector<1x1x256xf32>
    %170 = vector.shape_cast %169 : vector<1x1x256xf32> to vector<1x256xf32>
    %171 = vector.broadcast %170 : vector<1x256xf32> to vector<16x256xf32>
    %172 = arith.mulf %168, %171 : vector<16x256xf32>
    %173 = arith.addf %163, %172 : vector<16x256xf32>
    %c241_i32_112 = arith.constant 241 : i32
    %174 = tpu.dynamic_rotate %119 by %c241_i32_112 dim 1 : vector<16x256xf32>, i32 -> vector<16x256xf32>
    %c6_113 = arith.constant 6 : index
    %c0_114 = arith.constant 0 : index
    %c0_115 = arith.constant 0 : index
    %175 = vector.load %arg13[%c6_113, %c0_114, %c0_115] : memref<9x16x1xf32, #tpu.memory_space<vmem>>, vector<1x16x1xf32>
    %176 = vector.shape_cast %175 : vector<1x16x1xf32> to vector<16x1xf32>
    %177 = vector.broadcast %176 : vector<16x1xf32> to vector<16x256xf32>
    %178 = arith.mulf %174, %177 : vector<16x256xf32>
    %c6_116 = arith.constant 6 : index
    %c0_117 = arith.constant 0 : index
    %c0_118 = arith.constant 0 : index
    %179 = vector.load %arg2[%c6_116, %c0_117, %c0_118] : memref<9x1x256xf32, #tpu.memory_space<vmem>>, vector<1x1x256xf32>
    %180 = vector.shape_cast %179 : vector<1x1x256xf32> to vector<1x256xf32>
    %181 = vector.broadcast %180 : vector<1x256xf32> to vector<16x256xf32>
    %182 = arith.mulf %178, %181 : vector<16x256xf32>
    %183 = arith.addf %173, %182 : vector<16x256xf32>
    %c240_i32_119 = arith.constant 240 : i32
    %184 = tpu.dynamic_rotate %119 by %c240_i32_119 dim 1 : vector<16x256xf32>, i32 -> vector<16x256xf32>
    %c7_120 = arith.constant 7 : index
    %c0_121 = arith.constant 0 : index
    %c0_122 = arith.constant 0 : index
    %185 = vector.load %arg13[%c7_120, %c0_121, %c0_122] : memref<9x16x1xf32, #tpu.memory_space<vmem>>, vector<1x16x1xf32>
    %186 = vector.shape_cast %185 : vector<1x16x1xf32> to vector<16x1xf32>
    %187 = vector.broadcast %186 : vector<16x1xf32> to vector<16x256xf32>
    %188 = arith.mulf %184, %187 : vector<16x256xf32>
    %c7_123 = arith.constant 7 : index
    %c0_124 = arith.constant 0 : index
    %c0_125 = arith.constant 0 : index
    %189 = vector.load %arg2[%c7_123, %c0_124, %c0_125] : memref<9x1x256xf32, #tpu.memory_space<vmem>>, vector<1x1x256xf32>
    %190 = vector.shape_cast %189 : vector<1x1x256xf32> to vector<1x256xf32>
    %191 = vector.broadcast %190 : vector<1x256xf32> to vector<16x256xf32>
    %192 = arith.mulf %188, %191 : vector<16x256xf32>
    %193 = arith.addf %183, %192 : vector<16x256xf32>
    %c239_i32_126 = arith.constant 239 : i32
    %194 = tpu.dynamic_rotate %119 by %c239_i32_126 dim 1 : vector<16x256xf32>, i32 -> vector<16x256xf32>
    %c8_127 = arith.constant 8 : index
    %c0_128 = arith.constant 0 : index
    %c0_129 = arith.constant 0 : index
    %195 = vector.load %arg13[%c8_127, %c0_128, %c0_129] : memref<9x16x1xf32, #tpu.memory_space<vmem>>, vector<1x16x1xf32>
    %196 = vector.shape_cast %195 : vector<1x16x1xf32> to vector<16x1xf32>
    %197 = vector.broadcast %196 : vector<16x1xf32> to vector<16x256xf32>
    %198 = arith.mulf %194, %197 : vector<16x256xf32>
    %c8_130 = arith.constant 8 : index
    %c0_131 = arith.constant 0 : index
    %c0_132 = arith.constant 0 : index
    %199 = vector.load %arg2[%c8_130, %c0_131, %c0_132] : memref<9x1x256xf32, #tpu.memory_space<vmem>>, vector<1x1x256xf32>
    %200 = vector.shape_cast %199 : vector<1x1x256xf32> to vector<1x256xf32>
    %201 = vector.broadcast %200 : vector<1x256xf32> to vector<16x256xf32>
    %202 = arith.mulf %198, %201 : vector<16x256xf32>
    %203 = arith.addf %193, %202 : vector<16x256xf32>
    %c0_133 = arith.constant 0 : index
    %c0_134 = arith.constant 0 : index
    %204 = vector.load %arg14[%c0_133, %c0_134] : memref<16x1xf32, #tpu.memory_space<vmem>>, vector<16x1xf32>
    %205 = vector.broadcast %204 : vector<16x1xf32> to vector<16x256xf32>
    %206 = arith.mulf %203, %205 : vector<16x256xf32>
    %c0_135 = arith.constant 0 : index
    %c0_136 = arith.constant 0 : index
    %207 = vector.load %arg15[%c0_135, %c0_136] : memref<16x1xf32, #tpu.memory_space<vmem>>, vector<16x1xf32>
    %208 = vector.broadcast %207 : vector<16x1xf32> to vector<16x256xf32>
    %209 = arith.addf %206, %208 : vector<16x256xf32>
    %c16 = arith.constant 16 : index
    %c0_137 = arith.constant 0 : index
    %210 = vector.load %arg31[%c16, %c0_137] : memref<48x256xf32, #tpu.memory_space<vmem>>, vector<16x256xf32>
    tpu.vector_store %arg31[%c16, %c0_137], %209 {strides = array<i32>} : memref<48x256xf32, #tpu.memory_space<vmem>>, vector<16x256xf32>,
    %c16_138 = arith.constant 16 : index
    %c0_139 = arith.constant 0 : index
    %211 = vector.load %arg31[%c16_138, %c0_139] : memref<48x256xf32, #tpu.memory_space<vmem>>, vector<16x256xf32>
    %c0_140 = arith.constant 0 : index
    %c0_141 = arith.constant 0 : index
    %212 = vector.load %arg16[%c0_140, %c0_141] : memref<10x16xf32, #tpu.memory_space<vmem>>, vector<10x16xf32>
    %cst_142 = arith.constant dense<0.000000e+00> : vector<10x256xf32>
    %213 = tpu.matmul %212, %211, %cst_142 {dimension_numbers = #tpu.dot_dimension_numbers<[1], [0], [0], [1], [0, 0, 1, 1], [], []>} : vector<10x16xf32>, vector<16x256xf32>, vector<10x256xf32> -> vector<10x256xf32>
    %c0_143 = arith.constant 0 : index
    %c0_144 = arith.constant 0 : index
    %214 = vector.load %arg17[%c0_143, %c0_144] : memref<10x1xf32, #tpu.memory_space<vmem>>, vector<10x1xf32>
    %215 = vector.broadcast %214 : vector<10x1xf32> to vector<10x256xf32>
    %216 = arith.mulf %213, %215 : vector<10x256xf32>
    %c0_145 = arith.constant 0 : index
    %c0_146 = arith.constant 0 : index
    %217 = vector.load %arg18[%c0_145, %c0_146] : memref<10x1xf32, #tpu.memory_space<vmem>>, vector<10x1xf32>
    %218 = vector.broadcast %217 : vector<10x1xf32> to vector<10x256xf32>
    %219 = arith.addf %216, %218 : vector<10x256xf32>
    %cst_147 = arith.constant 0.000000e+00 : f32
    %220 = vector.broadcast %cst_147 : f32 to vector<10x256xf32>
    %221 = arith.maximumf %219, %220 : vector<10x256xf32>
    %c17_i32_148 = arith.constant 17 : i32
    %222 = tpu.dynamic_rotate %221 by %c17_i32_148 dim 1 : vector<10x256xf32>, i32 -> vector<10x256xf32>
    %c0_149 = arith.constant 0 : index
    %c0_150 = arith.constant 0 : index
    %c0_151 = arith.constant 0 : index
    %223 = vector.load %arg19[%c0_149, %c0_150, %c0_151] : memref<9x10x1xf32, #tpu.memory_space<vmem>>, vector<1x10x1xf32>
    %224 = vector.shape_cast %223 : vector<1x10x1xf32> to vector<10x1xf32>
    %225 = vector.broadcast %224 : vector<10x1xf32> to vector<10x256xf32>
    %226 = arith.mulf %222, %225 : vector<10x256xf32>
    %c0_152 = arith.constant 0 : index
    %c0_153 = arith.constant 0 : index
    %c0_154 = arith.constant 0 : index
    %227 = vector.load %arg2[%c0_152, %c0_153, %c0_154] : memref<9x1x256xf32, #tpu.memory_space<vmem>>, vector<1x1x256xf32>
    %228 = vector.shape_cast %227 : vector<1x1x256xf32> to vector<1x256xf32>
    %229 = vector.broadcast %228 : vector<1x256xf32> to vector<10x256xf32>
    %230 = arith.mulf %226, %229 : vector<10x256xf32>
    %c16_i32_155 = arith.constant 16 : i32
    %231 = tpu.dynamic_rotate %221 by %c16_i32_155 dim 1 : vector<10x256xf32>, i32 -> vector<10x256xf32>
    %c1_156 = arith.constant 1 : index
    %c0_157 = arith.constant 0 : index
    %c0_158 = arith.constant 0 : index
    %232 = vector.load %arg19[%c1_156, %c0_157, %c0_158] : memref<9x10x1xf32, #tpu.memory_space<vmem>>, vector<1x10x1xf32>
    %233 = vector.shape_cast %232 : vector<1x10x1xf32> to vector<10x1xf32>
    %234 = vector.broadcast %233 : vector<10x1xf32> to vector<10x256xf32>
    %235 = arith.mulf %231, %234 : vector<10x256xf32>
    %c1_159 = arith.constant 1 : index
    %c0_160 = arith.constant 0 : index
    %c0_161 = arith.constant 0 : index
    %236 = vector.load %arg2[%c1_159, %c0_160, %c0_161] : memref<9x1x256xf32, #tpu.memory_space<vmem>>, vector<1x1x256xf32>
    %237 = vector.shape_cast %236 : vector<1x1x256xf32> to vector<1x256xf32>
    %238 = vector.broadcast %237 : vector<1x256xf32> to vector<10x256xf32>
    %239 = arith.mulf %235, %238 : vector<10x256xf32>
    %240 = arith.addf %230, %239 : vector<10x256xf32>
    %c15_i32_162 = arith.constant 15 : i32
    %241 = tpu.dynamic_rotate %221 by %c15_i32_162 dim 1 : vector<10x256xf32>, i32 -> vector<10x256xf32>
    %c2_163 = arith.constant 2 : index
    %c0_164 = arith.constant 0 : index
    %c0_165 = arith.constant 0 : index
    %242 = vector.load %arg19[%c2_163, %c0_164, %c0_165] : memref<9x10x1xf32, #tpu.memory_space<vmem>>, vector<1x10x1xf32>
    %243 = vector.shape_cast %242 : vector<1x10x1xf32> to vector<10x1xf32>
    %244 = vector.broadcast %243 : vector<10x1xf32> to vector<10x256xf32>
    %245 = arith.mulf %241, %244 : vector<10x256xf32>
    %c2_166 = arith.constant 2 : index
    %c0_167 = arith.constant 0 : index
    %c0_168 = arith.constant 0 : index
    %246 = vector.load %arg2[%c2_166, %c0_167, %c0_168] : memref<9x1x256xf32, #tpu.memory_space<vmem>>, vector<1x1x256xf32>
    %247 = vector.shape_cast %246 : vector<1x1x256xf32> to vector<1x256xf32>
    %248 = vector.broadcast %247 : vector<1x256xf32> to vector<10x256xf32>
    %249 = arith.mulf %245, %248 : vector<10x256xf32>
    %250 = arith.addf %240, %249 : vector<10x256xf32>
    %c1_i32_169 = arith.constant 1 : i32
    %251 = tpu.dynamic_rotate %221 by %c1_i32_169 dim 1 : vector<10x256xf32>, i32 -> vector<10x256xf32>
    %c3_170 = arith.constant 3 : index
    %c0_171 = arith.constant 0 : index
    %c0_172 = arith.constant 0 : index
    %252 = vector.load %arg19[%c3_170, %c0_171, %c0_172] : memref<9x10x1xf32, #tpu.memory_space<vmem>>, vector<1x10x1xf32>
    %253 = vector.shape_cast %252 : vector<1x10x1xf32> to vector<10x1xf32>
    %254 = vector.broadcast %253 : vector<10x1xf32> to vector<10x256xf32>
    %255 = arith.mulf %251, %254 : vector<10x256xf32>
    %c3_173 = arith.constant 3 : index
    %c0_174 = arith.constant 0 : index
    %c0_175 = arith.constant 0 : index
    %256 = vector.load %arg2[%c3_173, %c0_174, %c0_175] : memref<9x1x256xf32, #tpu.memory_space<vmem>>, vector<1x1x256xf32>
    %257 = vector.shape_cast %256 : vector<1x1x256xf32> to vector<1x256xf32>
    %258 = vector.broadcast %257 : vector<1x256xf32> to vector<10x256xf32>
    %259 = arith.mulf %255, %258 : vector<10x256xf32>
    %260 = arith.addf %250, %259 : vector<10x256xf32>
    %c4_176 = arith.constant 4 : index
    %c0_177 = arith.constant 0 : index
    %c0_178 = arith.constant 0 : index
    %261 = vector.load %arg19[%c4_176, %c0_177, %c0_178] : memref<9x10x1xf32, #tpu.memory_space<vmem>>, vector<1x10x1xf32>
    %262 = vector.shape_cast %261 : vector<1x10x1xf32> to vector<10x1xf32>
    %263 = vector.broadcast %262 : vector<10x1xf32> to vector<10x256xf32>
    %264 = arith.mulf %221, %263 : vector<10x256xf32>
    %265 = arith.addf %260, %264 : vector<10x256xf32>
    %c255_i32_179 = arith.constant 255 : i32
    %266 = tpu.dynamic_rotate %221 by %c255_i32_179 dim 1 : vector<10x256xf32>, i32 -> vector<10x256xf32>
    %c5_180 = arith.constant 5 : index
    %c0_181 = arith.constant 0 : index
    %c0_182 = arith.constant 0 : index
    %267 = vector.load %arg19[%c5_180, %c0_181, %c0_182] : memref<9x10x1xf32, #tpu.memory_space<vmem>>, vector<1x10x1xf32>
    %268 = vector.shape_cast %267 : vector<1x10x1xf32> to vector<10x1xf32>
    %269 = vector.broadcast %268 : vector<10x1xf32> to vector<10x256xf32>
    %270 = arith.mulf %266, %269 : vector<10x256xf32>
    %c5_183 = arith.constant 5 : index
    %c0_184 = arith.constant 0 : index
    %c0_185 = arith.constant 0 : index
    %271 = vector.load %arg2[%c5_183, %c0_184, %c0_185] : memref<9x1x256xf32, #tpu.memory_space<vmem>>, vector<1x1x256xf32>
    %272 = vector.shape_cast %271 : vector<1x1x256xf32> to vector<1x256xf32>
    %273 = vector.broadcast %272 : vector<1x256xf32> to vector<10x256xf32>
    %274 = arith.mulf %270, %273 : vector<10x256xf32>
    %275 = arith.addf %265, %274 : vector<10x256xf32>
    %c241_i32_186 = arith.constant 241 : i32
    %276 = tpu.dynamic_rotate %221 by %c241_i32_186 dim 1 : vector<10x256xf32>, i32 -> vector<10x256xf32>
    %c6_187 = arith.constant 6 : index
    %c0_188 = arith.constant 0 : index
    %c0_189 = arith.constant 0 : index
    %277 = vector.load %arg19[%c6_187, %c0_188, %c0_189] : memref<9x10x1xf32, #tpu.memory_space<vmem>>, vector<1x10x1xf32>
    %278 = vector.shape_cast %277 : vector<1x10x1xf32> to vector<10x1xf32>
    %279 = vector.broadcast %278 : vector<10x1xf32> to vector<10x256xf32>
    %280 = arith.mulf %276, %279 : vector<10x256xf32>
    %c6_190 = arith.constant 6 : index
    %c0_191 = arith.constant 0 : index
    %c0_192 = arith.constant 0 : index
    %281 = vector.load %arg2[%c6_190, %c0_191, %c0_192] : memref<9x1x256xf32, #tpu.memory_space<vmem>>, vector<1x1x256xf32>
    %282 = vector.shape_cast %281 : vector<1x1x256xf32> to vector<1x256xf32>
    %283 = vector.broadcast %282 : vector<1x256xf32> to vector<10x256xf32>
    %284 = arith.mulf %280, %283 : vector<10x256xf32>
    %285 = arith.addf %275, %284 : vector<10x256xf32>
    %c240_i32_193 = arith.constant 240 : i32
    %286 = tpu.dynamic_rotate %221 by %c240_i32_193 dim 1 : vector<10x256xf32>, i32 -> vector<10x256xf32>
    %c7_194 = arith.constant 7 : index
    %c0_195 = arith.constant 0 : index
    %c0_196 = arith.constant 0 : index
    %287 = vector.load %arg19[%c7_194, %c0_195, %c0_196] : memref<9x10x1xf32, #tpu.memory_space<vmem>>, vector<1x10x1xf32>
    %288 = vector.shape_cast %287 : vector<1x10x1xf32> to vector<10x1xf32>
    %289 = vector.broadcast %288 : vector<10x1xf32> to vector<10x256xf32>
    %290 = arith.mulf %286, %289 : vector<10x256xf32>
    %c7_197 = arith.constant 7 : index
    %c0_198 = arith.constant 0 : index
    %c0_199 = arith.constant 0 : index
    %291 = vector.load %arg2[%c7_197, %c0_198, %c0_199] : memref<9x1x256xf32, #tpu.memory_space<vmem>>, vector<1x1x256xf32>
    %292 = vector.shape_cast %291 : vector<1x1x256xf32> to vector<1x256xf32>
    %293 = vector.broadcast %292 : vector<1x256xf32> to vector<10x256xf32>
    %294 = arith.mulf %290, %293 : vector<10x256xf32>
    %295 = arith.addf %285, %294 : vector<10x256xf32>
    %c239_i32_200 = arith.constant 239 : i32
    %296 = tpu.dynamic_rotate %221 by %c239_i32_200 dim 1 : vector<10x256xf32>, i32 -> vector<10x256xf32>
    %c8_201 = arith.constant 8 : index
    %c0_202 = arith.constant 0 : index
    %c0_203 = arith.constant 0 : index
    %297 = vector.load %arg19[%c8_201, %c0_202, %c0_203] : memref<9x10x1xf32, #tpu.memory_space<vmem>>, vector<1x10x1xf32>
    %298 = vector.shape_cast %297 : vector<1x10x1xf32> to vector<10x1xf32>
    %299 = vector.broadcast %298 : vector<10x1xf32> to vector<10x256xf32>
    %300 = arith.mulf %296, %299 : vector<10x256xf32>
    %c8_204 = arith.constant 8 : index
    %c0_205 = arith.constant 0 : index
    %c0_206 = arith.constant 0 : index
    %301 = vector.load %arg2[%c8_204, %c0_205, %c0_206] : memref<9x1x256xf32, #tpu.memory_space<vmem>>, vector<1x1x256xf32>
    %302 = vector.shape_cast %301 : vector<1x1x256xf32> to vector<1x256xf32>
    %303 = vector.broadcast %302 : vector<1x256xf32> to vector<10x256xf32>
    %304 = arith.mulf %300, %303 : vector<10x256xf32>
    %305 = arith.addf %295, %304 : vector<10x256xf32>
    %c0_207 = arith.constant 0 : index
    %c0_208 = arith.constant 0 : index
    %306 = vector.load %arg20[%c0_207, %c0_208] : memref<10x1xf32, #tpu.memory_space<vmem>>, vector<10x1xf32>
    %307 = vector.broadcast %306 : vector<10x1xf32> to vector<10x256xf32>
    %308 = arith.mulf %305, %307 : vector<10x256xf32>
    %c0_209 = arith.constant 0 : index
    %c0_210 = arith.constant 0 : index
    %309 = vector.load %arg21[%c0_209, %c0_210] : memref<10x1xf32, #tpu.memory_space<vmem>>, vector<10x1xf32>
    %310 = vector.broadcast %309 : vector<10x1xf32> to vector<10x256xf32>
    %311 = arith.addf %308, %310 : vector<10x256xf32>
    %c32 = arith.constant 32 : index
    %c0_211 = arith.constant 0 : index
    %312 = vector.load %arg31[%c32, %c0_211] : memref<48x256xf32, #tpu.memory_space<vmem>>, vector<10x256xf32>
    tpu.vector_store %arg31[%c32, %c0_211], %311 {strides = array<i32>} : memref<48x256xf32, #tpu.memory_space<vmem>>, vector<10x256xf32>,
    %c0_212 = arith.constant 0 : index
    %c10 = arith.constant 10 : index
    %c0_213 = arith.constant 0 : index
    %313 = vector.load %arg30[%c0_212, %c10, %c0_213] : memref<1x46x256xf32, #tpu.memory_space<vmem>>, vector<1x10x256xf32>
    %314 = vector.shape_cast %313 : vector<1x10x256xf32> to vector<10x256xf32>
    %315 = vector.shape_cast %311 : vector<10x256xf32> to vector<1x10x256xf32>
    tpu.vector_store %arg30[%c0_212, %c10, %c0_213], %315 {strides = array<i32>} : memref<1x46x256xf32, #tpu.memory_space<vmem>>, vector<1x10x256xf32>,
    %c32_214 = arith.constant 32 : index
    %c0_215 = arith.constant 0 : index
    %316 = vector.load %arg31[%c32_214, %c0_215] : memref<48x256xf32, #tpu.memory_space<vmem>>, vector<10x256xf32>
    %c0_216 = arith.constant 0 : index
    %c0_217 = arith.constant 0 : index
    %317 = vector.load %arg22[%c0_216, %c0_217] : memref<26x10xf32, #tpu.memory_space<vmem>>, vector<26x10xf32>
    %cst_218 = arith.constant dense<0.000000e+00> : vector<26x256xf32>
    %318 = tpu.matmul %317, %316, %cst_218 {dimension_numbers = #tpu.dot_dimension_numbers<[1], [0], [0], [1], [0, 0, 1, 1], [], []>} : vector<26x10xf32>, vector<10x256xf32>, vector<26x256xf32> -> vector<26x256xf32>
    %c16_219 = arith.constant 16 : index
    %c0_220 = arith.constant 0 : index
    %319 = vector.load %arg31[%c16_219, %c0_220] : memref<48x256xf32, #tpu.memory_space<vmem>>, vector<16x256xf32>
    %c0_221 = arith.constant 0 : index
    %c0_222 = arith.constant 0 : index
    %320 = vector.load %arg23[%c0_221, %c0_222] : memref<26x16xf32, #tpu.memory_space<vmem>>, vector<26x16xf32>
    %cst_223 = arith.constant dense<0.000000e+00> : vector<26x256xf32>
    %321 = tpu.matmul %320, %319, %cst_223 {dimension_numbers = #tpu.dot_dimension_numbers<[1], [0], [0], [1], [0, 0, 1, 1], [], []>} : vector<26x16xf32>, vector<16x256xf32>, vector<26x256xf32> -> vector<26x256xf32>
    %322 = arith.addf %318, %321 : vector<26x256xf32>
    %c0_224 = arith.constant 0 : index
    %c0_225 = arith.constant 0 : index
    %323 = vector.load %arg24[%c0_224, %c0_225] : memref<26x16xf32, #tpu.memory_space<vmem>>, vector<26x16xf32>
    %cst_226 = arith.constant dense<0.000000e+00> : vector<26x256xf32>
    %324 = tpu.matmul %323, %1, %cst_226 {dimension_numbers = #tpu.dot_dimension_numbers<[1], [0], [0], [1], [0, 0, 1, 1], [], []>} : vector<26x16xf32>, vector<16x256xf32>, vector<26x256xf32> -> vector<26x256xf32>
    %325 = arith.addf %322, %324 : vector<26x256xf32>
    %c0_227 = arith.constant 0 : index
    %c0_228 = arith.constant 0 : index
    %326 = vector.load %arg25[%c0_227, %c0_228] : memref<26x1xf32, #tpu.memory_space<vmem>>, vector<26x1xf32>
    %327 = vector.broadcast %326 : vector<26x1xf32> to vector<26x256xf32>
    %328 = arith.mulf %325, %327 : vector<26x256xf32>
    %c0_229 = arith.constant 0 : index
    %c0_230 = arith.constant 0 : index
    %329 = vector.load %arg26[%c0_229, %c0_230] : memref<26x1xf32, #tpu.memory_space<vmem>>, vector<26x1xf32>
    %330 = vector.broadcast %329 : vector<26x1xf32> to vector<26x256xf32>
    %331 = arith.addf %328, %330 : vector<26x256xf32>
    %cst_231 = arith.constant 0.000000e+00 : f32
    %332 = vector.broadcast %cst_231 : f32 to vector<26x256xf32>
    %333 = arith.maximumf %331, %332 : vector<26x256xf32>
    %c17_i32_232 = arith.constant 17 : i32
    %334 = tpu.dynamic_rotate %333 by %c17_i32_232 dim 1 : vector<26x256xf32>, i32 -> vector<26x256xf32>
    %c0_233 = arith.constant 0 : index
    %c0_234 = arith.constant 0 : index
    %c0_235 = arith.constant 0 : index
    %335 = vector.load %arg27[%c0_233, %c0_234, %c0_235] : memref<9x26x1xf32, #tpu.memory_space<vmem>>, vector<1x26x1xf32>
    %336 = vector.shape_cast %335 : vector<1x26x1xf32> to vector<26x1xf32>
    %337 = vector.broadcast %336 : vector<26x1xf32> to vector<26x256xf32>
    %338 = arith.mulf %334, %337 : vector<26x256xf32>
    %c0_236 = arith.constant 0 : index
    %c0_237 = arith.constant 0 : index
    %c0_238 = arith.constant 0 : index
    %339 = vector.load %arg2[%c0_236, %c0_237, %c0_238] : memref<9x1x256xf32, #tpu.memory_space<vmem>>, vector<1x1x256xf32>
    %340 = vector.shape_cast %339 : vector<1x1x256xf32> to vector<1x256xf32>
    %341 = vector.broadcast %340 : vector<1x256xf32> to vector<26x256xf32>
    %342 = arith.mulf %338, %341 : vector<26x256xf32>
    %c16_i32_239 = arith.constant 16 : i32
    %343 = tpu.dynamic_rotate %333 by %c16_i32_239 dim 1 : vector<26x256xf32>, i32 -> vector<26x256xf32>
    %c1_240 = arith.constant 1 : index
    %c0_241 = arith.constant 0 : index
    %c0_242 = arith.constant 0 : index
    %344 = vector.load %arg27[%c1_240, %c0_241, %c0_242] : memref<9x26x1xf32, #tpu.memory_space<vmem>>, vector<1x26x1xf32>
    %345 = vector.shape_cast %344 : vector<1x26x1xf32> to vector<26x1xf32>
    %346 = vector.broadcast %345 : vector<26x1xf32> to vector<26x256xf32>
    %347 = arith.mulf %343, %346 : vector<26x256xf32>
    %c1_243 = arith.constant 1 : index
    %c0_244 = arith.constant 0 : index
    %c0_245 = arith.constant 0 : index
    %348 = vector.load %arg2[%c1_243, %c0_244, %c0_245] : memref<9x1x256xf32, #tpu.memory_space<vmem>>, vector<1x1x256xf32>
    %349 = vector.shape_cast %348 : vector<1x1x256xf32> to vector<1x256xf32>
    %350 = vector.broadcast %349 : vector<1x256xf32> to vector<26x256xf32>
    %351 = arith.mulf %347, %350 : vector<26x256xf32>
    %352 = arith.addf %342, %351 : vector<26x256xf32>
    %c15_i32_246 = arith.constant 15 : i32
    %353 = tpu.dynamic_rotate %333 by %c15_i32_246 dim 1 : vector<26x256xf32>, i32 -> vector<26x256xf32>
    %c2_247 = arith.constant 2 : index
    %c0_248 = arith.constant 0 : index
    %c0_249 = arith.constant 0 : index
    %354 = vector.load %arg27[%c2_247, %c0_248, %c0_249] : memref<9x26x1xf32, #tpu.memory_space<vmem>>, vector<1x26x1xf32>
    %355 = vector.shape_cast %354 : vector<1x26x1xf32> to vector<26x1xf32>
    %356 = vector.broadcast %355 : vector<26x1xf32> to vector<26x256xf32>
    %357 = arith.mulf %353, %356 : vector<26x256xf32>
    %c2_250 = arith.constant 2 : index
    %c0_251 = arith.constant 0 : index
    %c0_252 = arith.constant 0 : index
    %358 = vector.load %arg2[%c2_250, %c0_251, %c0_252] : memref<9x1x256xf32, #tpu.memory_space<vmem>>, vector<1x1x256xf32>
    %359 = vector.shape_cast %358 : vector<1x1x256xf32> to vector<1x256xf32>
    %360 = vector.broadcast %359 : vector<1x256xf32> to vector<26x256xf32>
    %361 = arith.mulf %357, %360 : vector<26x256xf32>
    %362 = arith.addf %352, %361 : vector<26x256xf32>
    %c1_i32_253 = arith.constant 1 : i32
    %363 = tpu.dynamic_rotate %333 by %c1_i32_253 dim 1 : vector<26x256xf32>, i32 -> vector<26x256xf32>
    %c3_254 = arith.constant 3 : index
    %c0_255 = arith.constant 0 : index
    %c0_256 = arith.constant 0 : index
    %364 = vector.load %arg27[%c3_254, %c0_255, %c0_256] : memref<9x26x1xf32, #tpu.memory_space<vmem>>, vector<1x26x1xf32>
    %365 = vector.shape_cast %364 : vector<1x26x1xf32> to vector<26x1xf32>
    %366 = vector.broadcast %365 : vector<26x1xf32> to vector<26x256xf32>
    %367 = arith.mulf %363, %366 : vector<26x256xf32>
    %c3_257 = arith.constant 3 : index
    %c0_258 = arith.constant 0 : index
    %c0_259 = arith.constant 0 : index
    %368 = vector.load %arg2[%c3_257, %c0_258, %c0_259] : memref<9x1x256xf32, #tpu.memory_space<vmem>>, vector<1x1x256xf32>
    %369 = vector.shape_cast %368 : vector<1x1x256xf32> to vector<1x256xf32>
    %370 = vector.broadcast %369 : vector<1x256xf32> to vector<26x256xf32>
    %371 = arith.mulf %367, %370 : vector<26x256xf32>
    %372 = arith.addf %362, %371 : vector<26x256xf32>
    %c4_260 = arith.constant 4 : index
    %c0_261 = arith.constant 0 : index
    %c0_262 = arith.constant 0 : index
    %373 = vector.load %arg27[%c4_260, %c0_261, %c0_262] : memref<9x26x1xf32, #tpu.memory_space<vmem>>, vector<1x26x1xf32>
    %374 = vector.shape_cast %373 : vector<1x26x1xf32> to vector<26x1xf32>
    %375 = vector.broadcast %374 : vector<26x1xf32> to vector<26x256xf32>
    %376 = arith.mulf %333, %375 : vector<26x256xf32>
    %377 = arith.addf %372, %376 : vector<26x256xf32>
    %c255_i32_263 = arith.constant 255 : i32
    %378 = tpu.dynamic_rotate %333 by %c255_i32_263 dim 1 : vector<26x256xf32>, i32 -> vector<26x256xf32>
    %c5_264 = arith.constant 5 : index
    %c0_265 = arith.constant 0 : index
    %c0_266 = arith.constant 0 : index
    %379 = vector.load %arg27[%c5_264, %c0_265, %c0_266] : memref<9x26x1xf32, #tpu.memory_space<vmem>>, vector<1x26x1xf32>
    %380 = vector.shape_cast %379 : vector<1x26x1xf32> to vector<26x1xf32>
    %381 = vector.broadcast %380 : vector<26x1xf32> to vector<26x256xf32>
    %382 = arith.mulf %378, %381 : vector<26x256xf32>
    %c5_267 = arith.constant 5 : index
    %c0_268 = arith.constant 0 : index
    %c0_269 = arith.constant 0 : index
    %383 = vector.load %arg2[%c5_267, %c0_268, %c0_269] : memref<9x1x256xf32, #tpu.memory_space<vmem>>, vector<1x1x256xf32>
    %384 = vector.shape_cast %383 : vector<1x1x256xf32> to vector<1x256xf32>
    %385 = vector.broadcast %384 : vector<1x256xf32> to vector<26x256xf32>
    %386 = arith.mulf %382, %385 : vector<26x256xf32>
    %387 = arith.addf %377, %386 : vector<26x256xf32>
    %c241_i32_270 = arith.constant 241 : i32
    %388 = tpu.dynamic_rotate %333 by %c241_i32_270 dim 1 : vector<26x256xf32>, i32 -> vector<26x256xf32>
    %c6_271 = arith.constant 6 : index
    %c0_272 = arith.constant 0 : index
    %c0_273 = arith.constant 0 : index
    %389 = vector.load %arg27[%c6_271, %c0_272, %c0_273] : memref<9x26x1xf32, #tpu.memory_space<vmem>>, vector<1x26x1xf32>
    %390 = vector.shape_cast %389 : vector<1x26x1xf32> to vector<26x1xf32>
    %391 = vector.broadcast %390 : vector<26x1xf32> to vector<26x256xf32>
    %392 = arith.mulf %388, %391 : vector<26x256xf32>
    %c6_274 = arith.constant 6 : index
    %c0_275 = arith.constant 0 : index
    %c0_276 = arith.constant 0 : index
    %393 = vector.load %arg2[%c6_274, %c0_275, %c0_276] : memref<9x1x256xf32, #tpu.memory_space<vmem>>, vector<1x1x256xf32>
    %394 = vector.shape_cast %393 : vector<1x1x256xf32> to vector<1x256xf32>
    %395 = vector.broadcast %394 : vector<1x256xf32> to vector<26x256xf32>
    %396 = arith.mulf %392, %395 : vector<26x256xf32>
    %397 = arith.addf %387, %396 : vector<26x256xf32>
    %c240_i32_277 = arith.constant 240 : i32
    %398 = tpu.dynamic_rotate %333 by %c240_i32_277 dim 1 : vector<26x256xf32>, i32 -> vector<26x256xf32>
    %c7_278 = arith.constant 7 : index
    %c0_279 = arith.constant 0 : index
    %c0_280 = arith.constant 0 : index
    %399 = vector.load %arg27[%c7_278, %c0_279, %c0_280] : memref<9x26x1xf32, #tpu.memory_space<vmem>>, vector<1x26x1xf32>
    %400 = vector.shape_cast %399 : vector<1x26x1xf32> to vector<26x1xf32>
    %401 = vector.broadcast %400 : vector<26x1xf32> to vector<26x256xf32>
    %402 = arith.mulf %398, %401 : vector<26x256xf32>
    %c7_281 = arith.constant 7 : index
    %c0_282 = arith.constant 0 : index
    %c0_283 = arith.constant 0 : index
    %403 = vector.load %arg2[%c7_281, %c0_282, %c0_283] : memref<9x1x256xf32, #tpu.memory_space<vmem>>, vector<1x1x256xf32>
    %404 = vector.shape_cast %403 : vector<1x1x256xf32> to vector<1x256xf32>
    %405 = vector.broadcast %404 : vector<1x256xf32> to vector<26x256xf32>
    %406 = arith.mulf %402, %405 : vector<26x256xf32>
    %407 = arith.addf %397, %406 : vector<26x256xf32>
    %c239_i32_284 = arith.constant 239 : i32
    %408 = tpu.dynamic_rotate %333 by %c239_i32_284 dim 1 : vector<26x256xf32>, i32 -> vector<26x256xf32>
    %c8_285 = arith.constant 8 : index
    %c0_286 = arith.constant 0 : index
    %c0_287 = arith.constant 0 : index
    %409 = vector.load %arg27[%c8_285, %c0_286, %c0_287] : memref<9x26x1xf32, #tpu.memory_space<vmem>>, vector<1x26x1xf32>
    %410 = vector.shape_cast %409 : vector<1x26x1xf32> to vector<26x1xf32>
    %411 = vector.broadcast %410 : vector<26x1xf32> to vector<26x256xf32>
    %412 = arith.mulf %408, %411 : vector<26x256xf32>
    %c8_288 = arith.constant 8 : index
    %c0_289 = arith.constant 0 : index
    %c0_290 = arith.constant 0 : index
    %413 = vector.load %arg2[%c8_288, %c0_289, %c0_290] : memref<9x1x256xf32, #tpu.memory_space<vmem>>, vector<1x1x256xf32>
    %414 = vector.shape_cast %413 : vector<1x1x256xf32> to vector<1x256xf32>
    %415 = vector.broadcast %414 : vector<1x256xf32> to vector<26x256xf32>
    %416 = arith.mulf %412, %415 : vector<26x256xf32>
    %417 = arith.addf %407, %416 : vector<26x256xf32>
    %c0_291 = arith.constant 0 : index
    %c0_292 = arith.constant 0 : index
    %418 = vector.load %arg28[%c0_291, %c0_292] : memref<26x1xf32, #tpu.memory_space<vmem>>, vector<26x1xf32>
    %419 = vector.broadcast %418 : vector<26x1xf32> to vector<26x256xf32>
    %420 = arith.mulf %417, %419 : vector<26x256xf32>
    %c0_293 = arith.constant 0 : index
    %c0_294 = arith.constant 0 : index
    %421 = vector.load %arg29[%c0_293, %c0_294] : memref<26x1xf32, #tpu.memory_space<vmem>>, vector<26x1xf32>
    %422 = vector.broadcast %421 : vector<26x1xf32> to vector<26x256xf32>
    %423 = arith.addf %420, %422 : vector<26x256xf32>
    %c0_295 = arith.constant 0 : index
    %c20 = arith.constant 20 : index
    %c0_296 = arith.constant 0 : index
    %424 = vector.load %arg30[%c0_295, %c20, %c0_296] : memref<1x46x256xf32, #tpu.memory_space<vmem>>, vector<1x26x256xf32>
    %425 = vector.shape_cast %424 : vector<1x26x256xf32> to vector<26x256xf32>
    %426 = vector.shape_cast %423 : vector<26x256xf32> to vector<1x26x256xf32>
    tpu.vector_store %arg30[%c0_295, %c20, %c0_296], %426 {strides = array<i32>} : memref<1x46x256xf32, #tpu.memory_space<vmem>>, vector<1x26x256xf32>,
    return
  }
  func.func @transform_0(%arg0: i32) -> (i32, i32, i32) {
    %c0_i32 = arith.constant 0 : i32
    %c0_i32_0 = arith.constant 0 : i32
    %c0_i32_1 = arith.constant 0 : i32
    return %arg0, %c0_i32, %c0_i32_0 : i32, i32, i32
  }
  func.func @transform_1(%arg0: i32) -> (i32, i32, i32) {
    %c0_i32 = arith.constant 0 : i32
    %c0_i32_0 = arith.constant 0 : i32
    %c0_i32_1 = arith.constant 0 : i32
    %c0_i32_2 = arith.constant 0 : i32
    return %c0_i32, %c0_i32_0, %c0_i32_1 : i32, i32, i32
  }
  func.func @transform_2(%arg0: i32) -> (i32, i32) {
    %c0_i32 = arith.constant 0 : i32
    %c0_i32_0 = arith.constant 0 : i32
    %c0_i32_1 = arith.constant 0 : i32
    return %c0_i32, %c0_i32_0 : i32, i32
  }
  func.func @transform_3(%arg0: i32) -> (i32, i32) {
    %c0_i32 = arith.constant 0 : i32
    %c0_i32_0 = arith.constant 0 : i32
    %c0_i32_1 = arith.constant 0 : i32
    return %c0_i32, %c0_i32_0 : i32, i32
  }
  func.func @transform_4(%arg0: i32) -> (i32, i32) {
    %c0_i32 = arith.constant 0 : i32
    %c0_i32_0 = arith.constant 0 : i32
    %c0_i32_1 = arith.constant 0 : i32
    return %c0_i32, %c0_i32_0 : i32, i32
  }
  func.func @transform_5(%arg0: i32) -> (i32, i32, i32) {
    %c0_i32 = arith.constant 0 : i32
    %c0_i32_0 = arith.constant 0 : i32
    %c0_i32_1 = arith.constant 0 : i32
    %c0_i32_2 = arith.constant 0 : i32
    return %c0_i32, %c0_i32_0, %c0_i32_1 : i32, i32, i32
  }
  func.func @transform_6(%arg0: i32) -> (i32, i32) {
    %c0_i32 = arith.constant 0 : i32
    %c0_i32_0 = arith.constant 0 : i32
    %c0_i32_1 = arith.constant 0 : i32
    return %c0_i32, %c0_i32_0 : i32, i32
  }
  func.func @transform_7(%arg0: i32) -> (i32, i32) {
    %c0_i32 = arith.constant 0 : i32
    %c0_i32_0 = arith.constant 0 : i32
    %c0_i32_1 = arith.constant 0 : i32
    return %c0_i32, %c0_i32_0 : i32, i32
  }
  func.func @transform_8(%arg0: i32) -> (i32, i32) {
    %c0_i32 = arith.constant 0 : i32
    %c0_i32_0 = arith.constant 0 : i32
    %c0_i32_1 = arith.constant 0 : i32
    return %c0_i32, %c0_i32_0 : i32, i32
  }
  func.func @transform_9(%arg0: i32) -> (i32, i32) {
    %c0_i32 = arith.constant 0 : i32
    %c0_i32_0 = arith.constant 0 : i32
    %c0_i32_1 = arith.constant 0 : i32
    return %c0_i32, %c0_i32_0 : i32, i32
  }
  func.func @transform_10(%arg0: i32) -> (i32, i32) {
    %c0_i32 = arith.constant 0 : i32
    %c0_i32_0 = arith.constant 0 : i32
    %c0_i32_1 = arith.constant 0 : i32
    return %c0_i32, %c0_i32_0 : i32, i32
  }
  func.func @transform_11(%arg0: i32) -> (i32, i32) {
    %c0_i32 = arith.constant 0 : i32
    %c0_i32_0 = arith.constant 0 : i32
    %c0_i32_1 = arith.constant 0 : i32
    return %c0_i32, %c0_i32_0 : i32, i32
  }
  func.func @transform_12(%arg0: i32) -> (i32, i32, i32) {
    %c0_i32 = arith.constant 0 : i32
    %c0_i32_0 = arith.constant 0 : i32
    %c0_i32_1 = arith.constant 0 : i32
    %c0_i32_2 = arith.constant 0 : i32
    return %c0_i32, %c0_i32_0, %c0_i32_1 : i32, i32, i32
  }
  func.func @transform_13(%arg0: i32) -> (i32, i32) {
    %c0_i32 = arith.constant 0 : i32
    %c0_i32_0 = arith.constant 0 : i32
    %c0_i32_1 = arith.constant 0 : i32
    return %c0_i32, %c0_i32_0 : i32, i32
  }
  func.func @transform_14(%arg0: i32) -> (i32, i32) {
    %c0_i32 = arith.constant 0 : i32
    %c0_i32_0 = arith.constant 0 : i32
    %c0_i32_1 = arith.constant 0 : i32
    return %c0_i32, %c0_i32_0 : i32, i32
  }
  func.func @transform_15(%arg0: i32) -> (i32, i32) {
    %c0_i32 = arith.constant 0 : i32
    %c0_i32_0 = arith.constant 0 : i32
    %c0_i32_1 = arith.constant 0 : i32
    return %c0_i32, %c0_i32_0 : i32, i32
  }
  func.func @transform_16(%arg0: i32) -> (i32, i32) {
    %c0_i32 = arith.constant 0 : i32
    %c0_i32_0 = arith.constant 0 : i32
    %c0_i32_1 = arith.constant 0 : i32
    return %c0_i32, %c0_i32_0 : i32, i32
  }
  func.func @transform_17(%arg0: i32) -> (i32, i32) {
    %c0_i32 = arith.constant 0 : i32
    %c0_i32_0 = arith.constant 0 : i32
    %c0_i32_1 = arith.constant 0 : i32
    return %c0_i32, %c0_i32_0 : i32, i32
  }
  func.func @transform_18(%arg0: i32) -> (i32, i32, i32) {
    %c0_i32 = arith.constant 0 : i32
    %c0_i32_0 = arith.constant 0 : i32
    %c0_i32_1 = arith.constant 0 : i32
    %c0_i32_2 = arith.constant 0 : i32
    return %c0_i32, %c0_i32_0, %c0_i32_1 : i32, i32, i32
  }
  func.func @transform_19(%arg0: i32) -> (i32, i32) {
    %c0_i32 = arith.constant 0 : i32
    %c0_i32_0 = arith.constant 0 : i32
    %c0_i32_1 = arith.constant 0 : i32
    return %c0_i32, %c0_i32_0 : i32, i32
  }
  func.func @transform_20(%arg0: i32) -> (i32, i32) {
    %c0_i32 = arith.constant 0 : i32
    %c0_i32_0 = arith.constant 0 : i32
    %c0_i32_1 = arith.constant 0 : i32
    return %c0_i32, %c0_i32_0 : i32, i32
  }
  func.func @transform_21(%arg0: i32) -> (i32, i32) {
    %c0_i32 = arith.constant 0 : i32
    %c0_i32_0 = arith.constant 0 : i32
    %c0_i32_1 = arith.constant 0 : i32
    return %c0_i32, %c0_i32_0 : i32, i32
  }
  func.func @transform_22(%arg0: i32) -> (i32, i32) {
    %c0_i32 = arith.constant 0 : i32
    %c0_i32_0 = arith.constant 0 : i32
    %c0_i32_1 = arith.constant 0 : i32
    return %c0_i32, %c0_i32_0 : i32, i32
  }
  func.func @transform_23(%arg0: i32) -> (i32, i32) {
    %c0_i32 = arith.constant 0 : i32
    %c0_i32_0 = arith.constant 0 : i32
    %c0_i32_1 = arith.constant 0 : i32
    return %c0_i32, %c0_i32_0 : i32, i32
  }
  func.func @transform_24(%arg0: i32) -> (i32, i32) {
    %c0_i32 = arith.constant 0 : i32
    %c0_i32_0 = arith.constant 0 : i32
    %c0_i32_1 = arith.constant 0 : i32
    return %c0_i32, %c0_i32_0 : i32, i32
  }
  func.func @transform_25(%arg0: i32) -> (i32, i32) {
    %c0_i32 = arith.constant 0 : i32
    %c0_i32_0 = arith.constant 0 : i32
    %c0_i32_1 = arith.constant 0 : i32
    return %c0_i32, %c0_i32_0 : i32, i32
  }
  func.func @transform_26(%arg0: i32) -> (i32, i32, i32) {
    %c0_i32 = arith.constant 0 : i32
    %c0_i32_0 = arith.constant 0 : i32
    %c0_i32_1 = arith.constant 0 : i32
    %c0_i32_2 = arith.constant 0 : i32
    return %c0_i32, %c0_i32_0, %c0_i32_1 : i32, i32, i32
  }
  func.func @transform_27(%arg0: i32) -> (i32, i32) {
    %c0_i32 = arith.constant 0 : i32
    %c0_i32_0 = arith.constant 0 : i32
    %c0_i32_1 = arith.constant 0 : i32
    return %c0_i32, %c0_i32_0 : i32, i32
  }
  func.func @transform_28(%arg0: i32) -> (i32, i32) {
    %c0_i32 = arith.constant 0 : i32
    %c0_i32_0 = arith.constant 0 : i32
    %c0_i32_1 = arith.constant 0 : i32
    return %c0_i32, %c0_i32_0 : i32, i32
  }
  func.func @transform_29(%arg0: i32) -> (i32, i32, i32) {
    %c0_i32 = arith.constant 0 : i32
    %c0_i32_0 = arith.constant 0 : i32
    %c0_i32_1 = arith.constant 0 : i32
    return %arg0, %c0_i32, %c0_i32_0 : i32, i32, i32
  }
}

</mosaic_0001>

<bundles_post_ra>
// kernel: tpu_custom_call.1
= control target key start
LH: loop header
LB: loop body
LE: loop exit
PB: predicated region body
PF: predicated region fallthrough
CT: control target
= control target key end

     0   :  { %s4256_s6 = smov 1   ;;  %s4257_s10 = smov 2   ;;  %s6521_s0 = inlined_call_operand.smem [shape: u32[30], index: -1, kind: input, shape index: {}] }
   0x1   :  { %s4303_s5 = sld [smem:[%s6521_s0]]   ;;  %s4258_s14 = smov 3  }
   0x2   :  { %s4308_s9 = sld [smem:[%s6521_s0 + %s4256_s6]]   ;;  %s4259_s18 = smov 4  }
   0x3   :  { %s4313_s13 = sld [smem:[%s6521_s0 + %s4257_s10]]   ;;  %s4260_s22 = smov 5  }
   0x4   :  { %s4318_s17 = sld [smem:[%s6521_s0 + %s4258_s14]]   ;;  %s4261_s26 = smov 6  }
   0x5   :  { %s4323_s21 = sld [smem:[%s6521_s0 + %s4259_s18]]   ;;  %s4262_s30 = smov 7  }
   0x6   :  { %s4328_s25 = sld [smem:[%s6521_s0 + %s4260_s22]]   ;;  %s4263_s4 = smov 8  }
   0x7   :  { %6606 = sst [smem:[#allocation3_spill]] %s4303_s5  ;;  %s4264_s10 = smov 9  }
   0x8   :  { %s4333_s29 = sld [smem:[%s6521_s0 + %s4261_s26]]   ;;  %s4265_s15 = smov 10  }
   0x9   :  { %s4338_s3 = sld [smem:[%s6521_s0 + %s4262_s30]]   ;;  %s4266_s20 = smov 11  }
   0xa   :  { %s4343_s8 = sld [smem:[%s6521_s0 + %s4263_s4]]   ;;  %s4267_s26 = smov 12  }
   0xb   :  { %s4348_s14 = sld [smem:[%s6521_s0 + %s4264_s10]]   ;;  %s4268_s1 = smov 13  }
   0xc   :  { %s4353_s19 = sld [smem:[%s6521_s0 + %s4265_s15]]   ;;  %s4269_s7 = smov 14  }
   0xd   :  { %s4358_s24 = sld [smem:[%s6521_s0 + %s4266_s20]]   ;;  %s4270_s15 = smov 15  }
   0xe   :  { %s4363_s30 = sld [smem:[%s6521_s0 + %s4267_s26]]   ;;  %s4271_s22 = smov 16  }
   0xf   :  { %6607 = sst [smem:[#allocation4_spill]] %s4338_s3  ;;  %s4272_s28 = smov 17  }
  0x10   :  { %s4368_s6 = sld [smem:[%s6521_s0 + %s4268_s1]]  }
  0x11   :  { %s4373_s12 = sld [smem:[%s6521_s0 + %s4269_s7]]   ;;  %s4273_s7 = smov 18  }
  0x12   :  { %s4378_s20 = sld [smem:[%s6521_s0 + %s4270_s15]]   ;;  %s4274_s15 = smov 19  }
  0x13   :  { %s4383_s27 = sld [smem:[%s6521_s0 + %s4271_s22]]   ;;  %s4275_s22 = smov 20  }
  0x14   :  { %s4388_s4 = sld [smem:[%s6521_s0 + %s4272_s28]]   ;;  %s4276_s28 = smov 21  }
  0x16   :  { %6608 = sst [smem:[#allocation5_spill]] %s4368_s6 }
  0x17   :  { %6609 = sst [smem:[#allocation6_spill]] %s4373_s12 }
  0x18   :  { %6610 = sst [smem:[#allocation7_spill]] %s4378_s20 }
  0x19   :  { %6611 = sst [smem:[#allocation8_spill]] %s4383_s27 }
  0x1a   :  { %6612 = sst [smem:[#allocation9_spill]] %s4388_s4 }
  0x1b   :  { %s4393_s12 = sld [smem:[%s6521_s0 + %s4273_s7]]   ;;  %s4277_s7 = smov 22  }
  0x1c   :  { %s4398_s20 = sld [smem:[%s6521_s0 + %s4274_s15]]   ;;  %s4278_s15 = smov 23  }
  0x1d   :  { %s4403_s27 = sld [smem:[%s6521_s0 + %s4275_s22]]   ;;  %s4279_s22 = smov 24  }
  0x1e   :  { %s4408_s4 = sld [smem:[%s6521_s0 + %s4276_s28]]   ;;  %s4280_s28 = smov 25  }
  0x21   :  { %6613 = sst [smem:[#allocation10_spill]] %s4393_s12 }
  0x22   :  { %6614 = sst [smem:[#allocation11_spill]] %s4398_s20 }
  0x23   :  { %6615 = sst [smem:[#allocation12_spill]] %s4403_s27 }
  0x24   :  { %6616 = sst [smem:[#allocation13_spill]] %s4408_s4 }
  0x25   :  { %s4413_s12 = sld [smem:[%s6521_s0 + %s4277_s7]]   ;;  %s4281_s7 = smov 26  }
  0x26   :  { %s4418_s20 = sld [smem:[%s6521_s0 + %s4278_s15]]   ;;  %s4282_s15 = smov 27  }
  0x27   :  { %s4423_s27 = sld [smem:[%s6521_s0 + %s4279_s22]]   ;;  %s4283_s22 = smov 28  }
  0x28   :  { %s4428_s4 = sld [smem:[%s6521_s0 + %s4280_s28]]   ;;  %s4284_s28 = smov 29  }
  0x2b   :  { %6617 = sst [smem:[#allocation14_spill]] %s4413_s12 }
  0x2c   :  { %6618 = sst [smem:[#allocation15_spill]] %s4418_s20 }
  0x2d   :  { %6619 = sst [smem:[#allocation16_spill]] %s4423_s27 }
  0x2e   :  { %6620 = sst [smem:[#allocation17_spill]] %s4428_s4 }
  0x2f   :  { %s4433_s12 = sld [smem:[%s6521_s0 + %s4281_s7]]   ;;  %s4450_s7 = smov 0  }
  0x30   :  { %s4438_s20 = sld [smem:[%s6521_s0 + %s4282_s15]]  }
  0x31   :  { %s4443_s27 = sld [smem:[%s6521_s0 + %s4283_s22]]  }
  0x32   :  { %s4448_s4 = sld [smem:[%s6521_s0 + %s4284_s28]]  }
  0x38   :  { %6621 = sst [smem:[#allocation18_spill]] %s4448_s4 }
  0x39 LB: > { %s6622_s6 = sld [smem:[#allocation5_spill]]  ;;  %s4051_s10 = sadd.s32 4294967295, %s4254_s7   ;;  %s4254_s7 = sphi %s4450_s7, %s69_s7  }
  0x3a   : > { %s6623_s3 = sld [smem:[#allocation4_spill]]  ;;  %p4055_p0 = scmp.ge.s32.totalorder %s4254_s7, 1 }
  0x3b   : > { %p817_p1 = scmp.lt.s32.totalorder %s4254_s7, 3 }
  0x3d   : > { %p818_p2 = pnand %p4055_p0, %p817_p1 }
  0x3f   : > { %821 = sbr.rel (%p818_p2) target bundleno = 1755 (0x6db), region = 136 }
  0x44   : > { %p893_p3 = scmp.lt.s32.totalorder %s4051_s10, 1  ;;  %s6624_s5 = sld [smem:[#allocation3_spill]]  ;;  %v6534_v0 = vmov 0.0   ;;  %v994_v1 = vld [vmem:[%s4318_s17 + $0x8] sm:$0x3]  ;;  %v4286_v3 = vmov 0  }
  0x45   : > { %980 = vmatprep.mubr.f32.mxu1 %v6534_v0  ;;  %v1010_v2 = vld [vmem:[%s4323_s21 + $0x8] sm:$0x3]  ;;  %1663 = vmatprep.mubr.f32.mxu0 %v6534_v0  ;;  %v993_v4 = vld [vmem:[%s4318_s17] sm:$0xff]  ;;  %vm909_vm0 = vcmask 130048   ;;  %v4062_v12 = vld [vmem:[%s4328_s25 + $0x18] sm:$0x3] }
  0x46   : > { %s6736_s10 = smov (!%p893_p3, %s4051_s10), 1  ;;  %4242 = vset.pattern.permute.xlu0 %v4286_v3  ;;  %4243 = vset.pattern.permute.xlu1 %v4286_v3  ;;  %v1009_v5 = vld [vmem:[%s4323_s21] sm:$0xff]  ;;  %v1045_v11 = vld [vmem:[%s4328_s25 + $0x8] sm:$0x3]  ;;  %v4061_v15 = vld [vmem:[%s4328_s25 + $0x10] sm:$0xff]  ;;  %s6544_s15 = smov 15  }
  0x47   : > { %1002 = vperm.xlu0 %4242, %v994_v1   ;;  %1018 = vperm.xlu1 %4243, %v1010_v2   ;;  %s4193_s0 = sshll.u32 %s6736_s10, 5  ;;  %v907_v10 = vld [vmem:[%s4313_s13] sm:$0xff]  ;;  %v908_v13 = vld [vmem:[%s4313_s13 + $0x8] sm:$0x3]  ;;  %v4068_v18 = vld [vmem:[%s4328_s25 + $0x38] sm:$0x3] }
  0x48   : > { %v1044_v14 = vld [vmem:[%s4328_s25] sm:$0xff]  ;;  %v4065_v16 = vld [vmem:[%s4328_s25 + $0x28] sm:$0x3]  ;;  %v4067_v19 = vld [vmem:[%s4328_s25 + $0x30] sm:$0xff]  ;;  %s6567_s16 = smov 17   ;;  %s6555_s18 = smov 1  }
  0x49   : > { %v4064_v17 = vld [vmem:[%s4328_s25 + $0x20] sm:$0xff]  ;;  %v4071_v20 = vld [vmem:[%s4328_s25 + $0x48] sm:$0x3]  ;;  %v4073_v21 = vld [vmem:[%s4328_s25 + $0x58] sm:$0x3]  ;;  %s6563_s22 = smov 16  }
  0x4a   : > { %s4467_s11 = scalar_lea.vmem %s6624_s5, %s4193_s0  ;;  %v4070_v22 = vld [vmem:[%s4328_s25 + $0x40] sm:$0xff]  ;;  %v4072_v23 = vld [vmem:[%s4328_s25 + $0x50] sm:$0xff]  ;;  %v4076_v24 = vld [vmem:[%s4328_s25 + $0x68] sm:$0x3]  ;;  %s6558_s23 = smov 112   ;;  %vm1592_vm9 = vcmask 1041408  }
  0x4b   : > { %v906_v6 = vld [vmem:[%s4467_s11 + $0x18] sm:$0xff]  ;;  %v905_v7 = vld [vmem:[%s4467_s11 + $0x10] sm:$0xff]  ;;  %v904_v8 = vld [vmem:[%s4467_s11 + $0x8] sm:$0xff]  ;;  %997 = vperm.xlu0 %4242, %v993_v4   ;;  %1013 = vperm.xlu1 %4243, %v1009_v5   ;;  %s6553_s26 = smov 127   ;;  %s6560_s28 = smov 111   ;;  %vm1585_vm10 = vcmask 80896  }
  0x4c   : > { %944 = vmatprep.subr.mxu1 %v906_v6  ;;  %v903_v9 = vld [vmem:[%s4467_s11] sm:$0xff]  ;;  %v4079_v26 = vld [vmem:[%s4328_s25 + $0x78] sm:$0x3]  ;;  %v4078_v27 = vld [vmem:[%s4328_s25 + $0x70] sm:$0xff]  ;;  %s6546_s1 = smov 113   ;;  %s6635_s4 = sld [smem:[#allocation18_spill]] }
  0x4d   : > { %945 = vmatpush1.msra.mxu1 %v905_v7  ;;  %v4075_v25 = vld [vmem:[%s4328_s25 + $0x60] sm:$0xff]  ;;  %v4082_v28 = vld [vmem:[%s4328_s25 + $0x88] sm:$0x3]  ;;  %v4091_v2 = vld [vmem:[%s4363_s30 + $0x18] sm:$0xff]  ;;  %s4194_s2 = smul.u32 96, %s6736_s10  ;;  %s6637_s10 = sld [smem:[#allocation6_spill]] }
  0x4e   : > { %946 = vmatprep.subr.mxu1 %v904_v8  ;;  %v4081_v29 = vld [vmem:[%s4328_s25 + $0x80] sm:$0xff]  ;;  %v1455_v51 = vld [vmem:[%s4333_s29 + $0x8] sm:$0x3]  ;;  %s6661_s5 = sld [smem:[#allocation12_spill]]  ;;  %vm3936_vm11 = vcmask 1043456  }
  0x4f   : > { %947 = vmatpush1.msra.mxu1 %v903_v9  ;;  %1053 = vperm.xlu0 %4242, %v1045_v11   ;;  %v1454_v50 = vld [vmem:[%s4333_s29] sm:$0xff]  ;;  %v1471_v55 = vld [vmem:[%s6623_s3 + $0x8] sm:$0x3] }
  0x50   : > { %4059 = vmatmul.mubr.msk.f32.vlgmr.msra.gmra.mxu1 %vm909_vm0, %v907_v10  ;;  %1099 = vperm.xlu1 %4243, %v4062_v12   ;;  %v1470_v54 = vld [vmem:[%s6623_s3] sm:$0xff]  ;;  %v1677_v59 = vld [vmem:[%s4353_s19 + $0x8] sm:$0xff]  ;;  %s6659_s3 = sld [smem:[#allocation11_spill]] }
  0x51   : > { %986 = vmatprep.mubr.f32.mxu1 %v6534_v0  ;;  %1536 = vmatprep.subr.mxu1 %v906_v6  ;;  %v1676_v58 = vld [vmem:[%s4353_s19] sm:$0xff]  ;;  %v1693_v61 = vld [vmem:[%s4358_s24 + $0x8] sm:$0xff] }
  0x52   : > { %1537 = vmatpush1.msra.mxu1 %v905_v7  ;;  %v1692_v60 = vld [vmem:[%s4358_s24] sm:$0xff]  ;;  %v1725_v3 = vld [vmem:[%s4363_s30 + $0x8] sm:$0xff]  ;;  %v4090_v7 = vld [vmem:[%s4363_s30 + $0x10] sm:$0xff]  ;;  %s4910_s0 = scalar_lea.vmem %s6635_s4, %s4194_s2  ;;  %s6638_s2 = sld [smem:[#allocation8_spill]] }
  0x53   : > { %1048 = vperm.xlu0 %4242, %v1044_v14   ;;  %1538 = vmatprep.subr.mxu1 %v904_v8  ;;  %v1500_v1 = vld [vmem:[%s4348_s14] sm:$0xff]  ;;  %v1501_v4 = vld [vmem:[%s4348_s14 + $0x8] sm:$0xff]  ;;  %v4097_v14 = vld [vmem:[%s4363_s30 + $0x38] sm:$0xff]  ;;  %s6660_s4 = smov 16  }
  0x54   : > { %4060 = vmatmul.mubr.msk.f32.gmra.mxu1 %vm909_vm0, %v908_v13  ;;  %1094 = vperm.xlu1 %4243, %v4061_v15   ;;  %v1724_v8 = vld [vmem:[%s4363_s30] sm:$0xff]  ;;  %v4094_v10 = vld [vmem:[%s4363_s30 + $0x28] sm:$0xff]  ;;  %v4096_v13 = vld [vmem:[%s4363_s30 + $0x30] sm:$0xff] }
  0x55   : > { %1539 = vmatpush1.msra.mxu1 %v903_v9  ;;  %1572 = vmatprep.mubr.f32.mxu1 %v6534_v0  ;;  %v4093_v9 = vld [vmem:[%s4363_s30 + $0x20] sm:$0xff] }
  0x57   : > { %1150 = vperm.xlu0 %4242, %v4065_v16  }
  0x58   : > { %1145 = vperm.xlu1 %4243, %v4064_v17   ;;  %4084 = vmatmul.mubr.msk.f32.vlgmr.msra.gmra.mxu1 %vm909_vm0, %v1500_v1  ;;  %v4102_v17 = vld [vmem:[%s4363_s30 + $0x58] sm:$0xff]  ;;  %v4066_v1 = vld [vmem:[%s4308_s9 + $0x4] sm:$0x3] }
  0x59   : > { %1578 = vmatprep.mubr.f32.mxu1 %v6534_v0 }
  0x5b   : > { %1201 = vperm.xlu0 %4242, %v4068_v18   ;;  %v4100_v18 = vld [vmem:[%s4363_s30 + $0x48] sm:$0xff] }
  0x5c   : > { %1196 = vperm.xlu1 %4243, %v4067_v19   ;;  %4085 = vmatmul.mubr.msk.f32.gmra.mxu1 %vm909_vm0, %v1501_v4  ;;  %v4101_v19 = vld [vmem:[%s4363_s30 + $0x50] sm:$0xff] }
  0x5d   : > { %2232 = vmatprep.mubr.f32.mxu1 %v6534_v0 }
  0x5f   : > { %1239 = vperm.xlu0 %4242, %v4071_v20   ;;  %v4099_v20 = vld [vmem:[%s4363_s30 + $0x40] sm:$0xff] }
  0x60   : > { %1273 = vperm.xlu1 %4243, %v4073_v21  }
  0x63   : > { %1234 = vperm.xlu0 %4242, %v4070_v22  }
  0x64   : > { %1268 = vperm.xlu1 %4243, %v4072_v23   ;;  %v4104_v23 = vld [vmem:[%s4363_s30 + $0x60] sm:$0xff] }
  0x67   : > { %1324 = vperm.xlu0 %4242, %v4076_v24   ;;  %v4105_v24 = vld [vmem:[%s4363_s30 + $0x68] sm:$0xff] }
  0x68   : > { %1319 = vperm.xlu1 %4243, %v4075_v25  }
  0x6b   : > { %1375 = vperm.xlu0 %4242, %v4079_v26  }
  0x6c   : > { %1370 = vperm.xlu1 %4243, %v4078_v27   ;;  %v4107_v27 = vld [vmem:[%s4363_s30 + $0x70] sm:$0xff] }
  0x6f   : > { %1426 = vperm.xlu0 %4242, %v4082_v28   ;;  %v4108_v28 = vld [vmem:[%s4363_s30 + $0x78] sm:$0xff] }
  0x70   : > { %1421 = vperm.xlu1 %4243, %v4081_v29   ;;  %v4110_v29 = vld [vmem:[%s4363_s30 + $0x80] sm:$0xff] }
  0xc2   : > { %v1003_v30 = vpop.permute.xlu0 %1002  ;;  %v1019_v31 = vpop.permute.xlu1 %1018 }
  0xc6   : > { %v998_v32 = vpop.permute.xlu0 %997  ;;  %v1014_v35 = vpop.permute.xlu1 %1013 }
  0xca   : > { %v4572_v52 = vpop.permute.xlu0 %1053 }
  0xcb   : > { %v4574_v53 = vpop.permute.xlu1 %1099 }
  0xce   : > { %v4578_v56 = vpop.permute.xlu0 %1048 }
  0xcf   : > { %v4580_v57 = vpop.permute.xlu1 %1094 }
  0xd2   : > { %v4586_v62 = vpop.permute.xlu0 %1150 }
  0xd3   : > { %v4588_v63 = vpop.permute.xlu1 %1145 }
  0xd6   : > { %v4596_v5 = vpop.permute.xlu0 %1201 }
  0xd7   : > { %v4598_v6 = vpop.permute.xlu1 %1196 }
  0xda   : > { %v4606_v11 = vpop.permute.xlu0 %1239 }
  0xdb   : > { %v4608_v12 = vpop.permute.xlu1 %1273 }
  0xde   : > { %v4612_v15 = vpop.permute.xlu0 %1234 }
  0xdf   : > { %v4614_v16 = vpop.permute.xlu1 %1268 }
  0xe2   : > { %v4620_v21 = vpop.permute.xlu0 %1324 }
  0xe3   : > { %v4622_v22 = vpop.permute.xlu1 %1319 }
  0xe6   : > { %v4626_v25 = vpop.permute.xlu0 %1375 }
  0xe7   : > { %v4628_v26 = vpop.permute.xlu1 %1370 }
 0x110   : > { %v982_v33 = vpop.f32.mrf.mxu1 }
 0x111   : > { %v1005_v34 = vmul.f32 %v998_v32, %v982_v33 }
 0x112   : > { %v984_v38 = vpop.f32.mrf.mxu1 }
 0x113   : > { %v1021_v36 = vadd.f32 %v1014_v35, %v1005_v34  ;;  %v1006_v39 = vmul.f32 %v998_v32, %v984_v38  ;;  %v4636_v32 = vpop.permute.xlu1 %1421 }
 0x114   : > { %v988_v42 = vpop.f32.mrf.mxu1 }
 0x115   : > { %v4498_v37 = vmax.f32 %v1021_v36, 0.0  ;;  %v1022_v40 = vadd.f32 %v1014_v35, %v1006_v39  ;;  %v1007_v43 = vmul.f32 %v1003_v30, %v988_v42 }
 0x116   : > { %v990_v46 = vpop.f32.mrf.mxu1 }
 0x117   : > { %1127 = vrot.lane.b32.xlu0 %v4498_v37, %s6544_s15  ;;  %1029 = vrot.lane.b32.xlu1 %v4498_v37, %s6567_s16  ;;  %v4516_v41 = vmax.f32 %v1022_v40, 0.0  ;;  %v1023_v44 = vadd.f32 %v1019_v31, %v1007_v43  ;;  %v1008_v47 = vmul.f32 %v1003_v30, %v990_v46  ;;  %v4111_v30 = vld [vmem:[%s4363_s30 + $0x88] sm:$0xff] }
 0x119   : > { %v4530_v45 = vmax.f32 %v1023_v44, 0.0  ;;  %v1024_v48 = vadd.f32 %v1019_v31, %v1008_v47  ;;  %v4634_v31 = vpop.permute.xlu0 %1426 }
 0x11a   : > { %6625 = vst [vmem:[#allocation19_spill] sm:$0xff] %v4634_v31 }
 0x11b   : > { %1178 = vrot.lane.b32.xlu0 %v4498_v37, %s6555_s18  ;;  %1076 = vrot.lane.b32.xlu1 %v4498_v37, %s6563_s22  ;;  %v4544_v49 = vmax.f32 %v1024_v48, 0.0  ;;  %v1037_v48 = vlaneseq }
 0x11f   : > { %1352 = vrot.lane.b32.xlu0 %v4498_v37, %s6558_s23  ;;  %1250 = vrot.lane.b32.xlu1 %v4498_v37, %s6553_s26 }
 0x123   : > { %1403 = vrot.lane.b32.xlu0 %v4498_v37, %s6560_s28  ;;  %1301 = vrot.lane.b32.xlu1 %v4498_v37, %s6546_s1 }
 0x127   : > { %1131 = vrot.lane.b32.xlu1 %v4516_v41, %s6544_s15  ;;  %1033 = vrot.lane.b32.xlu0 %v4516_v41, %s6567_s16 }
 0x12b   : > { %1182 = vrot.lane.b32.xlu1 %v4516_v41, %s6555_s18  ;;  %1080 = vrot.lane.b32.xlu0 %v4516_v41, %s6563_s22 }
 0x12f   : > { %1356 = vrot.lane.b32.xlu1 %v4516_v41, %s6558_s23  ;;  %1254 = vrot.lane.b32.xlu0 %v4516_v41, %s6553_s26 }
 0x133   : > { %1305 = vrot.lane.b32.xlu0 %v4516_v41, %s6546_s1  ;;  %1031 = vrot.lane.b32.xlu1 %v4530_v45, %s6567_s16 }
 0x137   : > { %1180 = vrot.lane.b32.xlu0 %v4530_v45, %s6555_s18  ;;  %1078 = vrot.lane.b32.xlu1 %v4530_v45, %s6563_s22 }
 0x13b   : > { %1405 = vrot.lane.b32.xlu0 %v4530_v45, %s6560_s28  ;;  %1129 = vrot.lane.b32.xlu1 %v4530_v45, %s6544_s15 }
 0x13f   : > { %1252 = vrot.lane.b32.xlu1 %v4530_v45, %s6553_s26  ;;  %1035 = vrot.lane.b32.xlu0 %v4544_v49, %s6567_s16 }
 0x143   : > { %1303 = vrot.lane.b32.xlu1 %v4530_v45, %s6546_s1  ;;  %1082 = vrot.lane.b32.xlu0 %v4544_v49, %s6563_s22 }
 0x147   : > { %1354 = vrot.lane.b32.xlu1 %v4530_v45, %s6558_s23  ;;  %1133 = vrot.lane.b32.xlu0 %v4544_v49, %s6544_s15 }
 0x14b   : > { %1184 = vrot.lane.b32.xlu1 %v4544_v49, %s6555_s18  ;;  %1256 = vrot.lane.b32.xlu0 %v4544_v49, %s6553_s26 }
 0x14f   : > { %1407 = vrot.lane.b32.xlu1 %v4516_v41, %s6560_s28  ;;  %1307 = vrot.lane.b32.xlu0 %v4544_v49, %s6546_s1 }
 0x153   : > { %1409 = vrot.lane.b32.xlu1 %v4544_v49, %s6560_s28  ;;  %1358 = vrot.lane.b32.xlu0 %v4544_v49, %s6558_s23 }
 0x157   : > { %1458 = vperm.xlu1 %4243, %v1454_v50   ;;  %1463 = vperm.xlu0 %4242, %v1455_v51  }
 0x15b   : > { %1474 = vperm.xlu1 %4243, %v1470_v54   ;;  %1479 = vperm.xlu0 %4242, %v1471_v55   ;;  %v1063_v54 = vshrl.u32 %v1037_v48, 7 }
 0x15f   : > { %1680 = vperm.xlu1 %4243, %v1676_v58   ;;  %1685 = vperm.xlu0 %4242, %v1677_v59   ;;  %v4654_v59 = vand.u32 127, %v1037_v48 }
 0x161   : > { %vm1135_vm1 = vcmp.lt.s32.totalorder %v4654_v59, 15  ;;  %vm1039_vm2 = vcmp.lt.s32.totalorder %v4654_v59, 17  ;;  %vm1084_vm3 = vcmp.lt.s32.totalorder %v4654_v59, 16  ;;  %vm1186_vm4 = vcmp.lt.s32.totalorder %v4654_v59, 1 }
 0x162   : > { %vm1360_vm5 = vcmp.lt.s32.totalorder %v4654_v59, 112  ;;  %vm1258_vm6 = vcmp.lt.s32.totalorder %v4654_v59, 127  ;;  %vm1309_vm7 = vcmp.lt.s32.totalorder %v4654_v59, 113  ;;  %vm1411_vm8 = vcmp.lt.s32.totalorder %v4654_v59, 111 }
 0x163   : > { %1696 = vperm.xlu1 %4243, %v1692_v60   ;;  %1701 = vperm.xlu0 %4242, %v1693_v61   ;;  %v4656_v60 = vsub.s32 0, %v1063_v54  ;;  %v4658_v61 = vsub.s32 1, %v1063_v54 }
 0x165   : > { %6626 = vst [vmem:[#allocation20_spill] sm:$0xff] %v4656_v60  ;;  %6627 = vst [vmem:[#allocation21_spill] sm:$0xff] %v4658_v61 }
 0x167   : > { %1778 = vperm.xlu1 %4243, %v4091_v2   ;;  %1733 = vperm.xlu0 %4242, %v1725_v3   ;;  %v1060_v2 = vld [vmem:[%s4308_s9] sm:$0x3] }
 0x16b   : > { %1773 = vperm.xlu1 %4243, %v4090_v7   ;;  %1728 = vperm.xlu0 %4242, %v1724_v8   ;;  %v4069_v7 = vld [vmem:[%s4308_s9 + $0x6] sm:$0x3]  ;;  %v4672_v8 = vmul.f32 %v4612_v15, %v4498_v37  ;;  %v4693_v37 = vrot.slane %v1060_v2, %v4658_v61 }
 0x16f   : > { %1822 = vperm.xlu1 %4243, %v4093_v9   ;;  %1827 = vperm.xlu0 %4242, %v4094_v10   ;;  %v4675_v9 = vrot.slane %v4066_v1, %v4656_v60  ;;  %v4678_v10 = vrot.slane %v4066_v1, %v4658_v61  ;;  %v4077_v1 = vld [vmem:[%s4308_s9 + $0xc] sm:$0x3] }
 0x173   : > { %1871 = vperm.xlu1 %4243, %v4096_v13   ;;  %1876 = vperm.xlu0 %4242, %v4097_v14   ;;  %v4063_v13 = vld [vmem:[%s4308_s9 + $0x2] sm:$0x3]  ;;  %v4683_v14 = vmul.f32 %v4612_v15, %v4516_v41  ;;  %v4701_v41 = vrot.slane %v4069_v7, %v4656_v60  ;;  %v4704_v15 = vrot.slane %v4069_v7, %v4658_v61 }
 0x177   : > { %1946 = vperm.xlu1 %4243, %v4102_v17   ;;  %1913 = vperm.xlu0 %4242, %v4100_v18   ;;  %v4687_v17 = vmul.f32 %v4606_v11, %v4530_v45  ;;  %v4690_v18 = vrot.slane %v1060_v2, %v4656_v60 }
 0x17b   : > { %1941 = vperm.xlu1 %4243, %v4101_v19   ;;  %1908 = vperm.xlu0 %4242, %v4099_v20   ;;  %v4698_v19 = vmul.f32 %v4606_v11, %v4544_v49 }
 0x17f   : > { %1990 = vperm.xlu1 %4243, %v4104_v23   ;;  %1995 = vperm.xlu0 %4242, %v4105_v24  }
 0x183   : > { %2039 = vperm.xlu1 %4243, %v4107_v27   ;;  %2044 = vperm.xlu0 %4242, %v4108_v28   ;;  %v1112_v27 = vrot.slane %v4063_v13, %v4656_v60  ;;  %v1116_v28 = vrot.slane %v4063_v13, %v4658_v61 }
 0x187   : > { %2088 = vperm.xlu1 %4243, %v4110_v29   ;;  %2093 = vperm.xlu0 %4242, %v4111_v30   ;;  %v4080_v29 = vld [vmem:[%s4308_s9 + $0xe] sm:$0x3] }
 0x188   : > { %v4741_v7 = vrot.slane %v4080_v29, %v4658_v61 }
 0x189   : > { %v1128_v33 = vpop.permute.xlu0 %1127  ;;  %v1030_v34 = vpop.permute.xlu1 %1029 }
 0x18a   : > { %6628 = vst [vmem:[#allocation22_spill] sm:$0xff] %v4741_v7 }
 0x18d   : > { %v1179_v35 = vpop.permute.xlu0 %1178  ;;  %v1077_v36 = vpop.permute.xlu1 %1076 }
 0x191   : > { %v4638_v38 = vpop.permute.xlu0 %1352  ;;  %v4640_v39 = vpop.permute.xlu1 %1250 }
 0x195   : > { %v4642_v40 = vpop.permute.xlu0 %1403  ;;  %v4644_v42 = vpop.permute.xlu1 %1301 }
 0x199   : > { %v1132_v43 = vpop.permute.xlu1 %1131  ;;  %v1034_v44 = vpop.permute.xlu0 %1033 }
 0x19a   : > { %v1136_v49 = vsel %vm1135_vm1, %v1128_v33, %v1132_v43  ;;  %v1138_v11 = vsel %vm1135_vm1, %v1132_v43, %v1128_v33  ;;  %v1040_v30 = vsel %vm1039_vm2, %v1030_v34, %v1034_v44 }
 0x19b   : > { %v1153_v2 = vmul.f32 %v4588_v63, %v1138_v11  ;;  %v4757_v11 = vrot.slane %v4077_v1, %v4656_v60 }
 0x19d   : > { %v1183_v46 = vpop.permute.xlu1 %1182  ;;  %v1081_v47 = vpop.permute.xlu0 %1080 }
 0x19e   : > { %v1085_v45 = vsel %vm1084_vm3, %v1077_v36, %v1081_v47  ;;  %v1087_v20 = vsel %vm1084_vm3, %v1081_v47, %v1077_v36  ;;  %v1042_v36 = vsel %vm1039_vm2, %v1034_v44, %v1030_v34  ;;  %v4074_v47 = vld [vmem:[%s4308_s9 + $0xa] sm:$0x3]  ;;  %v1187_v33 = vsel %vm1186_vm4, %v1179_v35, %v1183_v46 }
 0x19f   : > { %v1189_v43 = vsel %vm1186_vm4, %v1183_v46, %v1179_v35  ;;  %v1102_v48 = vmul.f32 %v4580_v57, %v1087_v20  ;;  %v1103_v54 = vmul.f32 %v4580_v57, %v1085_v45  ;;  %v1154_v34 = vmul.f32 %v4588_v63, %v1136_v49  ;;  %v4083_v63 = vld [vmem:[%s4308_s9 + $0x10] sm:$0x3] }
 0x1a0   : > { %v4738_v44 = vrot.slane %v4080_v29, %v4656_v60  ;;  %v1056_v35 = vmul.f32 %v4578_v56, %v1042_v36  ;;  %v1057_v46 = vmul.f32 %v4578_v56, %v1040_v30  ;;  %v4748_v57 = vrot.slane %v4074_v47, %v4656_v60 }
 0x1a1   : > { %v4646_v50 = vpop.permute.xlu1 %1356  ;;  %v4648_v51 = vpop.permute.xlu0 %1254  ;;  %v4751_v45 = vrot.slane %v4074_v47, %v4658_v61  ;;  %v1204_v20 = vmul.f32 %v4598_v6, %v1189_v43  ;;  %v1205_v49 = vmul.f32 %v4598_v6, %v1187_v33  ;;  %v4760_v29 = vrot.slane %v4077_v1, %v4658_v61 }
 0x1a2   : > { %v1119_v36 = vmul.f32 %v1112_v27, %v1102_v48  ;;  %v1120_v31 = vmul.f32 %v1116_v28, %v1103_v54  ;;  %v1170_v6 = vmul.f32 %v4675_v9, %v1153_v2  ;;  %v1171_v47 = vmul.f32 %v4678_v10, %v1154_v34 }
 0x1a3   : > { %v4774_v48 = vrot.slane %v4083_v63, %v4656_v60  ;;  %v4777_v54 = vrot.slane %v4083_v63, %v4658_v61  ;;  %v1072_v1 = vmul.f32 %v4690_v18, %v1056_v35  ;;  %v1073_v7 = vmul.f32 %v4693_v37, %v1057_v46 }
 0x1a4   : > { %v1221_v35 = vmul.f32 %v4701_v41, %v1204_v20  ;;  %v1222_v46 = vmul.f32 %v4704_v15, %v1205_v49 }
 0x1a5   : > { %v4650_v55 = vpop.permute.xlu0 %1305  ;;  %v4652_v58 = vpop.permute.xlu1 %1031  ;;  %6629 = vst [vmem:[#allocation23_spill] sm:$0xff] %v4774_v48  ;;  %6630 = vst [vmem:[#allocation24_spill] sm:$0xff] %v4777_v54  ;;  %v1123_v61 = vadd.f32 %v1119_v36, %v1072_v1  ;;  %v1124_v54 = vadd.f32 %v1120_v31, %v1073_v7  ;;  %v1259_v48 = vsel %vm1258_vm6, %v4640_v39, %v4648_v51 }
 0x1a6   : > { %v1361_v31 = vsel %vm1360_vm5, %v4638_v38, %v4646_v50  ;;  %v1363_v7 = vsel %vm1360_vm5, %v4646_v50, %v4638_v38  ;;  %v1276_v38 = vmul.f32 %v4614_v16, %v1259_v48 }
 0x1a7   : > { %v1174_v49 = vadd.f32 %v1170_v6, %v1123_v61  ;;  %v1175_v36 = vadd.f32 %v1171_v47, %v1124_v54  ;;  %v1312_v6 = vsel %vm1309_vm7, %v4650_v55, %v4644_v42 }
 0x1a9   : > { %v4662_v3 = vpop.permute.xlu0 %1180  ;;  %v4664_v4 = vpop.permute.xlu1 %1078  ;;  %v1225_v48 = vadd.f32 %v1221_v35, %v1174_v49  ;;  %v1226_v54 = vadd.f32 %v1222_v46, %v1175_v36  ;;  %v1328_v35 = vmul.f32 %v4622_v22, %v1312_v6  ;;  %v1293_v46 = vmul.f32 %v4748_v57, %v1276_v38 }
 0x1ad   : > { %v4710_v23 = vpop.permute.xlu0 %1405  ;;  %v4712_v24 = vpop.permute.xlu1 %1129 }
 0x1b1   : > { %v4743_v13 = vpop.permute.xlu1 %1252  ;;  %v1036_v0 = vpop.permute.xlu0 %1035 }
 0x1b2   : > { %v1041_v56 = vsel %vm1039_vm2, %v4652_v58, %v1036_v0  ;;  %v1043_v30 = vsel %vm1039_vm2, %v1036_v0, %v4652_v58 }
 0x1b3   : > { %v1058_v2 = vmul.f32 %v4572_v52, %v1043_v30  ;;  %v1059_v34 = vmul.f32 %v4572_v52, %v1041_v56  ;;  %v1261_v52 = vsel %vm1258_vm6, %v4648_v51, %v4640_v39 }
 0x1b4   : > { %v1277_v50 = vmul.f32 %v4614_v16, %v1261_v52 }
 0x1b5   : > { %v4771_v33 = vpop.permute.xlu1 %1303  ;;  %v1083_v43 = vpop.permute.xlu0 %1082  ;;  %v1074_v51 = vmul.f32 %v4690_v18, %v1058_v2 }
 0x1b6   : > { %v1086_v0 = vsel %vm1084_vm3, %v4664_v4, %v1083_v43  ;;  %v1088_v58 = vsel %vm1084_vm3, %v1083_v43, %v4664_v4 }
 0x1b7   : > { %v1104_v60 = vmul.f32 %v4574_v53, %v1088_v58  ;;  %v1105_v63 = vmul.f32 %v4574_v53, %v1086_v0 }
 0x1b9   : > { %v1121_v4 = vmul.f32 %v1112_v27, %v1104_v60  ;;  %v1122_v56 = vmul.f32 %v1116_v28, %v1105_v63  ;;  %v4801_v30 = vpop.permute.xlu1 %1354  ;;  %v1134_v53 = vpop.permute.xlu0 %1133  ;;  %v1075_v60 = vmul.f32 %v4693_v37, %v1059_v34 }
 0x1ba   : > { %v1137_v20 = vsel %vm1135_vm1, %v4712_v24, %v1134_v53  ;;  %v1139_v39 = vsel %vm1135_vm1, %v1134_v53, %v4712_v24 }
 0x1bb   : > { %v1155_v27 = vmul.f32 %v4586_v62, %v1139_v39  ;;  %v1156_v28 = vmul.f32 %v4586_v62, %v1137_v20  ;;  %v1125_v43 = vadd.f32 %v1121_v4, %v1074_v51  ;;  %v1126_v1 = vadd.f32 %v1122_v56, %v1075_v60 }
 0x1bc   : > { %v1246_v20 = vadd.f32 %v4672_v8, %v1225_v48 }
 0x1bd   : > { %v1172_v24 = vmul.f32 %v4675_v9, %v1155_v27  ;;  %v1173_v18 = vmul.f32 %v4678_v10, %v1156_v28  ;;  %v1185_v0 = vpop.permute.xlu1 %1184  ;;  %v1257_v37 = vpop.permute.xlu0 %1256  ;;  %v1310_v10 = vsel %vm1309_vm7, %v4644_v42, %v4650_v55  ;;  %v1378_v42 = vmul.f32 %v4628_v26, %v1361_v31 }
 0x1be   : > { %v1188_v62 = vsel %vm1186_vm4, %v4662_v3, %v1185_v0  ;;  %v1190_v61 = vsel %vm1186_vm4, %v1185_v0, %v4662_v3  ;;  %v1260_v16 = vsel %vm1258_vm6, %v4743_v13, %v1257_v37  ;;  %v1262_v9 = vsel %vm1258_vm6, %v1257_v37, %v4743_v13 }
 0x1bf   : > { %v1206_v3 = vmul.f32 %v4596_v5, %v1190_v61  ;;  %v1207_v47 = vmul.f32 %v4596_v5, %v1188_v62  ;;  %v1176_v58 = vadd.f32 %v1172_v24, %v1125_v43  ;;  %v1177_v2 = vadd.f32 %v1173_v18, %v1126_v1  ;;  %v6631_v62 = vld [vmem:[#allocation22_spill] sm:$0xff] }
 0x1c0   : > { %v1278_v63 = vmul.f32 %v4608_v12, %v1260_v16  ;;  %v1279_v52 = vmul.f32 %v4608_v12, %v1262_v9  ;;  %v1379_v55 = vmul.f32 %v4628_v26, %v1363_v7  ;;  %v1327_v5 = vmul.f32 %v4622_v22, %v1310_v10  ;;  %v6632_v9 = vld [vmem:[#allocation19_spill] sm:$0xff] }
 0x1c1   : > { %v1223_v13 = vmul.f32 %v4701_v41, %v1206_v3  ;;  %v1224_v34 = vmul.f32 %v4704_v15, %v1207_v47  ;;  %v1408_v4 = vpop.permute.xlu1 %1407  ;;  %v1308_v56 = vpop.permute.xlu0 %1307  ;;  %v1294_v41 = vmul.f32 %v4751_v45, %v1277_v50  ;;  %v1247_v12 = vadd.f32 %v4683_v14, %v1226_v54  ;;  %v6633_v47 = vld [vmem:[#allocation23_spill] sm:$0xff] }
 0x1c2   : > { %v1311_v31 = vsel %vm1309_vm7, %v4771_v33, %v1308_v56  ;;  %v1313_v26 = vsel %vm1309_vm7, %v1308_v56, %v4771_v33  ;;  %v1295_v39 = vmul.f32 %v4748_v57, %v1278_v63  ;;  %v1296_v51 = vmul.f32 %v4751_v45, %v1279_v52 }
 0x1c3   : > { %v1227_v53 = vadd.f32 %v1223_v13, %v1176_v58  ;;  %v1228_v15 = vadd.f32 %v1224_v34, %v1177_v2  ;;  %v1344_v8 = vmul.f32 %v4757_v11, %v1327_v5  ;;  %v1345_v14 = vmul.f32 %v4760_v29, %v1328_v35 }
 0x1c4   : > { %v1329_v27 = vmul.f32 %v4620_v21, %v1311_v31  ;;  %v1330_v28 = vmul.f32 %v4620_v21, %v1313_v26  ;;  %v1297_v45 = vadd.f32 %v1293_v46, %v1246_v20  ;;  %v1298_v33 = vadd.f32 %v1294_v41, %v1247_v12 }
 0x1c5   : > { %v1248_v22 = vadd.f32 %v4687_v17, %v1227_v53  ;;  %v1249_v7 = vadd.f32 %v4698_v19, %v1228_v15  ;;  %v1359_v60 = vpop.permute.xlu0 %1358  ;;  %v1412_v17 = vsel %vm1411_vm8, %v4642_v40, %v1408_v4  ;;  %v1414_v19 = vsel %vm1411_vm8, %v1408_v4, %v4642_v40  ;;  %v1410_v57 = vpop.permute.xlu1 %1409 }
 0x1c6   : > { %v1362_v38 = vsel %vm1360_vm5, %v4801_v30, %v1359_v60  ;;  %v1364_v21 = vsel %vm1360_vm5, %v1359_v60, %v4801_v30  ;;  %v1346_v50 = vmul.f32 %v4757_v11, %v1329_v27  ;;  %v1347_v43 = vmul.f32 %v4760_v29, %v1330_v28  ;;  %v1574_v27 = vpop.f32.mrf.mxu1 }
 0x1c7   : > { %v1299_v49 = vadd.f32 %v1295_v39, %v1248_v22  ;;  %v1300_v36 = vadd.f32 %v1296_v51, %v1249_v7  ;;  %v1380_v1 = vmul.f32 %v4626_v25, %v1362_v38  ;;  %v1381_v24 = vmul.f32 %v4626_v25, %v1364_v21  ;;  %v1498_v51 = vld [vmem:[%s4343_s8] sm:$0xff] }
 0x1c8   : > { %v1429_v40 = vmul.f32 %v4636_v32, %v1412_v17  ;;  %v1430_v18 = vmul.f32 %v4636_v32, %v1414_v19  ;;  %v1413_v0 = vsel %vm1411_vm8, %v4710_v23, %v1410_v57  ;;  %v1415_v30 = vsel %vm1411_vm8, %v1410_v57, %v4710_v23  ;;  %v6634_v23 = vld [vmem:[#allocation24_spill] sm:$0xff] }
 0x1c9   : > { %v1350_v37 = vadd.f32 %v1346_v50, %v1299_v49  ;;  %v1351_v11 = vadd.f32 %v1347_v43, %v1300_v36  ;;  %v1397_v29 = vmul.f32 %v4738_v44, %v1380_v1  ;;  %v1398_v61 = vmul.f32 %v6631_v62, %v1381_v24 }
 0x1ca   : > { %v1348_v25 = vadd.f32 %v1344_v8, %v1297_v45  ;;  %v1349_v16 = vadd.f32 %v1345_v14, %v1298_v33  ;;  %v1431_v10 = vmul.f32 %v6632_v9, %v1413_v0  ;;  %v1432_v32 = vmul.f32 %v6632_v9, %v1415_v30  ;;  %v1499_v8 = vld [vmem:[%s4343_s8 + $0x8] sm:$0xff]  ;;  %v1576_v33 = vpop.f32.mrf.mxu1 }
 0x1cb   : > { %v1395_v6 = vmul.f32 %v4738_v44, %v1378_v42  ;;  %v1396_v3 = vmul.f32 %v6631_v62, %v1379_v55  ;;  %v1446_v48 = vmul.f32 %v6633_v47, %v1429_v40  ;;  %v1447_v54 = vmul.f32 %v6634_v23, %v1430_v18 }
 0x1cc   : > { %v1401_v58 = vadd.f32 %v1397_v29, %v1350_v37  ;;  %v1402_v2 = vadd.f32 %v1398_v61, %v1351_v11  ;;  %v1448_v13 = vmul.f32 %v6633_v47, %v1431_v10  ;;  %v1449_v34 = vmul.f32 %v6634_v23, %v1432_v32  ;;  %v1580_v43 = vpop.f32.mrf.mxu1  ;;  %v2121_v10 = vld [vmem:[%s6622_s6 + $0x8] sm:$0xff]  ;;  %v2120_v32 = vld [vmem:[%s6622_s6] sm:$0xff]  ;;  %s6662_s6 = sld [smem:[#allocation14_spill]] }
 0x1cd   : > { %v1399_v63 = vadd.f32 %v1395_v6, %v1348_v25  ;;  %v1400_v52 = vadd.f32 %v1396_v3, %v1349_v16  ;;  %v6636_v60 = vmov 0.0   ;;  %v2137_v47 = vld [vmem:[%s6637_s10 + $0x8] sm:$0xff] }
 0x1ce   : > { %v1452_v42 = vadd.f32 %v1448_v13, %v1401_v58  ;;  %v1453_v55 = vadd.f32 %v1449_v34, %v1402_v2  ;;  %v1582_v11 = vpop.f32.mrf.mxu1  ;;  %v2245_v58 = vld [vmem:[%s6638_s2] sm:$0xff]  ;;  %v2246_v2 = vld [vmem:[%s6638_s2 + $0x8] sm:$0x3]  ;;  %s6657_s2 = smov 112  }
 0x1cf   : > { %v1450_v5 = vadd.f32 %v1446_v48, %v1399_v63  ;;  %v1451_v44 = vadd.f32 %v1447_v54, %v1400_v52  ;;  %v2136_v48 = vld [vmem:[%s6637_s10] sm:$0xff] }
 0x1d2   : > { %v1459_v4 = vpop.permute.xlu1 %1458  ;;  %v1464_v56 = vpop.permute.xlu0 %1463 }
 0x1d3   : > { %v1466_v35 = vmul.f32 %v1459_v4, %v1450_v5  ;;  %v1467_v46 = vmul.f32 %v1459_v4, %v1451_v44  ;;  %v1468_v41 = vmul.f32 %v1464_v56, %v1452_v42  ;;  %v1469_v53 = vmul.f32 %v1464_v56, %v1453_v55 }
 0x1d6   : > { %v1475_v15 = vpop.permute.xlu1 %1474  ;;  %v1480_v20 = vpop.permute.xlu0 %1479 }
 0x1d7   : > { %v1482_v12 = vadd.f32 %v1475_v15, %v1466_v35  ;;  %v1483_v31 = vadd.f32 %v1475_v15, %v1467_v46  ;;  %v1484_v26 = vadd.f32 %v1480_v20, %v1468_v41  ;;  %v1485_v22 = vadd.f32 %v1480_v20, %v1469_v53 }
 0x1d9   : > { %1490 = vst [vmem:[%s4910_s0] sm:$0xff] %v1482_v12  ;;  %1491 = vst [vmem:[%s4910_s0 + $0x8] sm:$0xff] %v1483_v31 }
 0x1da   : > { %1488 = vst [vmem:[#allocation2 + $0x58] sm:$0x3] %v1484_v26  ;;  %1489 = vst [vmem:[#allocation2 + $0x18] sm:$0x3] %v1485_v22  ;;  %v1681_v14 = vpop.permute.xlu1 %1680  ;;  %v1686_v18 = vpop.permute.xlu0 %1685 }
 0x1db   : > { %1492 = vst [vmem:[%s4910_s0 + $0x10] sm:$0x3] %v1484_v26  ;;  %1493 = vst [vmem:[%s4910_s0 + $0x18] sm:$0x3] %v1485_v22 }
 0x1de   : > { %v1697_v17 = vpop.permute.xlu1 %1696  ;;  %v1702_v30 = vpop.permute.xlu0 %1701 }
 0x1e1   : > { %v1497_v7 = vld [vmem:[#allocation2 + $0x18] sm:$0x3] }
 0x1e2   : > { %v1496_v39 = vld [vmem:[#allocation2 + $0x58] sm:$0x3]  ;;  %4086 = vmatprep.subr.msk.mxu0 %vm1592_vm9, %v1497_v7  ;;  %v4998_v6 = vpop.permute.xlu1 %1778  ;;  %v5000_v3 = vpop.permute.xlu0 %1733 }
 0x1e3   : > { %4087 = vmatpush1.msk.msra.mxu0 %vm1592_vm9, %v1496_v39 }
 0x1e4   : > { %1629 = vmatprep.subr.mxu0 %v1483_v31 }
 0x1e5   : > { %1630 = vmatpush1.msra.mxu0 %v1482_v12 }
 0x1e6   : > { %4088 = vmatmul.mubr.msk.f32.vlgmr.msra.gmra.mxu0 %vm1585_vm10, %v1498_v51  ;;  %v5004_v23 = vpop.permute.xlu1 %1773  ;;  %v5006_v54 = vpop.permute.xlu0 %1728 }
 0x1e7   : > { %1669 = vmatprep.mubr.f32.mxu0 %v6636_v60 }
 0x1ea   : > { %4089 = vmatmul.mubr.msk.f32.gmra.mxu0 %vm1585_vm10, %v1499_v8  ;;  %v5012_v63 = vpop.permute.xlu1 %1822  ;;  %v5014_v52 = vpop.permute.xlu0 %1827 }
 0x1eb   : > { %2835 = vmatprep.mubr.f32.mxu0 %v6636_v60 }
 0x1ee   : > { %v5018_v5 = vpop.permute.xlu1 %1871  ;;  %v5020_v44 = vpop.permute.xlu0 %1876 }
 0x1f2   : > { %v5026_v41 = vpop.permute.xlu1 %1946  ;;  %v5028_v53 = vpop.permute.xlu0 %1913 }
 0x1f6   : > { %v5032_v12 = vpop.permute.xlu1 %1941  ;;  %v5034_v31 = vpop.permute.xlu0 %1908 }
 0x1fa   : > { %v5040_v51 = vpop.permute.xlu1 %1990  ;;  %v5042_v8 = vpop.permute.xlu0 %1995 }
 0x2a6   : > { %v1665_v28 = vpop.f32.mrf.mxu0 }
 0x2a7   : > { %v1666_v49 = vadd.f32 %v1665_v28, %v1574_v27  ;;  %v5046_v28 = vpop.permute.xlu1 %2039 }
 0x2a8   : > { %v1667_v45 = vpop.f32.mrf.mxu0 }
 0x2a9   : > { %v1688_v36 = vmul.f32 %v1681_v14, %v1666_v49  ;;  %v1668_v38 = vadd.f32 %v1667_v45, %v1576_v33  ;;  %v5048_v49 = vpop.permute.xlu0 %2044 }
 0x2aa   : > { %v1671_v1 = vpop.f32.mrf.mxu0 }
 0x2ab   : > { %v1704_v19 = vadd.f32 %v1697_v17, %v1688_v36  ;;  %v1689_v21 = vmul.f32 %v1681_v14, %v1668_v38  ;;  %v1672_v40 = vadd.f32 %v1671_v1, %v1580_v43  ;;  %v5054_v33 = vpop.permute.xlu1 %2088 }
 0x2ac   : > { %v1673_v29 = vpop.f32.mrf.mxu0 }
 0x2ad   : > { %v4924_v57 = vmax.f32 %v1704_v19, 0.0  ;;  %v1705_v50 = vadd.f32 %v1697_v17, %v1689_v21  ;;  %v1690_v0 = vmul.f32 %v1686_v18, %v1672_v40  ;;  %v1674_v61 = vadd.f32 %v1673_v29, %v1582_v11  ;;  %v5056_v38 = vpop.permute.xlu0 %2093 }
 0x2ae   : > { %6641 = vst [vmem:[#allocation22_spill] sm:$0xff] %v5056_v38 }
 0x2af   : > { %1805 = vrot.lane.b32.xlu0 %v4924_v57, %s6544_s15  ;;  %1712 = vrot.lane.b32.xlu1 %v4924_v57, %s6567_s16  ;;  %v4942_v24 = vmax.f32 %v1705_v50, 0.0  ;;  %v1706_v37 = vadd.f32 %v1702_v30, %v1690_v0  ;;  %v1691_v25 = vmul.f32 %v1686_v18, %v1674_v61 }
 0x2b1   : > { %v4956_v62 = vmax.f32 %v1706_v37, 0.0  ;;  %v1707_v16 = vadd.f32 %v1702_v30, %v1691_v25 }
 0x2b3   : > { %1854 = vrot.lane.b32.xlu0 %v4924_v57, %s6555_s18  ;;  %1756 = vrot.lane.b32.xlu1 %v4924_v57, %s6563_s22  ;;  %v4970_v9 = vmax.f32 %v1707_v16, 0.0 }
 0x2b7   : > { %2022 = vrot.lane.b32.xlu0 %v4924_v57, %s6558_s23  ;;  %1924 = vrot.lane.b32.xlu1 %v4924_v57, %s6553_s26 }
 0x2bb   : > { %2071 = vrot.lane.b32.xlu0 %v4924_v57, %s6560_s28  ;;  %1973 = vrot.lane.b32.xlu1 %v4924_v57, %s6546_s1 }
 0x2bf   : > { %1716 = vrot.lane.b32.xlu0 %v4942_v24, %s6567_s16  ;;  %1809 = vrot.lane.b32.xlu1 %v4942_v24, %s6544_s15 }
 0x2c3   : > { %1760 = vrot.lane.b32.xlu0 %v4942_v24, %s6563_s22  ;;  %1858 = vrot.lane.b32.xlu1 %v4942_v24, %s6555_s18 }
 0x2c7   : > { %1928 = vrot.lane.b32.xlu0 %v4942_v24, %s6553_s26  ;;  %2026 = vrot.lane.b32.xlu1 %v4942_v24, %s6558_s23 }
 0x2cb   : > { %1977 = vrot.lane.b32.xlu0 %v4942_v24, %s6546_s1  ;;  %1714 = vrot.lane.b32.xlu1 %v4956_v62, %s6567_s16 }
 0x2cf   : > { %1856 = vrot.lane.b32.xlu0 %v4956_v62, %s6555_s18  ;;  %1758 = vrot.lane.b32.xlu1 %v4956_v62, %s6563_s22 }
 0x2d3   : > { %2073 = vrot.lane.b32.xlu0 %v4956_v62, %s6560_s28  ;;  %1807 = vrot.lane.b32.xlu1 %v4956_v62, %s6544_s15 }
 0x2d7   : > { %1718 = vrot.lane.b32.xlu0 %v4970_v9, %s6567_s16  ;;  %1926 = vrot.lane.b32.xlu1 %v4956_v62, %s6553_s26 }
 0x2db   : > { %1762 = vrot.lane.b32.xlu0 %v4970_v9, %s6563_s22  ;;  %1975 = vrot.lane.b32.xlu1 %v4956_v62, %s6546_s1 }
 0x2df   : > { %1811 = vrot.lane.b32.xlu0 %v4970_v9, %s6544_s15  ;;  %2024 = vrot.lane.b32.xlu1 %v4956_v62, %s6558_s23  ;;  %s6639_s15 = sld [smem:[#allocation9_spill]] }
 0x2e3   : > { %1930 = vrot.lane.b32.xlu0 %v4970_v9, %s6553_s26  ;;  %1860 = vrot.lane.b32.xlu1 %v4970_v9, %s6555_s18  ;;  %s6651_s26 = sld [smem:[#allocation7_spill]]  ;;  %s6653_s18 = smov 15  }
 0x2e5   : > { %v2261_v13 = vld [vmem:[%s6639_s15] sm:$0xff]  ;;  %v2262_v34 = vld [vmem:[%s6639_s15 + $0x8] sm:$0x3] }
 0x2e7   : > { %1979 = vrot.lane.b32.xlu0 %v4970_v9, %s6546_s1  ;;  %2075 = vrot.lane.b32.xlu1 %v4942_v24, %s6560_s28  ;;  %s6640_s1 = sld [smem:[#allocation10_spill]] }
 0x2eb   : > { %2028 = vrot.lane.b32.xlu0 %v4970_v9, %s6558_s23  ;;  %2077 = vrot.lane.b32.xlu1 %v4970_v9, %s6560_s28 }
 0x2ed   : > { %v2293_v4 = vld [vmem:[%s6640_s1] sm:$0xff]  ;;  %v2294_v56 = vld [vmem:[%s6640_s1 + $0x8] sm:$0x3]  ;;  %v4115_v42 = vld [vmem:[%s6640_s1 + $0x10] sm:$0xff] }
 0x2ee   : > { %v4116_v55 = vld [vmem:[%s6640_s1 + $0x18] sm:$0x3]  ;;  %v4118_v35 = vld [vmem:[%s6640_s1 + $0x20] sm:$0xff]  ;;  %v4119_v46 = vld [vmem:[%s6640_s1 + $0x28] sm:$0x3] }
 0x2ef   : > { %2129 = vperm.xlu0 %4242, %v2121_v10   ;;  %2124 = vperm.xlu1 %4243, %v2120_v32   ;;  %v4121_v15 = vld [vmem:[%s6640_s1 + $0x30] sm:$0xff]  ;;  %v4122_v20 = vld [vmem:[%s6640_s1 + $0x38] sm:$0x3]  ;;  %v4124_v26 = vld [vmem:[%s6640_s1 + $0x40] sm:$0xff] }
 0x2f0   : > { %v4125_v22 = vld [vmem:[%s6640_s1 + $0x48] sm:$0x3]  ;;  %v4126_v7 = vld [vmem:[%s6640_s1 + $0x50] sm:$0xff]  ;;  %v4127_v39 = vld [vmem:[%s6640_s1 + $0x58] sm:$0x3] }
 0x2f1   : > { %v4130_v14 = vld [vmem:[%s6640_s1 + $0x68] sm:$0x3]  ;;  %v4129_v27 = vld [vmem:[%s6640_s1 + $0x60] sm:$0xff]  ;;  %v4133_v36 = vld [vmem:[%s6640_s1 + $0x78] sm:$0x3] }
 0x2f2   : > { %v4132_v17 = vld [vmem:[%s6640_s1 + $0x70] sm:$0xff]  ;;  %v4136_v19 = vld [vmem:[%s6640_s1 + $0x88] sm:$0x3]  ;;  %v4135_v45 = vld [vmem:[%s6640_s1 + $0x80] sm:$0xff]  ;;  %s6654_s1 = smov 1  }
 0x2f3   : > { %2145 = vperm.xlu0 %4242, %v2137_v47   ;;  %2140 = vperm.xlu1 %4243, %v2136_v48   ;;  %v1740_v47 = vld [vmem:[%s4308_s9] sm:$0x3] }
 0x2f7   : > { %2249 = vperm.xlu0 %4242, %v2245_v58   ;;  %2254 = vperm.xlu1 %4243, %v2246_v2   ;;  %v4092_v2 = vld [vmem:[%s4308_s9 + $0x2] sm:$0x3] }
 0x2fb   : > { %2265 = vperm.xlu0 %4242, %v2261_v13   ;;  %2270 = vperm.xlu1 %4243, %v2262_v34  }
 0x2ff   : > { %2297 = vperm.xlu0 %4242, %v2293_v4   ;;  %2302 = vperm.xlu1 %4243, %v2294_v56   ;;  %v6642_v4 = vld [vmem:[#allocation20_spill] sm:$0xff] }
 0x300   : > { %v5081_v56 = vrot.slane %v1740_v47, %v6642_v4 }
 0x303   : > { %2342 = vperm.xlu0 %4242, %v4115_v42   ;;  %2347 = vperm.xlu1 %4243, %v4116_v55   ;;  %v6643_v42 = vld [vmem:[#allocation21_spill] sm:$0xff] }
 0x304   : > { %v5084_v55 = vrot.slane %v1740_v47, %v6643_v42 }
 0x307   : > { %2391 = vperm.xlu0 %4242, %v4118_v35   ;;  %2396 = vperm.xlu1 %4243, %v4119_v46  }
 0x30b   : > { %2440 = vperm.xlu0 %4242, %v4121_v15   ;;  %2445 = vperm.xlu1 %4243, %v4122_v20   ;;  %v4095_v15 = vld [vmem:[%s4308_s9 + $0x4] sm:$0x3]  ;;  %v5092_v20 = vrot.slane %v4092_v2, %v6642_v4 }
 0x30f   : > { %2477 = vperm.xlu0 %4242, %v4124_v26   ;;  %2482 = vperm.xlu1 %4243, %v4125_v22   ;;  %v5095_v26 = vrot.slane %v4092_v2, %v6643_v42 }
 0x313   : > { %2510 = vperm.xlu0 %4242, %v4126_v7   ;;  %2515 = vperm.xlu1 %4243, %v4127_v39   ;;  %v4098_v39 = vld [vmem:[%s4308_s9 + $0x6] sm:$0x3] }
 0x317   : > { %2564 = vperm.xlu0 %4242, %v4130_v14   ;;  %2559 = vperm.xlu1 %4243, %v4129_v27  }
 0x31b   : > { %2613 = vperm.xlu0 %4242, %v4133_v36   ;;  %2608 = vperm.xlu1 %4243, %v4132_v17   ;;  %v5106_v36 = vmul.f32 %v5034_v31, %v4942_v24  ;;  %v5110_v17 = vmul.f32 %v5034_v31, %v4924_v57  ;;  %v5123_v24 = vrot.slane %v4095_v15, %v6642_v4  ;;  %v4103_v57 = vld [vmem:[%s4308_s9 + $0xa] sm:$0x3]  ;;  %v4109_v31 = vld [vmem:[%s4308_s9 + $0xe] sm:$0x3] }
 0x31f   : > { %2662 = vperm.xlu0 %4242, %v4136_v19   ;;  %2657 = vperm.xlu1 %4243, %v4135_v45   ;;  %v5114_v19 = vmul.f32 %v5028_v53, %v4956_v62 }
 0x321   : > { %v1806_v21 = vpop.permute.xlu0 %1805  ;;  %v1713_v50 = vpop.permute.xlu1 %1712 }
 0x325   : > { %v1855_v43 = vpop.permute.xlu0 %1854  ;;  %v1757_v1 = vpop.permute.xlu1 %1756 }
 0x329   : > { %v5058_v40 = vpop.permute.xlu0 %2022  ;;  %v5060_v18 = vpop.permute.xlu1 %1924 }
 0x32d   : > { %v5062_v0 = vpop.permute.xlu0 %2071  ;;  %v5064_v30 = vpop.permute.xlu1 %1973 }
 0x331   : > { %v1717_v37 = vpop.permute.xlu0 %1716  ;;  %v1810_v11 = vpop.permute.xlu1 %1809 }
 0x332   : > { %v1720_v35 = vsel %vm1039_vm2, %v1713_v50, %v1717_v37  ;;  %v1722_v46 = vsel %vm1039_vm2, %v1717_v37, %v1713_v50  ;;  %v1813_v62 = vsel %vm1135_vm1, %v1806_v21, %v1810_v11 }
 0x333   : > { %v1736_v45 = vmul.f32 %v5006_v54, %v1722_v46  ;;  %v1737_v50 = vmul.f32 %v5006_v54, %v1720_v35  ;;  %v5138_v54 = vrot.slane %v4098_v39, %v6643_v42  ;;  %v5154_v46 = vrot.slane %v4109_v31, %v6642_v4 }
 0x335   : > { %v1761_v29 = vpop.permute.xlu0 %1760  ;;  %v1859_v61 = vpop.permute.xlu1 %1858  ;;  %6645 = vst [vmem:[#allocation23_spill] sm:$0xff] %v5154_v46 }
 0x336   : > { %v1764_v13 = vsel %vm1084_vm3, %v1757_v1, %v1761_v29  ;;  %v1766_v34 = vsel %vm1084_vm3, %v1761_v29, %v1757_v1  ;;  %v5126_v1 = vrot.slane %v4095_v15, %v6643_v42  ;;  %v1862_v47 = vsel %vm1186_vm4, %v1855_v43, %v1859_v61 }
 0x337   : > { %v1781_v22 = vmul.f32 %v5004_v23, %v1766_v34  ;;  %v1782_v7 = vmul.f32 %v5004_v23, %v1764_v13  ;;  %v5118_v23 = vmul.f32 %v5028_v53, %v4970_v9  ;;  %v1815_v9 = vsel %vm1135_vm1, %v1810_v11, %v1806_v21  ;;  %v4106_v13 = vld [vmem:[%s4308_s9 + $0xc] sm:$0x3] }
 0x338   : > { %v5135_v53 = vrot.slane %v4098_v39, %v6642_v4  ;;  %v1864_v2 = vsel %vm1186_vm4, %v1859_v61, %v1855_v43  ;;  %v5148_v21 = vrot.slane %v4103_v57, %v6642_v4  ;;  %v5151_v11 = vrot.slane %v4103_v57, %v6643_v42 }
 0x339   : > { %v5066_v25 = vpop.permute.xlu0 %1928  ;;  %v5068_v16 = vpop.permute.xlu1 %2026  ;;  %v1797_v37 = vmul.f32 %v5092_v20, %v1781_v22  ;;  %v1798_v29 = vmul.f32 %v5095_v26, %v1782_v7  ;;  %v5157_v15 = vrot.slane %v4109_v31, %v6643_v42  ;;  %v4112_v22 = vld [vmem:[%s4308_s9 + $0x10] sm:$0x3]  ;;  %v1752_v7 = vmul.f32 %v5081_v56, %v1736_v45 }
 0x33a   : > { %v1753_v43 = vmul.f32 %v5084_v55, %v1737_v50  ;;  %v1830_v61 = vmul.f32 %v5012_v63, %v1815_v9  ;;  %v1831_v39 = vmul.f32 %v5012_v63, %v1813_v62  ;;  %v1879_v60 = vmul.f32 %v5018_v5, %v1864_v2 }
 0x33b   : > { %6646 = vst [vmem:[#allocation24_spill] sm:$0xff] %v5157_v15  ;;  %v1880_v57 = vmul.f32 %v5018_v5, %v1862_v47  ;;  %v5167_v38 = vrot.slane %v4106_v13, %v6642_v4  ;;  %v5170_v46 = vrot.slane %v4106_v13, %v6643_v42  ;;  %v1801_v31 = vadd.f32 %v1797_v37, %v1752_v7 }
 0x33c   : > { %v1802_v15 = vadd.f32 %v1798_v29, %v1753_v43  ;;  %v5173_v50 = vrot.slane %v4112_v22, %v6642_v4  ;;  %v5176_v9 = vrot.slane %v4112_v22, %v6643_v42  ;;  %v1846_v29 = vmul.f32 %v5123_v24, %v1830_v61 }
 0x33d   : > { %v5070_v10 = vpop.permute.xlu0 %1977  ;;  %v1715_v32 = vpop.permute.xlu1 %1714  ;;  %v1847_v47 = vmul.f32 %v5126_v1, %v1831_v39  ;;  %v1895_v22 = vmul.f32 %v5135_v53, %v1879_v60  ;;  %v1896_v7 = vmul.f32 %v5138_v54, %v1880_v57  ;;  %v2032_v60 = vsel %vm1360_vm5, %v5068_v16, %v5058_v40 }
 0x33e   : > { %v1850_v39 = vadd.f32 %v1846_v29, %v1801_v31  ;;  %v1981_v31 = vsel %vm1309_vm7, %v5064_v30, %v5070_v10 }
 0x33f   : > { %v1851_v57 = vadd.f32 %v1847_v47, %v1802_v15 }
 0x341   : > { %v5073_v48 = vpop.permute.xlu0 %1856  ;;  %v1759_v58 = vpop.permute.xlu1 %1758 }
 0x345   : > { %v5100_v14 = vpop.permute.xlu0 %2073  ;;  %v5102_v27 = vpop.permute.xlu1 %1807 }
 0x346   : > { %6644 = vst [vmem:[#allocation19_spill] sm:$0xff] %v5100_v14 }
 0x349   : > { %v1719_v34 = vpop.permute.xlu0 %1718  ;;  %v1927_v35 = vpop.permute.xlu1 %1926 }
 0x34a   : > { %v1721_v63 = vsel %vm1039_vm2, %v1715_v32, %v1719_v34  ;;  %v1723_v5 = vsel %vm1039_vm2, %v1719_v34, %v1715_v32  ;;  %v1932_v32 = vsel %vm1258_vm6, %v5060_v18, %v5066_v25 }
 0x34b   : > { %v1739_v34 = vmul.f32 %v5000_v3, %v1721_v63  ;;  %v1949_v63 = vmul.f32 %v5032_v12, %v1932_v32 }
 0x34d   : > { %v1763_v14 = vpop.permute.xlu0 %1762  ;;  %v1976_v45 = vpop.permute.xlu1 %1975 }
 0x34e   : > { %v1765_v62 = vsel %vm1084_vm3, %v1759_v58, %v1763_v14  ;;  %v1767_v37 = vsel %vm1084_vm3, %v1763_v14, %v1759_v58  ;;  %v1934_v58 = vsel %vm1258_vm6, %v5066_v25, %v5060_v18  ;;  %v2030_v14 = vsel %vm1360_vm5, %v5058_v40, %v5068_v16 }
 0x34f   : > { %v1783_v2 = vmul.f32 %v4998_v6, %v1767_v37  ;;  %v1784_v13 = vmul.f32 %v4998_v6, %v1765_v62  ;;  %v1738_v6 = vmul.f32 %v5000_v3, %v1723_v5  ;;  %v1950_v15 = vmul.f32 %v5032_v12, %v1934_v58 }
 0x351   : > { %v1812_v43 = vpop.permute.xlu0 %1811  ;;  %v2025_v61 = vpop.permute.xlu1 %2024  ;;  %v1799_v62 = vmul.f32 %v5092_v20, %v1783_v2  ;;  %v1800_v40 = vmul.f32 %v5095_v26, %v1784_v13  ;;  %v1983_v20 = vsel %vm1309_vm7, %v5070_v10, %v5064_v30  ;;  %v1754_v26 = vmul.f32 %v5081_v56, %v1738_v6 }
 0x352   : > { %v1814_v18 = vsel %vm1135_vm1, %v5102_v27, %v1812_v43  ;;  %v1816_v25 = vsel %vm1135_vm1, %v1812_v43, %v5102_v27  ;;  %v1755_v27 = vmul.f32 %v5084_v55, %v1739_v34  ;;  %v1899_v56 = vadd.f32 %v1895_v22, %v1850_v39 }
 0x353   : > { %v1832_v16 = vmul.f32 %v5014_v52, %v1816_v25  ;;  %v1833_v3 = vmul.f32 %v5014_v52, %v1814_v18  ;;  %v1900_v55 = vadd.f32 %v1896_v7, %v1851_v57  ;;  %v1998_v2 = vmul.f32 %v5040_v51, %v1981_v31 }
 0x354   : > { %v1999_v13 = vmul.f32 %v5040_v51, %v1983_v20  ;;  %v1966_v57 = vmul.f32 %v5151_v11, %v1950_v15  ;;  %v2047_v25 = vmul.f32 %v5046_v28, %v2030_v14 }
 0x355   : > { %v1848_v52 = vmul.f32 %v5123_v24, %v1832_v16  ;;  %v1849_v5 = vmul.f32 %v5126_v1, %v1833_v3  ;;  %v1931_v37 = vpop.permute.xlu0 %1930  ;;  %v1861_v12 = vpop.permute.xlu1 %1860  ;;  %v1803_v24 = vadd.f32 %v1799_v62, %v1754_v26  ;;  %v1804_v1 = vadd.f32 %v1800_v40, %v1755_v27 }
 0x356   : > { %v1933_v29 = vsel %vm1258_vm6, %v1927_v35, %v1931_v37  ;;  %v1935_v47 = vsel %vm1258_vm6, %v1931_v37, %v1927_v35  ;;  %v1863_v30 = vsel %vm1186_vm4, %v5073_v48, %v1861_v12  ;;  %v1865_v10 = vsel %vm1186_vm4, %v1861_v12, %v5073_v48 }
 0x357   : > { %v1881_v32 = vmul.f32 %v5020_v44, %v1865_v10  ;;  %v1882_v35 = vmul.f32 %v5020_v44, %v1863_v30  ;;  %v1852_v58 = vadd.f32 %v1848_v52, %v1803_v24  ;;  %v1853_v6 = vadd.f32 %v1849_v5, %v1804_v1  ;;  %v6648_v10 = vld [vmem:[#allocation23_spill] sm:$0xff]  ;;  %v6650_v1 = vld [vmem:[#allocation22_spill] sm:$0xff] }
 0x358   : > { %v1951_v34 = vmul.f32 %v5026_v41, %v1933_v29  ;;  %v1952_v43 = vmul.f32 %v5026_v41, %v1935_v47  ;;  %v1965_v44 = vmul.f32 %v5148_v21, %v1949_v63  ;;  %v2048_v41 = vmul.f32 %v5046_v28, %v2032_v60  ;;  %v6647_v29 = vld [vmem:[#allocation19_spill] sm:$0xff] }
 0x359   : > { %v1980_v18 = vpop.permute.xlu0 %1979  ;;  %v2076_v48 = vpop.permute.xlu1 %2075  ;;  %v1897_v22 = vmul.f32 %v5135_v53, %v1881_v32  ;;  %v1898_v7 = vmul.f32 %v5138_v54, %v1882_v35  ;;  %v1920_v62 = vadd.f32 %v5110_v17, %v1899_v56  ;;  %v1921_v53 = vadd.f32 %v5106_v36, %v1900_v55  ;;  %v6649_v55 = vld [vmem:[#allocation24_spill] sm:$0xff] }
 0x35a   : > { %v1982_v39 = vsel %vm1309_vm7, %v1976_v45, %v1980_v18  ;;  %v1984_v51 = vsel %vm1309_vm7, %v1980_v18, %v1976_v45  ;;  %v2014_v16 = vmul.f32 %v5167_v38, %v1998_v2  ;;  %v2015_v3 = vmul.f32 %v5170_v46, %v1999_v13 }
 0x35b   : > { %v1901_v40 = vadd.f32 %v1897_v22, %v1852_v58  ;;  %v1902_v54 = vadd.f32 %v1898_v7, %v1853_v6  ;;  %v2000_v45 = vmul.f32 %v5042_v8, %v1982_v39  ;;  %v2001_v63 = vmul.f32 %v5042_v8, %v1984_v51 }
 0x35c   : > { %v1967_v15 = vmul.f32 %v5148_v21, %v1951_v34  ;;  %v1968_v14 = vmul.f32 %v5151_v11, %v1952_v43  ;;  %v2079_v36 = vsel %vm1411_vm8, %v5062_v0, %v2076_v48  ;;  %v2081_v60 = vsel %vm1411_vm8, %v2076_v48, %v5062_v0 }
 0x35d   : > { %v2029_v31 = vpop.permute.xlu0 %2028  ;;  %v1922_v28 = vadd.f32 %v5114_v19, %v1901_v40  ;;  %v1923_v17 = vadd.f32 %v5118_v23, %v1902_v54  ;;  %v2078_v20 = vpop.permute.xlu1 %2077  ;;  %v1969_v27 = vadd.f32 %v1965_v44, %v1920_v62  ;;  %v1970_v52 = vadd.f32 %v1966_v57, %v1921_v53 }
 0x35e   : > { %v2031_v8 = vsel %vm1360_vm5, %v2025_v61, %v2029_v31  ;;  %v2033_v21 = vsel %vm1360_vm5, %v2029_v31, %v2025_v61  ;;  %v2016_v5 = vmul.f32 %v5167_v38, %v2000_v45  ;;  %v2017_v37 = vmul.f32 %v5170_v46, %v2001_v63  ;;  %v2160_v63 = vld [vmem:[%s6651_s26] sm:$0xff]  ;;  %v4244_v31 = vld [vmem:[%s4467_s11 + $0x18] sm:$0xff] }
 0x35f   : > { %v1971_v11 = vadd.f32 %v1967_v15, %v1922_v28  ;;  %v1972_v26 = vadd.f32 %v1968_v14, %v1923_v17  ;;  %v2049_v19 = vmul.f32 %v5048_v49, %v2031_v8  ;;  %v2050_v23 = vmul.f32 %v5048_v49, %v2033_v21  ;;  %v2161_v14 = vld [vmem:[%s6651_s26 + $0x8] sm:$0x3] }
 0x360   : > { %v2096_v0 = vmul.f32 %v5054_v33, %v2079_v36  ;;  %v2097_v12 = vmul.f32 %v5054_v33, %v2081_v60  ;;  %v2080_v61 = vsel %vm1411_vm8, %v6647_v29, %v2078_v20  ;;  %v2082_v47 = vsel %vm1411_vm8, %v2078_v20, %v6647_v29 }
 0x361   : > { %v2020_v30 = vadd.f32 %v2016_v5, %v1971_v11  ;;  %v2021_v49 = vadd.f32 %v2017_v37, %v1972_v26  ;;  %v2065_v56 = vmul.f32 %v6648_v10, %v2049_v19  ;;  %v2066_v38 = vmul.f32 %v6649_v55, %v2050_v23 }
 0x362   : > { %v2018_v24 = vadd.f32 %v2014_v16, %v1969_v27  ;;  %v2019_v46 = vadd.f32 %v2015_v3, %v1970_v52  ;;  %v2098_v2 = vmul.f32 %v6650_v1, %v2080_v61  ;;  %v2099_v33 = vmul.f32 %v6650_v1, %v2082_v47 }
 0x363   : > { %v2063_v13 = vmul.f32 %v6648_v10, %v2047_v25  ;;  %v2064_v32 = vmul.f32 %v6649_v55, %v2048_v41  ;;  %v2112_v35 = vmul.f32 %v5173_v50, %v2096_v0  ;;  %v2113_v58 = vmul.f32 %v5176_v9, %v2097_v12  ;;  %v2689_v10 = vld [vmem:[%s6659_s3] sm:$0xff]  ;;  %v2706_v55 = vld [vmem:[%s6661_s5 + $0x8] sm:$0x3] }
 0x364   : > { %v2069_v6 = vadd.f32 %v2065_v56, %v2020_v30  ;;  %v2070_v34 = vadd.f32 %v2066_v38, %v2021_v49  ;;  %v2114_v43 = vmul.f32 %v5173_v50, %v2098_v2  ;;  %v2115_v18 = vmul.f32 %v5176_v9, %v2099_v33  ;;  %v2690_v30 = vld [vmem:[%s6659_s3 + $0x8] sm:$0x3]  ;;  %v2755_v38 = vld [vmem:[%s6662_s6] sm:$0xff]  ;;  %v4245_v2 = vld [vmem:[%s4467_s11 + $0x10] sm:$0xff]  ;;  %s6664_s3 = sld [smem:[#allocation17_spill]] }
 0x365   : > { %v2068_v48 = vadd.f32 %v2064_v32, %v2019_v46  ;;  %v2067_v22 = vadd.f32 %v2063_v13, %v2018_v24  ;;  %v6652_v15 = vmov 0.0   ;;  %v2705_v24 = vld [vmem:[%s6661_s5] sm:$0xff]  ;;  %v2756_v13 = vld [vmem:[%s6662_s6 + $0x8] sm:$0xff]  ;;  %s6665_s5 = sld [smem:[#allocation15_spill]] }
 0x366   : > { %v2118_v51 = vadd.f32 %v2114_v43, %v2069_v6  ;;  %v2119_v44 = vadd.f32 %v2115_v18, %v2070_v34  ;;  %v4246_v32 = vld [vmem:[%s4467_s11 + $0x8] sm:$0xff]  ;;  %v4247_v34 = vld [vmem:[%s4467_s11] sm:$0xff]  ;;  %s6670_s11 = sld [smem:[#allocation13_spill]] }
 0x367   : > { %v2117_v57 = vadd.f32 %v2113_v58, %v2068_v48  ;;  %v2116_v25 = vadd.f32 %v2112_v35, %v2067_v22  ;;  %v2757_v58 = vld [vmem:[%s6662_s6 + $0x10] sm:$0xff]  ;;  %v2758_v22 = vld [vmem:[%s6662_s6 + $0x18] sm:$0x3] }
 0x36a   : > { %v2130_v7 = vpop.permute.xlu0 %2129  ;;  %v2125_v39 = vpop.permute.xlu1 %2124 }
 0x36b   : > { %v2134_v41 = vmul.f32 %v2130_v7, %v2118_v51  ;;  %v2135_v62 = vmul.f32 %v2130_v7, %v2119_v44  ;;  %v2132_v53 = vmul.f32 %v2125_v39, %v2116_v25  ;;  %v2133_v40 = vmul.f32 %v2125_v39, %v2117_v57  ;;  %v3112_v7 = vld [vmem:[%s6664_s3] sm:$0xff]  ;;  %v3113_v39 = vld [vmem:[%s6664_s3 + $0x8] sm:$0xff]  ;;  %v3114_v57 = vld [vmem:[%s6664_s3 + $0x10] sm:$0xff] }
 0x36c   : > { %v2967_v44 = vld [vmem:[%s6665_s5] sm:$0xff] }
 0x36e   : > { %v2146_v54 = vpop.permute.xlu0 %2145  ;;  %v2141_v16 = vpop.permute.xlu1 %2140 }
 0x36f   : > { %v2150_v3 = vadd.f32 %v2146_v54, %v2134_v41  ;;  %v2151_v50 = vadd.f32 %v2146_v54, %v2135_v62  ;;  %v2148_v9 = vadd.f32 %v2141_v16, %v2132_v53  ;;  %v2149_v45 = vadd.f32 %v2141_v16, %v2133_v40  ;;  %v3115_v41 = vld [vmem:[%s6664_s3 + $0x18] sm:$0x3]  ;;  %v2968_v62 = vld [vmem:[%s6665_s5 + $0x8] sm:$0xff]  ;;  %v3176_v53 = vld [vmem:[%s4433_s12] sm:$0xff]  ;;  %s6674_s3 = smov 17  }
 0x370   : > { %v3177_v54 = vld [vmem:[%s4433_s12 + $0x8] sm:$0xff] }
 0x371   : > { %2196 = vmatprep.subr.mxu1 %v2151_v50  ;;  %2799 = vmatprep.subr.mxu0 %v2151_v50  ;;  %v3178_v50 = vld [vmem:[%s4433_s12 + $0x10] sm:$0xff] }
 0x372   : > { %2197 = vmatpush1.msra.mxu1 %v2150_v3  ;;  %2800 = vmatpush1.msra.mxu0 %v2150_v3  ;;  %v2250_v28 = vpop.permute.xlu0 %2249  ;;  %v2255_v11 = vpop.permute.xlu1 %2254  ;;  %v2969_v3 = vld [vmem:[%s6665_s5 + $0x10] sm:$0xff] }
 0x373   : > { %2198 = vmatprep.subr.mxu1 %v2149_v45  ;;  %2801 = vmatprep.subr.mxu0 %v2149_v45 }
 0x374   : > { %2199 = vmatpush1.msra.mxu1 %v2148_v9  ;;  %2802 = vmatpush1.msra.mxu0 %v2148_v9  ;;  %v3179_v9 = vld [vmem:[%s4433_s12 + $0x18] sm:$0x3] }
 0x375   : > { %4113 = vmatmul.mubr.msk.f32.vlgmr.msra.gmra.mxu1 %vm909_vm0, %v2160_v63  ;;  %3011 = vmatprep.subr.mxu0 %v4244_v31  ;;  %v2970_v63 = vld [vmem:[%s6665_s5 + $0x18] sm:$0x3]  ;;  %v4152_v31 = vld [vmem:[%s4433_s12 + $0x20] sm:$0xff] }
 0x376   : > { %2238 = vmatprep.mubr.f32.mxu1 %v6652_v15  ;;  %v2266_v60 = vpop.permute.xlu0 %2265  ;;  %v2271_v5 = vpop.permute.xlu1 %2270  ;;  %4138 = vmatmul.mubr.msk.f32.vlgmr.msra.gmra.mxu0 %vm909_vm0, %v2755_v38  ;;  %v4167_v38 = vld [vmem:[%s4433_s12 + $0x80] sm:$0xff] }
 0x377   : > { %2841 = vmatprep.mubr.f32.mxu0 %v6652_v15  ;;  %3012 = vmatpush1.msra.mxu0 %v4245_v2 }
 0x378   : > { %3013 = vmatprep.subr.mxu0 %v4246_v32 }
 0x379   : > { %4114 = vmatmul.mubr.msk.f32.gmra.mxu1 %vm909_vm0, %v2161_v14  ;;  %3014 = vmatpush1.msra.mxu0 %v4247_v34 }
 0x37a   : > { %2942 = vmatprep.mubr.f32.mxu1 %v6652_v15  ;;  %v5380_v49 = vpop.permute.xlu0 %2297  ;;  %v5385_v56 = vpop.permute.xlu1 %2302  ;;  %4139 = vmatmul.mubr.msk.f32.gmra.mxu0 %vm909_vm0, %v2756_v13  ;;  %v4169_v13 = vld [vmem:[%s4433_s12 + $0x90] sm:$0xff] }
 0x37b   : > { %2847 = vmatprep.mubr.f32.mxu0 %v6652_v15 }
 0x37e   : > { %v5391_v46 = vpop.permute.xlu0 %2342  ;;  %v5396_v33 = vpop.permute.xlu1 %2347  ;;  %4140 = vmatmul.mubr.msk.f32.gmra.mxu0 %vm909_vm0, %v2757_v58 }
 0x37f   : > { %2853 = vmatprep.mubr.f32.mxu0 %v6652_v15 }
 0x382   : > { %v5406_v43 = vpop.permute.xlu0 %2391  ;;  %v5410_v48 = vpop.permute.xlu1 %2396  ;;  %4141 = vmatmul.mubr.msk.f32.gmra.mxu0 %vm909_vm0, %v2758_v22 }
 0x383   : > { %3047 = vmatprep.mubr.f32.mxu0 %v6652_v15 }
 0x386   : > { %v5417_v51 = vpop.permute.xlu0 %2440  ;;  %v5422_v25 = vpop.permute.xlu1 %2445  ;;  %4148 = vmatmul.mubr.msk.f32.vlgmr.msra.gmra.mxu0 %vm909_vm0, %v2967_v44  ;;  %v4174_v44 = vld [vmem:[%s4433_s12 + $0xb8] sm:$0x3] }
 0x387   : > { %3053 = vmatprep.mubr.f32.mxu0 %v6652_v15 }
 0x38a   : > { %v5429_v40 = vpop.permute.xlu0 %2477  ;;  %4149 = vmatmul.mubr.msk.f32.gmra.mxu0 %vm909_vm0, %v2968_v62  ;;  %v5433_v16 = vpop.permute.xlu1 %2482 }
 0x38b   : > { %3059 = vmatprep.mubr.f32.mxu0 %v6652_v15 }
 0x38e   : > { %4150 = vmatmul.mubr.msk.f32.gmra.mxu0 %vm909_vm0, %v2969_v3  ;;  %v5440_v45 = vpop.permute.xlu0 %2510  ;;  %v5445_v14 = vpop.permute.xlu1 %2515  ;;  %v4178_v3 = vld [vmem:[%s4433_s12 + $0xd0] sm:$0xff] }
 0x38f   : > { %3065 = vmatprep.mubr.f32.mxu0 %v6652_v15 }
 0x392   : > { %4151 = vmatmul.mubr.msk.f32.gmra.mxu0 %vm909_vm0, %v2970_v63 }
 0x435   : > { %v2234_v17 = vpop.f32.mrf.mxu1 }
 0x436   : > { %v2257_v36 = vmul.f32 %v2250_v28, %v2234_v17  ;;  %v4154_v17 = vld [vmem:[%s4433_s12 + $0x30] sm:$0xff] }
 0x437   : > { %v2236_v8 = vpop.f32.mrf.mxu1 }
 0x438   : > { %v2273_v21 = vadd.f32 %v2266_v60, %v2257_v36  ;;  %v2258_v20 = vmul.f32 %v2250_v28, %v2236_v8  ;;  %v4153_v28 = vld [vmem:[%s4433_s12 + $0x28] sm:$0xff]  ;;  %v5450_v36 = vpop.permute.xlu0 %2564  ;;  %v5453_v8 = vpop.permute.xlu1 %2559 }
 0x439   : > { %v2240_v26 = vpop.f32.mrf.mxu1 }
 0x43a   : > { %v5309_v19 = vmax.f32 %v2273_v21, 0.0  ;;  %v2274_v23 = vadd.f32 %v2266_v60, %v2258_v20  ;;  %v2259_v52 = vmul.f32 %v2255_v11, %v2240_v26  ;;  %v4155_v60 = vld [vmem:[%s4433_s12 + $0x38] sm:$0x3]  ;;  %v4157_v21 = vld [vmem:[%s4433_s12 + $0x40] sm:$0xff]  ;;  %v4158_v20 = vld [vmem:[%s4433_s12 + $0x48] sm:$0xff] }
 0x43b   : > { %v2242_v12 = vpop.f32.mrf.mxu1  ;;  %v4159_v26 = vld [vmem:[%s4433_s12 + $0x50] sm:$0xff] }
 0x43c   : > { %v5311_v27 = vmax.f32 %v2274_v23, 0.0  ;;  %2281 = vrot.lane.b32.xlu0 %v5309_v19, %s6567_s16  ;;  %v2275_v37 = vadd.f32 %v2271_v5, %v2259_v52  ;;  %v2260_v29 = vmul.f32 %v2255_v11, %v2242_v12  ;;  %v5457_v11 = vpop.permute.xlu0 %2613  ;;  %v5460_v23 = vpop.permute.xlu1 %2608  ;;  %v4160_v52 = vld [vmem:[%s4433_s12 + $0x58] sm:$0x3]  ;;  %v4163_v12 = vld [vmem:[%s4433_s12 + $0x68] sm:$0xff] }
 0x43e   : > { %2595 = vrot.lane.b32.xlu1 %v5311_v27, %s6558_s23  ;;  %v5321_v0 = vmax.f32 %v2275_v37, 0.0  ;;  %s6655_s23 = smov 127   ;;  %v2276_v61 = vadd.f32 %v2271_v5, %v2260_v29  ;;  %v4162_v5 = vld [vmem:[%s4433_s12 + $0x60] sm:$0xff] }
 0x440   : > { %2325 = vrot.lane.b32.xlu0 %v5309_v19, %s6563_s22  ;;  %v5351_v47 = vmax.f32 %v2276_v61, 0.0  ;;  %v5464_v37 = vpop.permute.xlu0 %2662  ;;  %v5467_v29 = vpop.permute.xlu1 %2657  ;;  %v4164_v61 = vld [vmem:[%s4433_s12 + $0x70] sm:$0xff] }
 0x441   : > { %6666 = vst [vmem:[#allocation20_spill] sm:$0xff] %v5464_v37  ;;  %6667 = vst [vmem:[#allocation21_spill] sm:$0xff] %v5467_v29  ;;  %v3864_v37 = vld [vmem:[%s4438_s20] sm:$0xff] }
 0x442   : > { %2644 = vrot.lane.b32.xlu1 %v5311_v27, %s6560_s28  ;;  %s6656_s28 = smov 113  }
 0x444   : > { %2374 = vrot.lane.b32.xlu0 %v5309_v19, %s6653_s18 }
 0x446   : > { %2283 = vrot.lane.b32.xlu1 %v5321_v0, %s6567_s16 }
 0x448   : > { %2423 = vrot.lane.b32.xlu0 %v5309_v19, %s6654_s1 }
 0x44a   : > { %2327 = vrot.lane.b32.xlu1 %v5321_v0, %s6563_s22  ;;  %s6658_s22 = smov 111  }
 0x44c   : > { %2493 = vrot.lane.b32.xlu0 %v5309_v19, %s6655_s23 }
 0x44e   : > { %2376 = vrot.lane.b32.xlu1 %v5321_v0, %s6653_s18 }
 0x450   : > { %2542 = vrot.lane.b32.xlu0 %v5309_v19, %s6656_s28 }
 0x452   : > { %2425 = vrot.lane.b32.xlu1 %v5321_v0, %s6654_s1 }
 0x454   : > { %2591 = vrot.lane.b32.xlu0 %v5309_v19, %s6657_s2 }
 0x456   : > { %2495 = vrot.lane.b32.xlu1 %v5321_v0, %s6655_s23 }
 0x458   : > { %2640 = vrot.lane.b32.xlu0 %v5309_v19, %s6658_s22 }
 0x45a   : > { %2544 = vrot.lane.b32.xlu1 %v5321_v0, %s6656_s28 }
 0x45c   : > { %2285 = vrot.lane.b32.xlu0 %v5311_v27, %s6567_s16 }
 0x45e   : > { %2593 = vrot.lane.b32.xlu1 %v5321_v0, %s6657_s2 }
 0x460   : > { %2329 = vrot.lane.b32.xlu0 %v5311_v27, %s6660_s4 }
 0x462   : > { %2287 = vrot.lane.b32.xlu1 %v5351_v47, %s6567_s16  ;;  %s6663_s16 = sld [smem:[#allocation16_spill]] }
 0x464   : > { %2378 = vrot.lane.b32.xlu0 %v5311_v27, %s6653_s18 }
 0x466   : > { %2331 = vrot.lane.b32.xlu1 %v5351_v47, %s6660_s4 }
 0x468   : > { %2427 = vrot.lane.b32.xlu0 %v5311_v27, %s6654_s1  ;;  %v3080_v1 = vld [vmem:[%s6663_s16] sm:$0xff]  ;;  %v3081_v35 = vld [vmem:[%s6663_s16 + $0x8] sm:$0xff]  ;;  %v3082_v6 = vld [vmem:[%s6663_s16 + $0x10] sm:$0xff] }
 0x469   : > { %v3083_v18 = vld [vmem:[%s6663_s16 + $0x18] sm:$0x3] }
 0x46a   : > { %2380 = vrot.lane.b32.xlu1 %v5351_v47, %s6653_s18 }
 0x46c   : > { %2497 = vrot.lane.b32.xlu0 %v5311_v27, %s6655_s23 }
 0x46e   : > { %2429 = vrot.lane.b32.xlu1 %v5351_v47, %s6654_s1 }
 0x470   : > { %2546 = vrot.lane.b32.xlu0 %v5311_v27, %s6656_s28 }
 0x472   : > { %2499 = vrot.lane.b32.xlu1 %v5351_v47, %s6655_s23 }
 0x474   : > { %2642 = vrot.lane.b32.xlu0 %v5321_v0, %s6658_s22 }
 0x476   : > { %2548 = vrot.lane.b32.xlu1 %v5351_v47, %s6656_s28 }
 0x478   : > { %2597 = vrot.lane.b32.xlu0 %v5351_v47, %s6657_s2 }
 0x47a   : > { %2646 = vrot.lane.b32.xlu1 %v5351_v47, %s6658_s22 }
 0x47c   : > { %2698 = vperm.xlu0 %4242, %v2690_v30  }
 0x47e   : > { %2693 = vperm.xlu1 %4243, %v2689_v10   ;;  %v4165_v10 = vld [vmem:[%s4433_s12 + $0x78] sm:$0x3] }
 0x480   : > { %2714 = vperm.xlu0 %4242, %v2706_v55  }
 0x482   : > { %2709 = vperm.xlu1 %4243, %v2705_v24  }
 0x484   : > { %3086 = vperm.xlu0 %4242, %v3080_v1   ;;  %v4168_v1 = vld [vmem:[%s4433_s12 + $0x88] sm:$0xff] }
 0x486   : > { %3091 = vperm.xlu1 %4243, %v3081_v35   ;;  %v4170_v35 = vld [vmem:[%s4433_s12 + $0x98] sm:$0x3] }
 0x488   : > { %3096 = vperm.xlu0 %4242, %v3082_v6   ;;  %v4171_v6 = vld [vmem:[%s4433_s12 + $0xa0] sm:$0xff] }
 0x48a   : > { %3101 = vperm.xlu1 %4243, %v3083_v18   ;;  %v4172_v18 = vld [vmem:[%s4433_s12 + $0xa8] sm:$0xff] }
 0x48c   : > { %3118 = vperm.xlu0 %4242, %v3112_v7   ;;  %v4173_v7 = vld [vmem:[%s4433_s12 + $0xb0] sm:$0xff] }
 0x48e   : > { %3123 = vperm.xlu1 %4243, %v3113_v39  }
 0x490   : > { %3128 = vperm.xlu0 %4242, %v3114_v57  }
 0x492   : > { %3133 = vperm.xlu1 %4243, %v3115_v41   ;;  %v4176_v41 = vld [vmem:[%s4433_s12 + $0xc0] sm:$0xff] }
 0x494   : > { %3182 = vperm.xlu0 %4242, %v3176_v53   ;;  %v4177_v53 = vld [vmem:[%s4433_s12 + $0xc8] sm:$0xff] }
 0x496   : > { %3187 = vperm.xlu1 %4243, %v3177_v54  }
 0x498   : > { %3192 = vperm.xlu0 %4242, %v3178_v50  }
 0x49a   : > { %3197 = vperm.xlu1 %4243, %v3179_v9   ;;  %v4179_v9 = vld [vmem:[%s4433_s12 + $0xd8] sm:$0x3] }
 0x49c   : > { %3259 = vperm.xlu0 %4242, %v4152_v31   ;;  %v4181_v31 = vld [vmem:[%s4433_s12 + $0xe0] sm:$0xff] }
 0x49e   : > { %3264 = vperm.xlu1 %4243, %v4153_v28  }
 0x4a0   : > { %3269 = vperm.xlu0 %4242, %v4154_v17   ;;  %v4182_v17 = vld [vmem:[%s4433_s12 + $0xe8] sm:$0xff] }
 0x4a2   : > { %3274 = vperm.xlu1 %4243, %v4155_v60  }
 0x4a4   : > { %3344 = vperm.xlu0 %4242, %v4157_v21   ;;  %v4183_v21 = vld [vmem:[%s4433_s12 + $0xf0] sm:$0xff] }
 0x4a6   : > { %3349 = vperm.xlu1 %4243, %v4158_v20  }
 0x4a8   : > { %3354 = vperm.xlu0 %4242, %v4159_v26   ;;  %v4134_v26 = vld [vmem:[%s4308_s9 + $0xe] sm:$0x3] }
 0x4aa   : > { %3359 = vperm.xlu1 %4243, %v4160_v52   ;;  %v2309_v52 = vld [vmem:[%s4308_s9] sm:$0x3] }
 0x4ac   : > { %3429 = vperm.xlu0 %4242, %v4162_v5   ;;  %v4184_v5 = vld [vmem:[%s4433_s12 + $0xf8] sm:$0x3] }
 0x4ae   : > { %v5470_v30 = vpop.permute.xlu0 %2281  ;;  %3434 = vperm.xlu1 %4243, %v4163_v12  }
 0x4b0   : > { %v5473_v55 = vpop.permute.xlu1 %2595  ;;  %3439 = vperm.xlu0 %4242, %v4164_v61   ;;  %v4117_v61 = vld [vmem:[%s4308_s9 + $0x2] sm:$0x3] }
 0x4b2   : > { %v5476_v24 = vpop.permute.xlu0 %2325  ;;  %3444 = vperm.xlu1 %4243, %v4165_v10   ;;  %v4186_v10 = vld [vmem:[%s4433_s12 + $0x100] sm:$0xff] }
 0x4b4   : > { %v5479_v2 = vpop.permute.xlu1 %2644  ;;  %3490 = vperm.xlu0 %4242, %v4167_v38   ;;  %v5527_v38 = vmul.f32 %v5429_v40, %v5309_v19  ;;  %v5545_v19 = vrot.slane %v4134_v26, %v6643_v42 }
 0x4b6   : > { %v5482_v32 = vpop.permute.xlu0 %2374  ;;  %3495 = vperm.xlu1 %4243, %v4168_v1   ;;  %v5531_v1 = vmul.f32 %v5429_v40, %v5311_v27  ;;  %v5551_v27 = vrot.slane %v2309_v52, %v6643_v42 }
 0x4b8   : > { %v5485_v58 = vpop.permute.xlu1 %2283  ;;  %3500 = vperm.xlu0 %4242, %v4169_v13   ;;  %v5535_v13 = vmul.f32 %v5433_v16, %v5321_v0  ;;  %v4120_v0 = vld [vmem:[%s4308_s9 + $0x4] sm:$0x3] }
 0x4ba   : > { %v5488_v34 = vpop.permute.xlu0 %2423  ;;  %3505 = vperm.xlu1 %4243, %v4170_v35   ;;  %v5539_v35 = vmul.f32 %v5433_v16, %v5351_v47 }
 0x4bc   : > { %v5491_v22 = vpop.permute.xlu1 %2327  ;;  %3555 = vperm.xlu0 %4242, %v4171_v6   ;;  %v5542_v6 = vrot.slane %v4134_v26, %v6642_v4  ;;  %v5577_v26 = vrot.slane %v4120_v0, %v6643_v42 }
 0x4be   : > { %v5494_v39 = vpop.permute.xlu0 %2493  ;;  %3560 = vperm.xlu1 %4243, %v4172_v18   ;;  %v5548_v18 = vrot.slane %v2309_v52, %v6642_v4 }
 0x4c0   : > { %v5497_v57 = vpop.permute.xlu1 %2376  ;;  %3565 = vperm.xlu0 %4242, %v4173_v7   ;;  %v4123_v7 = vld [vmem:[%s4308_s9 + $0x6] sm:$0x3] }
 0x4c1   : > { %v5581_v52 = vrot.slane %v4123_v7, %v6642_v4 }
 0x4c2   : > { %v5500_v62 = vpop.permute.xlu0 %2542  ;;  %3570 = vperm.xlu1 %4243, %v4174_v44  }
 0x4c4   : > { %v5503_v54 = vpop.permute.xlu1 %2425  ;;  %3640 = vperm.xlu0 %4242, %v4176_v41  }
 0x4c6   : > { %v5506_v50 = vpop.permute.xlu0 %2591  ;;  %3645 = vperm.xlu1 %4243, %v4177_v53   ;;  %v4187_v53 = vld [vmem:[%s4433_s12 + $0x108] sm:$0xff] }
 0x4c8   : > { %v5509_v63 = vpop.permute.xlu1 %2495  ;;  %3650 = vperm.xlu0 %4242, %v4178_v3   ;;  %v4128_v3 = vld [vmem:[%s4308_s9 + $0xa] sm:$0x3] }
 0x4ca   : > { %v5512_v28 = vpop.permute.xlu0 %2640  ;;  %3655 = vperm.xlu1 %4243, %v4179_v9   ;;  %v2359_v9 = vrot.slane %v4117_v61, %v6642_v4 }
 0x4cc   : > { %v5515_v60 = vpop.permute.xlu1 %2544  ;;  %3725 = vperm.xlu0 %4242, %v4181_v31   ;;  %v2363_v31 = vrot.slane %v4117_v61, %v6643_v42 }
 0x4ce   : > { %v2286_v20 = vpop.permute.xlu0 %2285  ;;  %3730 = vperm.xlu1 %4243, %v4182_v17  }
 0x4cf   : > { %v2289_v47 = vsel %vm1039_vm2, %v5470_v30, %v2286_v20  ;;  %v2291_v16 = vsel %vm1039_vm2, %v2286_v20, %v5470_v30  ;;  %v5574_v20 = vrot.slane %v4120_v0, %v6642_v4 }
 0x4d0   : > { %v5521_v12 = vpop.permute.xlu1 %2593  ;;  %3735 = vperm.xlu0 %4242, %v4183_v21   ;;  %v2305_v61 = vmul.f32 %v5380_v49, %v2291_v16  ;;  %v4189_v16 = vld [vmem:[%s4433_s12 + $0x118] sm:$0x3] }
 0x4d2   : > { %v2330_v40 = vpop.permute.xlu0 %2329  ;;  %3740 = vperm.xlu1 %4243, %v4184_v5   ;;  %v5584_v5 = vrot.slane %v4123_v7, %v6643_v42 }
 0x4d3   : > { %v2333_v44 = vsel %vm1084_vm3, %v5476_v24, %v2330_v40  ;;  %v2335_v41 = vsel %vm1084_vm3, %v2330_v40, %v5476_v24  ;;  %v4188_v24 = vld [vmem:[%s4433_s12 + $0x110] sm:$0xff]  ;;  %v5589_v40 = vrot.slane %v4128_v3, %v6642_v4 }
 0x4d4   : > { %v2350_v17 = vmul.f32 %v5391_v46, %v2335_v41  ;;  %v2351_v21 = vmul.f32 %v5391_v46, %v2333_v44  ;;  %3810 = vperm.xlu0 %4242, %v4186_v10   ;;  %v2288_v30 = vpop.permute.xlu1 %2287  ;;  %v2306_v46 = vmul.f32 %v5380_v49, %v2289_v47  ;;  %v5592_v44 = vrot.slane %v4128_v3, %v6643_v42 }
 0x4d5   : > { %v2290_v0 = vsel %vm1039_vm2, %v5485_v58, %v2288_v30  ;;  %v2292_v7 = vsel %vm1039_vm2, %v2288_v30, %v5485_v58  ;;  %v5611_v41 = vsel %vm1360_vm5, %v5506_v50, %v5473_v55  ;;  %v5617_v58 = vsel %vm1360_vm5, %v5473_v55, %v5506_v50 }
 0x4d6   : > { %v2379_v10 = vpop.permute.xlu0 %2378  ;;  %3815 = vperm.xlu1 %4243, %v4187_v53   ;;  %v2366_v53 = vmul.f32 %v2359_v9, %v2350_v17  ;;  %v2367_v3 = vmul.f32 %v2363_v31, %v2351_v21  ;;  %v2307_v55 = vmul.f32 %v5385_v56, %v2292_v7  ;;  %v2308_v50 = vmul.f32 %v5385_v56, %v2290_v0  ;;  %v3865_v56 = vld [vmem:[%s4438_s20 + $0x8] sm:$0xff] }
 0x4d7   : > { %v2382_v49 = vsel %vm1135_vm1, %v5482_v32, %v2379_v10  ;;  %v2384_v47 = vsel %vm1135_vm1, %v2379_v10, %v5482_v32 }
 0x4d8   : > { %3820 = vperm.xlu0 %4242, %v4188_v24   ;;  %v2332_v30 = vpop.permute.xlu1 %2331  ;;  %v2399_v32 = vmul.f32 %v5406_v43, %v2384_v47  ;;  %v2400_v10 = vmul.f32 %v5406_v43, %v2382_v49  ;;  %v2321_v43 = vmul.f32 %v5548_v18, %v2305_v61  ;;  %v2322_v49 = vmul.f32 %v5551_v27, %v2306_v46 }
 0x4d9   : > { %v2334_v15 = vsel %vm1084_vm3, %v5491_v22, %v2332_v30  ;;  %v2336_v29 = vsel %vm1084_vm3, %v2332_v30, %v5491_v22  ;;  %v3866_v30 = vld [vmem:[%s4438_s20 + $0x10] sm:$0xff] }
 0x4da   : > { %v2352_v17 = vmul.f32 %v5396_v33, %v2336_v29  ;;  %v2353_v21 = vmul.f32 %v5396_v33, %v2334_v15  ;;  %v2428_v24 = vpop.permute.xlu0 %2427  ;;  %3825 = vperm.xlu1 %4243, %v4189_v16   ;;  %v2415_v29 = vmul.f32 %v5574_v20, %v2399_v32  ;;  %v2416_v15 = vmul.f32 %v5577_v26, %v2400_v10 }
 0x4db   : > { %v2431_v22 = vsel %vm1186_vm4, %v5488_v34, %v2428_v24  ;;  %v2433_v7 = vsel %vm1186_vm4, %v2428_v24, %v5488_v34  ;;  %v2370_v46 = vadd.f32 %v2366_v53, %v2321_v43  ;;  %v2371_v47 = vadd.f32 %v2367_v3, %v2322_v49 }
 0x4dc   : > { %v2448_v33 = vmul.f32 %v5417_v51, %v2433_v7  ;;  %v2449_v0 = vmul.f32 %v5417_v51, %v2431_v22  ;;  %3870 = vperm.xlu0 %4242, %v3864_v37   ;;  %v2381_v61 = vpop.permute.xlu1 %2380  ;;  %v2323_v32 = vmul.f32 %v5548_v18, %v2307_v55  ;;  %v2324_v10 = vmul.f32 %v5551_v27, %v2308_v50  ;;  %v4131_v22 = vld [vmem:[%s4308_s9 + $0xc] sm:$0x3] }
 0x4dd   : > { %v2383_v16 = vsel %vm1135_vm1, %v5497_v57, %v2381_v61  ;;  %v2385_v34 = vsel %vm1135_vm1, %v2381_v61, %v5497_v57  ;;  %v2368_v51 = vmul.f32 %v2359_v9, %v2352_v17  ;;  %v2369_v37 = vmul.f32 %v2363_v31, %v2353_v21  ;;  %v3867_v57 = vld [vmem:[%s4438_s20 + $0x18] sm:$0x3]  ;;  %v3896_v17 = vld [vmem:[%s4443_s27] sm:$0xff] }
 0x4de   : > { %v2498_v24 = vpop.permute.xlu0 %2497  ;;  %3875 = vperm.xlu1 %4243, %v3865_v56   ;;  %v2464_v53 = vmul.f32 %v5581_v52, %v2448_v33  ;;  %v2465_v3 = vmul.f32 %v5584_v5, %v2449_v0  ;;  %v2401_v43 = vmul.f32 %v5410_v48, %v2385_v34  ;;  %v2402_v49 = vmul.f32 %v5410_v48, %v2383_v16 }
 0x4df   : > { %v2419_v7 = vadd.f32 %v2415_v29, %v2370_v46  ;;  %v2420_v61 = vadd.f32 %v2416_v15, %v2371_v47  ;;  %v2501_v18 = vsel %vm1258_vm6, %v5494_v39, %v2498_v24  ;;  %v2503_v27 = vsel %vm1258_vm6, %v2498_v24, %v5494_v39  ;;  %v3897_v46 = vld [vmem:[%s4443_s27 + $0x8] sm:$0xff] }
 0x4e0   : > { %3880 = vperm.xlu0 %4242, %v3866_v30   ;;  %v2430_v9 = vpop.permute.xlu1 %2429  ;;  %v2417_v31 = vmul.f32 %v5574_v20, %v2401_v43  ;;  %v2418_v55 = vmul.f32 %v5577_v26, %v2402_v49  ;;  %v2372_v21 = vadd.f32 %v2368_v51, %v2323_v32  ;;  %v2373_v56 = vadd.f32 %v2369_v37, %v2324_v10 }
 0x4e1   : > { %v2432_v48 = vsel %vm1186_vm4, %v5503_v54, %v2430_v9  ;;  %v2434_v50 = vsel %vm1186_vm4, %v2430_v9, %v5503_v54  ;;  %v2576_v39 = vrot.slane %v4131_v22, %v6642_v4  ;;  %v2580_v29 = vrot.slane %v4131_v22, %v6643_v42 }
 0x4e2   : > { %v2547_v15 = vpop.permute.xlu0 %2546  ;;  %3885 = vperm.xlu1 %4243, %v3867_v57   ;;  %v2468_v20 = vadd.f32 %v2464_v53, %v2419_v7  ;;  %v2469_v33 = vadd.f32 %v2465_v3, %v2420_v61  ;;  %v2450_v26 = vmul.f32 %v5422_v25, %v2434_v50  ;;  %v2451_v0 = vmul.f32 %v5422_v25, %v2432_v48 }
 0x4e3   : > { %v5682_v47 = vmul.f32 %v5460_v23, %v5611_v41  ;;  %v5686_v54 = vmul.f32 %v5460_v23, %v5617_v58  ;;  %v2518_v16 = vmul.f32 %v5440_v45, %v2501_v18  ;;  %v2519_v34 = vmul.f32 %v5440_v45, %v2503_v27 }
 0x4e4   : > { %3902 = vperm.xlu0 %4242, %v3896_v17   ;;  %v2500_v30 = vpop.permute.xlu1 %2499  ;;  %v2421_v32 = vadd.f32 %v2417_v31, %v2372_v21  ;;  %v2422_v10 = vadd.f32 %v2418_v55, %v2373_v56  ;;  %v2466_v51 = vmul.f32 %v5581_v52, %v2450_v26  ;;  %v2467_v25 = vmul.f32 %v5584_v5, %v2451_v0 }
 0x4e5   : > { %v2550_v41 = vsel %vm1309_vm7, %v5500_v62, %v2547_v15  ;;  %v2552_v23 = vsel %vm1309_vm7, %v2547_v15, %v5500_v62  ;;  %v2502_v45 = vsel %vm1258_vm6, %v5509_v63, %v2500_v30  ;;  %v2504_v58 = vsel %vm1258_vm6, %v2500_v30, %v5509_v63 }
 0x4e6   : > { %v2643_v37 = vpop.permute.xlu0 %2642  ;;  %3907 = vperm.xlu1 %4243, %v3897_v46   ;;  %v2489_v52 = vadd.f32 %v5527_v38, %v2468_v20  ;;  %v2490_v5 = vadd.f32 %v5531_v1, %v2469_v33  ;;  %v2470_v24 = vadd.f32 %v2466_v51, %v2421_v32  ;;  %v2471_v53 = vadd.f32 %v2467_v25, %v2422_v10  ;;  %v4137_v20 = vld [vmem:[%s4308_s9 + $0x10] sm:$0x3]  ;;  %v6668_v46 = vld [vmem:[#allocation20_spill] sm:$0xff] }
 0x4e7   : > { %v2534_v3 = vmul.f32 %v5589_v40, %v2518_v16  ;;  %v2535_v62 = vmul.f32 %v5592_v44, %v2519_v34  ;;  %v2520_v43 = vmul.f32 %v5445_v14, %v2502_v45  ;;  %v2521_v49 = vmul.f32 %v5445_v14, %v2504_v58  ;;  %v6669_v25 = vld [vmem:[#allocation21_spill] sm:$0xff] }
 0x4e8   : > { %v2549_v22 = vpop.permute.xlu1 %2548  ;;  %v2567_v57 = vmul.f32 %v5453_v8, %v2550_v41  ;;  %v2568_v63 = vmul.f32 %v5453_v8, %v2552_v23  ;;  %v2491_v7 = vadd.f32 %v5535_v13, %v2470_v24  ;;  %v2492_v38 = vadd.f32 %v5539_v35, %v2471_v53 }
 0x4e9   : > { %v2536_v1 = vmul.f32 %v5589_v40, %v2520_v43  ;;  %v2537_v61 = vmul.f32 %v5592_v44, %v2521_v49  ;;  %v2551_v18 = vsel %vm1309_vm7, %v5515_v60, %v2549_v22  ;;  %v2553_v14 = vsel %vm1309_vm7, %v2549_v22, %v5515_v60 }
 0x4ea   : > { %v2598_v27 = vpop.permute.xlu0 %2597  ;;  %v2569_v9 = vmul.f32 %v5450_v36, %v2551_v18  ;;  %v2570_v8 = vmul.f32 %v5450_v36, %v2553_v14  ;;  %v2648_v40 = vsel %vm1411_vm8, %v5512_v28, %v5479_v2  ;;  %v2650_v60 = vsel %vm1411_vm8, %v5479_v2, %v5512_v28 }
 0x4eb   : > { %v2600_v13 = vsel %vm1360_vm5, %v5521_v12, %v2598_v27  ;;  %v2602_v35 = vsel %vm1360_vm5, %v2598_v27, %v5521_v12  ;;  %v2583_v17 = vmul.f32 %v2576_v39, %v2567_v57  ;;  %v2584_v21 = vmul.f32 %v2580_v29, %v2568_v63 }
 0x4ec   : > { %v2618_v36 = vmul.f32 %v5457_v11, %v2600_v13  ;;  %v2619_v44 = vmul.f32 %v5457_v11, %v2602_v35  ;;  %v2647_v31 = vpop.permute.xlu1 %2646  ;;  %v2585_v55 = vmul.f32 %v2576_v39, %v2569_v9  ;;  %v2586_v48 = vmul.f32 %v2580_v29, %v2570_v8 }
 0x4ed   : > { %v2649_v12 = vsel %vm1411_vm8, %v2643_v37, %v2647_v31  ;;  %v2651_v50 = vsel %vm1411_vm8, %v2647_v31, %v2643_v37  ;;  %v2540_v56 = vadd.f32 %v2536_v1, %v2491_v7  ;;  %v2541_v15 = vadd.f32 %v2537_v61, %v2492_v38 }
 0x4ee   : > { %v2538_v33 = vadd.f32 %v2534_v3, %v2489_v52  ;;  %v2539_v2 = vadd.f32 %v2535_v62, %v2490_v5  ;;  %v2634_v28 = vmul.f32 %v5542_v6, %v2618_v36  ;;  %v2635_v11 = vmul.f32 %v5545_v19, %v2619_v44  ;;  %v2747_v44 = vld [vmem:[%s6670_s11] sm:$0xff] }
 0x4ef   : > { %v2589_v26 = vadd.f32 %v2585_v55, %v2540_v56  ;;  %v2590_v0 = vadd.f32 %v2586_v48, %v2541_v15  ;;  %v2667_v16 = vmul.f32 %v6668_v46, %v2649_v12  ;;  %v2668_v34 = vmul.f32 %v6668_v46, %v2651_v50  ;;  %v2748_v55 = vld [vmem:[%s6670_s11 + $0x8] sm:$0xff]  ;;  %v2749_v48 = vld [vmem:[%s6670_s11 + $0x10] sm:$0xff]  ;;  %v2750_v12 = vld [vmem:[%s6670_s11 + $0x18] sm:$0x3]  ;;  %v2837_v50 = vpop.f32.mrf.mxu0 }
 0x4f0   : > { %v2674_v30 = vrot.slane %v4137_v20, %v6642_v4  ;;  %v2678_v39 = vrot.slane %v4137_v20, %v6643_v42  ;;  %v2587_v29 = vadd.f32 %v2583_v17, %v2538_v33  ;;  %v2588_v32 = vadd.f32 %v2584_v21, %v2539_v2 }
 0x4f1   : > { %v2632_v10 = vmul.f32 %v5542_v6, %v5682_v47  ;;  %v2633_v51 = vmul.f32 %v5545_v19, %v5686_v54  ;;  %v2665_v41 = vmul.f32 %v6669_v25, %v2648_v40  ;;  %v2666_v23 = vmul.f32 %v6669_v25, %v2650_v60  ;;  %v2839_v17 = vpop.f32.mrf.mxu0 }
 0x4f2   : > { %v2683_v45 = vmul.f32 %v2674_v30, %v2667_v16  ;;  %v2684_v58 = vmul.f32 %v2678_v39, %v2668_v34  ;;  %v2638_v37 = vadd.f32 %v2634_v28, %v2589_v26  ;;  %v2639_v52 = vadd.f32 %v2635_v11, %v2590_v0 }
 0x4f3   : > { %v2636_v5 = vadd.f32 %v2632_v10, %v2587_v29  ;;  %v2637_v24 = vadd.f32 %v2633_v51, %v2588_v32  ;;  %v2681_v3 = vmul.f32 %v2674_v30, %v2665_v41  ;;  %v2682_v62 = vmul.f32 %v2678_v39, %v2666_v23  ;;  %v2843_v21 = vpop.f32.mrf.mxu0 }
 0x4f4   : > { %v2687_v43 = vadd.f32 %v2683_v45, %v2638_v37  ;;  %v2688_v49 = vadd.f32 %v2684_v58, %v2639_v52  ;;  %v6671_v31 = vmov 0.0  }
 0x4f5   : > { %v2685_v57 = vadd.f32 %v2681_v3, %v2636_v5  ;;  %v2686_v19 = vadd.f32 %v2682_v62, %v2637_v24  ;;  %v2845_v15 = vpop.f32.mrf.mxu0 }
 0x4f7   : > { %v2699_v53 = vpop.permute.xlu0 %2698  ;;  %v5776_v33 = vpop.f32.mrf.mxu0 }
 0x4f8   : > { %v2703_v6 = vmul.f32 %v2699_v53, %v2687_v43  ;;  %v2704_v47 = vmul.f32 %v2699_v53, %v2688_v49 }
 0x4f9   : > { %v2694_v22 = vpop.permute.xlu1 %2693  ;;  %v5780_v28 = vpop.f32.mrf.mxu0 }
 0x4fa   : > { %v2701_v63 = vmul.f32 %v2694_v22, %v2685_v57  ;;  %v2702_v7 = vmul.f32 %v2694_v22, %v2686_v19 }
 0x4fb   : > { %v2715_v54 = vpop.permute.xlu0 %2714  ;;  %v5784_v0 = vpop.f32.mrf.mxu0 }
 0x4fc   : > { %v2719_v38 = vadd.f32 %v2715_v54, %v2703_v6  ;;  %v2720_v1 = vadd.f32 %v2715_v54, %v2704_v47 }
 0x4fd   : > { %v2710_v61 = vpop.permute.xlu1 %2709  ;;  %v5786_v16 = vpop.f32.mrf.mxu0 }
 0x4fe   : > { %2723 = vst [vmem:[#allocation2 + $0x10] sm:$0x3] %v2719_v38  ;;  %2724 = vst [vmem:[#allocation2 + $0x40] sm:$0x3] %v2720_v1  ;;  %v2717_v18 = vadd.f32 %v2710_v61, %v2701_v63  ;;  %v2718_v14 = vadd.f32 %v2710_v61, %v2702_v7  ;;  %v2731_v27 = vrot.slane %v2719_v38, 6  ;;  %v2733_v9 = vrot.slane %v2720_v1, 6 }
 0x4ff   : > { %v3087_v56 = vpop.permute.xlu0 %3086  ;;  %v3049_v30 = vpop.f32.mrf.mxu0 }
 0x500   : > { %v2729_v8 = vrot.slane %v2717_v18, 6  ;;  %v2730_v13 = vrot.slane %v2718_v14, 6 }
 0x501   : > { %v3092_v20 = vpop.permute.xlu1 %3091  ;;  %v3051_v25 = vpop.f32.mrf.mxu0 }
 0x502   : > { %v2732_v35 = vsel %vm1592_vm9, %v2729_v8, %v2731_v27  ;;  %v2734_v40 = vsel %vm1592_vm9, %v2730_v13, %v2733_v9  ;;  %2739 = vst [vmem:[%s4910_s0 + $0x10] sm:$0xfc] %v2729_v8  ;;  %2740 = vst [vmem:[%s4910_s0 + $0x18] sm:$0xfc] %v2730_v13 }
 0x503   : > { %2741 = vst [vmem:[%s4910_s0 + $0x20] sm:$0xf] %v2732_v35  ;;  %2742 = vst [vmem:[%s4910_s0 + $0x28] sm:$0xf] %v2734_v40  ;;  %v5778_v2 = vpop.permute.xlu0 %3096  ;;  %v3055_v52 = vpop.f32.mrf.mxu0 }
 0x505   : > { %v2746_v60 = vld [vmem:[#allocation2 + $0x40] sm:$0x3]  ;;  %v2745_v36 = vld [vmem:[#allocation2 + $0x10] sm:$0x3]  ;;  %v5782_v11 = vpop.permute.xlu1 %3101 }
 0x506   : > { %4142 = vmatprep.subr.msk.mxu1 %vm1592_vm9, %v2746_v60 }
 0x507   : > { %4143 = vmatpush1.msk.msra.mxu1 %vm1592_vm9, %v2745_v36  ;;  %v3119_v26 = vpop.permute.xlu0 %3118 }
 0x508   : > { %2908 = vmatprep.subr.mxu1 %v2718_v14  ;;  %v3057_v14 = vpop.f32.mrf.mxu0 }
 0x509   : > { %2909 = vmatpush1.msra.mxu1 %v2717_v18  ;;  %v3124_v46 = vpop.permute.xlu1 %3123 }
 0x50a   : > { %4144 = vmatmul.mubr.msk.f32.vlgmr.msra.gmra.mxu1 %vm1585_vm10, %v2747_v44 }
 0x50b   : > { %2948 = vmatprep.mubr.f32.mxu1 %v6671_v31  ;;  %v5788_v34 = vpop.permute.xlu0 %3128 }
 0x50d   : > { %v5790_v39 = vpop.permute.xlu1 %3133 }
 0x50e   : > { %4145 = vmatmul.mubr.msk.f32.gmra.mxu1 %vm1585_vm10, %v2748_v55 }
 0x50f   : > { %2954 = vmatprep.mubr.f32.mxu1 %v6671_v31  ;;  %v5792_v32 = vpop.permute.xlu0 %3182 }
 0x511   : > { %v5794_v45 = vpop.permute.xlu1 %3187 }
 0x512   : > { %4146 = vmatmul.mubr.msk.f32.gmra.mxu1 %vm1585_vm10, %v2749_v48 }
 0x513   : > { %2960 = vmatprep.mubr.f32.mxu1 %v6671_v31  ;;  %v5796_v5 = vpop.permute.xlu0 %3192 }
 0x514   : > { %6672 = vst [vmem:[#allocation19_spill] sm:$0xff] %v5796_v5 }
 0x515   : > { %v5800_v43 = vpop.permute.xlu1 %3197 }
 0x516   : > { %4147 = vmatmul.mubr.msk.f32.gmra.mxu1 %vm1585_vm10, %v2750_v12  ;;  %6673 = vst [vmem:[#allocation23_spill] sm:$0xff] %v5800_v43 }
 0x517   : > { %v5804_v22 = vpop.permute.xlu0 %3259 }
 0x519   : > { %v5812_v47 = vpop.permute.xlu1 %3264 }
 0x51b   : > { %v5814_v57 = vpop.permute.xlu0 %3269 }
 0x51c   : > { %6675 = vst [vmem:[#allocation24_spill] sm:$0xff] %v5814_v57 }
 0x51d   : > { %v5820_v19 = vpop.permute.xlu1 %3274 }
 0x51e   : > { %6676 = vst [vmem:[#allocation22_spill] sm:$0xff] %v5820_v19 }
 0x51f   : > { %v5826_v54 = vpop.permute.xlu0 %3344 }
 0x521   : > { %v5832_v38 = vpop.permute.xlu1 %3349 }
 0x523   : > { %v5834_v18 = vpop.permute.xlu0 %3354 }
 0x524   : > { %6677 = vst [vmem:[#allocation20_spill] sm:$0xff] %v5834_v18 }
 0x525   : > { %v5840_v8 = vpop.permute.xlu1 %3359 }
 0x526   : > { %6678 = vst [vmem:[#allocation21_spill] sm:$0xff] %v5840_v8 }
 0x527   : > { %v5846_v13 = vpop.permute.xlu0 %3429 }
 0x529   : > { %v5852_v60 = vpop.permute.xlu1 %3434 }
 0x52b   : > { %v5856_v31 = vpop.permute.xlu0 %3439 }
 0x52c   : > { %6679 = vst [vmem:[#allocation25_spill] sm:$0xff] %v5856_v31  ;;  %v4175_v31 = vld [vmem:[%s4308_s9 + $0xa] sm:$0x3] }
 0x52d   : > { %v5864_v48 = vpop.permute.xlu1 %3444  ;;  %v6112_v5 = vrot.slane %v4175_v31, %v6642_v4 }
 0x52e   : > { %6680 = vst [vmem:[#allocation26_spill] sm:$0xff] %v5864_v48 }
 0x52f   : > { %v5870_v12 = vpop.permute.xlu0 %3490 }
 0x5ca   : > { %v2944_v29 = vpop.f32.mrf.mxu1 }
 0x5cb   : > { %v2945_v10 = vadd.f32 %v2944_v29, %v2837_v50 }
 0x5cc   : > { %v2946_v51 = vpop.f32.mrf.mxu1 }
 0x5cd   : > { %v3072_v41 = vadd.f32 %v3049_v30, %v2945_v10  ;;  %v2947_v63 = vadd.f32 %v2946_v51, %v2839_v17  ;;  %v5876_v17 = vpop.permute.xlu1 %3495 }
 0x5ce   : > { %v2950_v23 = vpop.f32.mrf.mxu1 }
 0x5cf   : > { %v3104_v58 = vmul.f32 %v3087_v56, %v3072_v41  ;;  %v2951_v37 = vadd.f32 %v2950_v23, %v2843_v21  ;;  %v3073_v61 = vadd.f32 %v3051_v25, %v2947_v63 }
 0x5d0   : > { %v2952_v7 = vpop.f32.mrf.mxu1 }
 0x5d1   : > { %v3136_v24 = vadd.f32 %v3119_v26, %v3104_v58  ;;  %v3074_v53 = vadd.f32 %v3055_v52, %v2951_v37  ;;  %v2953_v1 = vadd.f32 %v2952_v7, %v2845_v15  ;;  %v3105_v9 = vmul.f32 %v3087_v56, %v3073_v61  ;;  %v3061_v56 = vpop.f32.mrf.mxu0  ;;  %v5878_v15 = vpop.permute.xlu0 %3500 }
 0x5d2   : > { %v2956_v50 = vpop.f32.mrf.mxu1  ;;  %6681 = vst [vmem:[#allocation27_spill] sm:$0xff] %v5878_v15  ;;  %v5885_v30 = vpop.permute.xlu1 %3505 }
 0x5d3   : > { %v5798_v3 = vmax.f32 %v3136_v24, 0.0  ;;  %v3106_v62 = vmul.f32 %v3092_v20, %v3074_v53  ;;  %v3075_v27 = vadd.f32 %v3057_v14, %v2953_v1  ;;  %v3137_v40 = vadd.f32 %v3119_v26, %v3105_v9  ;;  %6682 = vst [vmem:[#allocation28_spill] sm:$0xff] %v5885_v30 }
 0x5d4   : > { %v2958_v21 = vpop.f32.mrf.mxu1 }
 0x5d5   : > { %v3138_v49 = vadd.f32 %v3124_v46, %v3106_v62  ;;  %3152 = vrot.lane.b32.xlu0 %v5798_v3, %s6674_s3  ;;  %v3107_v35 = vmul.f32 %v3092_v20, %v3075_v27  ;;  %v5854_v44 = vmax.f32 %v3137_v40, 0.0  ;;  %v2957_v20 = vadd.f32 %v2956_v50, %v5776_v33  ;;  %v5891_v29 = vpop.permute.xlu0 %3555 }
 0x5d6   : > { %v2962_v26 = vpop.f32.mrf.mxu1  ;;  %v5898_v33 = vpop.permute.xlu1 %3560  ;;  %v2959_v27 = vadd.f32 %v2958_v21, %v5780_v28  ;;  %v6071_v8 = vmul.f32 %v5870_v12, %v5798_v3 }
 0x5d7   : > { %v5806_v6 = vmax.f32 %v3138_v49, 0.0  ;;  %v3139_v36 = vadd.f32 %v3124_v46, %v3107_v35  ;;  %v3063_v46 = vpop.f32.mrf.mxu0  ;;  %v2963_v10 = vadd.f32 %v2962_v26, %v5784_v0  ;;  %v3076_v51 = vadd.f32 %v3061_v56, %v2957_v20 }
 0x5d8   : > { %v2964_v9 = vpop.f32.mrf.mxu1  ;;  %v6066_v48 = vmul.f32 %v5870_v12, %v5854_v44  ;;  %v4180_v12 = vld [vmem:[%s4308_s9 + $0xc] sm:$0x3] }
 0x5d9   : > { %3154 = vrot.lane.b32.xlu1 %v5806_v6, %s6674_s3  ;;  %3228 = vrot.lane.b32.xlu0 %v5798_v3, %s6660_s4  ;;  %v5862_v55 = vmax.f32 %v3139_v36, 0.0  ;;  %v3067_v25 = vpop.f32.mrf.mxu0  ;;  %v3108_v23 = vmul.f32 %v5778_v2, %v3076_v51  ;;  %v5901_v58 = vpop.permute.xlu0 %3565  ;;  %v2965_v40 = vadd.f32 %v2964_v9, %v5786_v16  ;;  %v3077_v36 = vadd.f32 %v3063_v46, %v2959_v27 }
 0x5da   : > { %v3078_v41 = vadd.f32 %v3067_v25, %v2963_v10  ;;  %6683 = vst [vmem:[#allocation29_spill] sm:$0xff] %v5901_v58  ;;  %v5909_v52 = vpop.permute.xlu1 %3570  ;;  %v4166_v58 = vld [vmem:[%s4308_s9 + $0x6] sm:$0x3]  ;;  %v6079_v19 = vmul.f32 %v5876_v17, %v5806_v6 }
 0x5db   : > { %v3140_v37 = vadd.f32 %v5788_v34, %v3108_v23  ;;  %6684 = vst [vmem:[#allocation30_spill] sm:$0xff] %v5909_v52  ;;  %v3069_v50 = vpop.f32.mrf.mxu0  ;;  %v3109_v20 = vmul.f32 %v5778_v2, %v3077_v36  ;;  %v4161_v52 = vld [vmem:[%s4308_s9 + $0x4] sm:$0x3]  ;;  %v6075_v18 = vmul.f32 %v5876_v17, %v5862_v55  ;;  %v6101_v17 = vrot.slane %v4166_v58, %v6642_v4 }
 0x5dc   : > { %v3110_v0 = vmul.f32 %v5782_v11, %v3078_v41  ;;  %v3079_v21 = vadd.f32 %v3069_v50, %v2965_v40 }
 0x5dd   : > { %3230 = vrot.lane.b32.xlu1 %v5806_v6, %s6660_s4  ;;  %3313 = vrot.lane.b32.xlu0 %v5798_v3, %s6653_s18  ;;  %v5915_v24 = vpop.permute.xlu0 %3640  ;;  %v5918_v62 = vmax.f32 %v3140_v37, 0.0  ;;  %v3141_v46 = vadd.f32 %v5788_v34, %v3109_v20 }
 0x5de   : > { %v3142_v53 = vadd.f32 %v5790_v39, %v3110_v0  ;;  %v5924_v49 = vpop.permute.xlu1 %3645  ;;  %v3111_v26 = vmul.f32 %v5782_v11, %v3079_v21  ;;  %v3898_v21 = vld [vmem:[%s4443_s27 + $0x10] sm:$0xff] }
 0x5df   : > { %6685 = vst [vmem:[#allocation31_spill] sm:$0xff] %v5918_v62  ;;  %v5980_v51 = vmax.f32 %v3141_v46, 0.0 }
 0x5e0   : > { %v5926_v63 = vmax.f32 %v3142_v53, 0.0  ;;  %v3143_v2 = vadd.f32 %v5790_v39, %v3111_v26  ;;  %v3899_v26 = vld [vmem:[%s4443_s27 + $0x18] sm:$0x3] }
 0x5e1   : > { %3315 = vrot.lane.b32.xlu1 %v5806_v6, %s6653_s18  ;;  %3398 = vrot.lane.b32.xlu0 %v5798_v3, %s6654_s1  ;;  %v5928_v7 = vpop.permute.xlu0 %3650  ;;  %6694 = vst [vmem:[#allocation40_spill] sm:$0xff] %v5980_v51 }
 0x5e2   : > { %6686 = vst [vmem:[#allocation32_spill] sm:$0xff] %v5926_v63  ;;  %6687 = vst [vmem:[#allocation33_spill] sm:$0xff] %v5928_v7  ;;  %v5934_v1 = vpop.permute.xlu1 %3655  ;;  %v5990_v34 = vmax.f32 %v3143_v2, 0.0 }
 0x5e3   : > { %6688 = vst [vmem:[#allocation34_spill] sm:$0xff] %v5934_v1  ;;  %v4156_v1 = vld [vmem:[%s4308_s9 + $0x2] sm:$0x3] }
 0x5e4   : > { %6697 = vst [vmem:[#allocation43_spill] sm:$0xff] %v5990_v34 }
 0x5e5   : > { %3400 = vrot.lane.b32.xlu1 %v5806_v6, %s6654_s1  ;;  %3524 = vrot.lane.b32.xlu0 %v5798_v3, %s6655_s23  ;;  %v5940_v61 = vpop.permute.xlu0 %3725 }
 0x5e6   : > { %v5946_v14 = vpop.permute.xlu1 %3730 }
 0x5e9   : > { %3526 = vrot.lane.b32.xlu1 %v5806_v6, %s6655_s23  ;;  %3609 = vrot.lane.b32.xlu0 %v5798_v3, %s6656_s28  ;;  %v5949_v35 = vpop.permute.xlu0 %3735 }
 0x5ea   : > { %6689 = vst [vmem:[#allocation35_spill] sm:$0xff] %v5949_v35  ;;  %v5956_v56 = vpop.permute.xlu1 %3740 }
 0x5eb   : > { %6690 = vst [vmem:[#allocation36_spill] sm:$0xff] %v5956_v56 }
 0x5ed   : > { %3611 = vrot.lane.b32.xlu1 %v5806_v6, %s6656_s28  ;;  %3694 = vrot.lane.b32.xlu0 %v5798_v3, %s6657_s2  ;;  %v5962_v28 = vpop.permute.xlu0 %3810 }
 0x5ee   : > { %6691 = vst [vmem:[#allocation37_spill] sm:$0xff] %v5962_v28  ;;  %v5969_v16 = vpop.permute.xlu1 %3815 }
 0x5ef   : > { %6692 = vst [vmem:[#allocation38_spill] sm:$0xff] %v5969_v16 }
 0x5f1   : > { %3696 = vrot.lane.b32.xlu1 %v5806_v6, %s6657_s2  ;;  %3779 = vrot.lane.b32.xlu0 %v5798_v3, %s6658_s22  ;;  %v5973_v10 = vpop.permute.xlu0 %3820  ;;  %v6091_v3 = vrot.slane %v4156_v1, %v6643_v42 }
 0x5f2   : > { %6693 = vst [vmem:[#allocation39_spill] sm:$0xff] %v5973_v10  ;;  %v5982_v25 = vpop.permute.xlu1 %3825 }
 0x5f3   : > { %6695 = vst [vmem:[#allocation41_spill] sm:$0xff] %v5982_v25 }
 0x5f5   : > { %3781 = vrot.lane.b32.xlu1 %v5806_v6, %s6658_s22  ;;  %3160 = vrot.lane.b32.xlu0 %v5854_v44, %s6674_s3  ;;  %v5988_v11 = vpop.permute.xlu0 %3870  ;;  %v6098_v6 = vrot.slane %v4161_v52, %v6643_v42 }
 0x5f6   : > { %6696 = vst [vmem:[#allocation42_spill] sm:$0xff] %v5988_v11  ;;  %v5996_v39 = vpop.permute.xlu1 %3875 }
 0x5f7   : > { %6698 = vst [vmem:[#allocation44_spill] sm:$0xff] %v5996_v39 }
 0x5f9   : > { %3162 = vrot.lane.b32.xlu1 %v5862_v55, %s6674_s3  ;;  %3236 = vrot.lane.b32.xlu0 %v5854_v44, %s6660_s4  ;;  %v5998_v41 = vpop.permute.xlu0 %3880 }
 0x5fa   : > { %6699 = vst [vmem:[#allocation45_spill] sm:$0xff] %v5998_v41  ;;  %v6004_v23 = vpop.permute.xlu1 %3885 }
 0x5fb   : > { %6700 = vst [vmem:[#allocation46_spill] sm:$0xff] %v6004_v23 }
 0x5fd   : > { %3238 = vrot.lane.b32.xlu1 %v5862_v55, %s6660_s4  ;;  %3321 = vrot.lane.b32.xlu0 %v5854_v44, %s6653_s18  ;;  %v6010_v0 = vpop.permute.xlu0 %3902 }
 0x5fe   : > { %6701 = vst [vmem:[#allocation47_spill] sm:$0xff] %v6010_v0  ;;  %v6016_v37 = vpop.permute.xlu1 %3907 }
 0x5ff   : > { %6702 = vst [vmem:[#allocation48_spill] sm:$0xff] %v6016_v37  ;;  %v6125_v37 = vrot.slane %v4180_v12, %v6643_v42 }
 0x601   : > { %3323 = vrot.lane.b32.xlu1 %v5862_v55, %s6653_s18  ;;  %3406 = vrot.lane.b32.xlu0 %v5854_v44, %s6654_s1 }
 0x605   : > { %3408 = vrot.lane.b32.xlu1 %v5862_v55, %s6654_s1  ;;  %3532 = vrot.lane.b32.xlu0 %v5854_v44, %s6655_s23 }
 0x609   : > { %3534 = vrot.lane.b32.xlu1 %v5862_v55, %s6655_s23  ;;  %3617 = vrot.lane.b32.xlu0 %v5854_v44, %s6656_s28 }
 0x60d   : > { %3619 = vrot.lane.b32.xlu1 %v5862_v55, %s6656_s28  ;;  %3702 = vrot.lane.b32.xlu0 %v5854_v44, %s6657_s2 }
 0x611   : > { %3704 = vrot.lane.b32.xlu1 %v5862_v55, %s6657_s2  ;;  %3787 = vrot.lane.b32.xlu0 %v5854_v44, %s6658_s22  ;;  %v6088_v44 = vrot.slane %v4156_v1, %v6642_v4 }
 0x615   : > { %3789 = vrot.lane.b32.xlu1 %v5862_v55, %s6658_s22  ;;  %3156 = vrot.lane.b32.xlu0 %v5918_v62, %s6674_s3  ;;  %v6095_v55 = vrot.slane %v4161_v52, %v6642_v4  ;;  %v6115_v52 = vrot.slane %v4175_v31, %v6643_v42 }
 0x619   : > { %3158 = vrot.lane.b32.xlu1 %v5926_v63, %s6674_s3  ;;  %3232 = vrot.lane.b32.xlu0 %v5918_v62, %s6660_s4 }
 0x61d   : > { %3234 = vrot.lane.b32.xlu1 %v5926_v63, %s6660_s4  ;;  %3317 = vrot.lane.b32.xlu0 %v5918_v62, %s6653_s18 }
 0x621   : > { %3319 = vrot.lane.b32.xlu1 %v5926_v63, %s6653_s18  ;;  %3402 = vrot.lane.b32.xlu0 %v5918_v62, %s6654_s1 }
 0x625   : > { %3404 = vrot.lane.b32.xlu1 %v5926_v63, %s6654_s1  ;;  %3528 = vrot.lane.b32.xlu0 %v5918_v62, %s6655_s23 }
 0x629   : > { %3530 = vrot.lane.b32.xlu1 %v5926_v63, %s6655_s23  ;;  %3613 = vrot.lane.b32.xlu0 %v5918_v62, %s6656_s28 }
 0x62d   : > { %3615 = vrot.lane.b32.xlu1 %v5926_v63, %s6656_s28  ;;  %3698 = vrot.lane.b32.xlu0 %v5918_v62, %s6657_s2 }
 0x631   : > { %3700 = vrot.lane.b32.xlu1 %v5926_v63, %s6657_s2  ;;  %3783 = vrot.lane.b32.xlu0 %v5918_v62, %s6658_s22  ;;  %v6122_v62 = vrot.slane %v4180_v12, %v6642_v4 }
 0x635   : > { %3785 = vrot.lane.b32.xlu1 %v5926_v63, %s6658_s22  ;;  %3164 = vrot.lane.b32.xlu0 %v5980_v51, %s6674_s3  ;;  %v4185_v63 = vld [vmem:[%s4308_s9 + $0xe] sm:$0x3] }
 0x636   : > { %v6133_v39 = vrot.slane %v4185_v63, %v6642_v4  ;;  %v6136_v0 = vrot.slane %v4185_v63, %v6643_v42 }
 0x639   : > { %3166 = vrot.lane.b32.xlu1 %v5990_v34, %s6674_s3  ;;  %3240 = vrot.lane.b32.xlu0 %v5980_v51, %s6660_s4 }
 0x63d   : > { %3242 = vrot.lane.b32.xlu1 %v5990_v34, %s6660_s4  ;;  %3325 = vrot.lane.b32.xlu0 %v5980_v51, %s6653_s18 }
 0x641   : > { %3327 = vrot.lane.b32.xlu1 %v5990_v34, %s6653_s18  ;;  %3410 = vrot.lane.b32.xlu0 %v5980_v51, %s6654_s1 }
 0x645   : > { %3412 = vrot.lane.b32.xlu1 %v5990_v34, %s6654_s1  ;;  %3536 = vrot.lane.b32.xlu0 %v5980_v51, %s6655_s23 }
 0x647   : > { %v3153_v53 = vpop.permute.xlu0 %3152 }
 0x649   : > { %3538 = vrot.lane.b32.xlu1 %v5990_v34, %s6655_s23  ;;  %3621 = vrot.lane.b32.xlu0 %v5980_v51, %s6656_s28 }
 0x64b   : > { %v3155_v27 = vpop.permute.xlu1 %3154  ;;  %v3229_v9 = vpop.permute.xlu0 %3228 }
 0x64d   : > { %3623 = vrot.lane.b32.xlu1 %v5990_v34, %s6656_s28  ;;  %3706 = vrot.lane.b32.xlu0 %v5980_v51, %s6657_s2 }
 0x64f   : > { %v6026_v40 = vpop.permute.xlu1 %3230  ;;  %v6028_v36 = vpop.permute.xlu0 %3313 }
 0x651   : > { %3708 = vrot.lane.b32.xlu1 %v5990_v34, %s6657_s2  ;;  %3791 = vrot.lane.b32.xlu0 %v5980_v51, %s6658_s22 }
 0x653   : > { %v6034_v50 = vpop.permute.xlu1 %3315  ;;  %v6037_v20 = vpop.permute.xlu0 %3398 }
 0x655   : > { %3793 = vrot.lane.b32.xlu1 %v5990_v34, %s6658_s22  ;;  %3912 = vperm.xlu0 %4242, %v3898_v21   ;;  %v3208_v21 = vld [vmem:[%s4308_s9] sm:$0x3] }
 0x656   : > { %v6082_v34 = vrot.slane %v3208_v21, %v6642_v4  ;;  %v6085_v30 = vrot.slane %v3208_v21, %v6643_v42  ;;  %v6104_v21 = vrot.slane %v4166_v58, %v6643_v42 }
 0x657   : > { %v6042_v46 = vpop.permute.xlu1 %3400  ;;  %v6044_v2 = vpop.permute.xlu0 %3524 }
 0x659   : > { %3917 = vperm.xlu1 %4243, %v3899_v26  }
 0x65b   : > { %v6046_v23 = vpop.permute.xlu1 %3526  ;;  %v6048_v41 = vpop.permute.xlu0 %3609 }
 0x65f   : > { %v6050_v25 = vpop.permute.xlu1 %3611  ;;  %v6052_v10 = vpop.permute.xlu0 %3694 }
 0x663   : > { %v6054_v56 = vpop.permute.xlu1 %3696  ;;  %v6056_v35 = vpop.permute.xlu0 %3779 }
 0x667   : > { %v6060_v7 = vpop.permute.xlu1 %3781  ;;  %v3161_v26 = vpop.permute.xlu0 %3160 }
 0x668   : > { %6703 = vst [vmem:[#allocation49_spill] sm:$0xff] %v6060_v7  ;;  %v3168_v43 = vsel %vm1039_vm2, %v3153_v53, %v3161_v26  ;;  %v3172_v1 = vsel %vm1039_vm2, %v3161_v26, %v3153_v53  ;;  %v4190_v53 = vld [vmem:[%s4308_s9 + $0x10] sm:$0x3] }
 0x66b   : > { %v3163_v57 = vpop.permute.xlu1 %3162  ;;  %v3237_v15 = vpop.permute.xlu0 %3236 }
 0x66c   : > { %v3169_v51 = vsel %vm1039_vm2, %v3155_v27, %v3163_v57  ;;  %v3173_v58 = vsel %vm1039_vm2, %v3163_v57, %v3155_v27  ;;  %v3244_v26 = vsel %vm1084_vm3, %v3229_v9, %v3237_v15  ;;  %v3248_v31 = vsel %vm1084_vm3, %v3237_v15, %v3229_v9 }
 0x66d   : > { %v3200_v57 = vmul.f32 %v5792_v32, %v3172_v1  ;;  %v3201_v27 = vmul.f32 %v5792_v32, %v3168_v43  ;;  %v3277_v12 = vmul.f32 %v5804_v22, %v3248_v31  ;;  %v3278_v11 = vmul.f32 %v5804_v22, %v3244_v26 }
 0x66e   : > { %v3202_v16 = vmul.f32 %v5794_v45, %v3173_v58  ;;  %v3203_v7 = vmul.f32 %v5794_v45, %v3169_v51  ;;  %v6145_v15 = vrot.slane %v4190_v53, %v6642_v4  ;;  %v6148_v9 = vrot.slane %v4190_v53, %v6643_v42 }
 0x66f   : > { %v3239_v28 = vpop.permute.xlu1 %3238  ;;  %v3297_v63 = vmul.f32 %v6088_v44, %v3277_v12  ;;  %v3298_v1 = vmul.f32 %v6091_v3, %v3278_v11  ;;  %v3322_v45 = vpop.permute.xlu0 %3321  ;;  %v3220_v11 = vmul.f32 %v6082_v34, %v3200_v57  ;;  %v3221_v58 = vmul.f32 %v6085_v30, %v3201_v27 }
 0x670   : > { %v3245_v32 = vsel %vm1084_vm3, %v6026_v40, %v3239_v28  ;;  %v3249_v43 = vsel %vm1084_vm3, %v3239_v28, %v6026_v40  ;;  %v3329_v42 = vsel %vm1135_vm1, %v6028_v36, %v3322_v45  ;;  %v3333_v51 = vsel %vm1135_vm1, %v3322_v45, %v6028_v36 }
 0x671   : > { %v3279_v22 = vmul.f32 %v5812_v47, %v3249_v43  ;;  %v3280_v4 = vmul.f32 %v5812_v47, %v3245_v32  ;;  %v3362_v53 = vmul.f32 %v5826_v54, %v3333_v51  ;;  %v3363_v28 = vmul.f32 %v5826_v54, %v3329_v42 }
 0x672   : > { %v3222_v40 = vmul.f32 %v6082_v34, %v3202_v16  ;;  %v3223_v47 = vmul.f32 %v6085_v30, %v3203_v7  ;;  %v3305_v27 = vadd.f32 %v3297_v63, %v3220_v11  ;;  %v3306_v7 = vadd.f32 %v3298_v1, %v3221_v58 }
 0x673   : > { %v3299_v26 = vmul.f32 %v6088_v44, %v3279_v22  ;;  %v3300_v31 = vmul.f32 %v6091_v3, %v3280_v4  ;;  %v3324_v12 = vpop.permute.xlu1 %3323  ;;  %v3382_v32 = vmul.f32 %v6095_v55, %v3362_v53  ;;  %v3383_v36 = vmul.f32 %v6098_v6, %v3363_v28  ;;  %v3407_v16 = vpop.permute.xlu0 %3406 }
 0x674   : > { %v3330_v57 = vsel %vm1135_vm1, %v6034_v50, %v3324_v12  ;;  %v3334_v54 = vsel %vm1135_vm1, %v3324_v12, %v6034_v50  ;;  %v3414_v42 = vsel %vm1186_vm4, %v6037_v20, %v3407_v16  ;;  %v3418_v51 = vsel %vm1186_vm4, %v3407_v16, %v6037_v20 }
 0x675   : > { %v3364_v43 = vmul.f32 %v5832_v38, %v3334_v54  ;;  %v3365_v45 = vmul.f32 %v5832_v38, %v3330_v57  ;;  %v3307_v22 = vadd.f32 %v3299_v26, %v3222_v40  ;;  %v3308_v4 = vadd.f32 %v3300_v31, %v3223_v47 }
 0x676   : > { %v3447_v63 = vmul.f32 %v5846_v13, %v3418_v51  ;;  %v3448_v1 = vmul.f32 %v5846_v13, %v3414_v42  ;;  %v3390_v38 = vadd.f32 %v3382_v32, %v3305_v27  ;;  %v3391_v58 = vadd.f32 %v3383_v36, %v3306_v7 }
 0x677   : > { %v3384_v53 = vmul.f32 %v6095_v55, %v3364_v43  ;;  %v3385_v50 = vmul.f32 %v6098_v6, %v3365_v45  ;;  %v3409_v11 = vpop.permute.xlu1 %3408  ;;  %v3533_v20 = vpop.permute.xlu0 %3532 }
 0x678   : > { %v3415_v28 = vsel %vm1186_vm4, %v6042_v46, %v3409_v11  ;;  %v3419_v40 = vsel %vm1186_vm4, %v3409_v11, %v6042_v46  ;;  %v3467_v31 = vmul.f32 %v6101_v17, %v3447_v63  ;;  %v3468_v12 = vmul.f32 %v6104_v21, %v3448_v1 }
 0x679   : > { %v3392_v47 = vadd.f32 %v3384_v53, %v3307_v22  ;;  %v3393_v26 = vadd.f32 %v3385_v50, %v3308_v4  ;;  %v3449_v13 = vmul.f32 %v5852_v60, %v3419_v40  ;;  %v3450_v32 = vmul.f32 %v5852_v60, %v3415_v28 }
 0x67a   : > { %v3540_v36 = vsel %vm1258_vm6, %v6044_v2, %v3533_v20  ;;  %v3544_v57 = vsel %vm1258_vm6, %v3533_v20, %v6044_v2  ;;  %v3475_v46 = vadd.f32 %v3467_v31, %v3390_v38  ;;  %v3476_v54 = vadd.f32 %v3468_v12, %v3391_v58 }
 0x67b   : > { %v3573_v16 = vmul.f32 %v5891_v29, %v3540_v36  ;;  %v3574_v27 = vmul.f32 %v5891_v29, %v3544_v57  ;;  %v3535_v7 = vpop.permute.xlu1 %3534  ;;  %v3469_v43 = vmul.f32 %v6101_v17, %v3449_v13  ;;  %v3470_v45 = vmul.f32 %v6104_v21, %v3450_v32  ;;  %v3618_v2 = vpop.permute.xlu0 %3617 }
 0x67c   : > { %v3541_v60 = vsel %vm1258_vm6, %v6046_v23, %v3535_v7  ;;  %v3545_v22 = vsel %vm1258_vm6, %v3535_v7, %v6046_v23  ;;  %v3517_v4 = vadd.f32 %v6066_v48, %v3476_v54  ;;  %v3516_v42 = vadd.f32 %v6071_v8, %v3475_v46 }
 0x67d   : > { %v3593_v29 = vmul.f32 %v6112_v5, %v3573_v16  ;;  %v3594_v51 = vmul.f32 %v6115_v52, %v3574_v27  ;;  %v3477_v53 = vadd.f32 %v3469_v43, %v3392_v47  ;;  %v3478_v50 = vadd.f32 %v3470_v45, %v3393_v26 }
 0x67e   : > { %v3575_v63 = vmul.f32 %v5898_v33, %v3541_v60  ;;  %v3576_v1 = vmul.f32 %v5898_v33, %v3545_v22  ;;  %v3625_v23 = vsel %vm1309_vm7, %v6048_v41, %v3618_v2  ;;  %v3629_v8 = vsel %vm1309_vm7, %v3618_v2, %v6048_v41 }
 0x67f   : > { %v3601_v11 = vadd.f32 %v3593_v29, %v3516_v42  ;;  %v3602_v38 = vadd.f32 %v3594_v51, %v3517_v4  ;;  %v3620_v48 = vpop.permute.xlu1 %3619  ;;  %v3519_v58 = vadd.f32 %v6075_v18, %v3478_v50  ;;  %v3518_v28 = vadd.f32 %v6079_v19, %v3477_v53  ;;  %v3703_v33 = vpop.permute.xlu0 %3702 }
 0x680   : > { %v3595_v40 = vmul.f32 %v6112_v5, %v3575_v63  ;;  %v3596_v20 = vmul.f32 %v6115_v52, %v3576_v1  ;;  %v3658_v47 = vmul.f32 %v5915_v24, %v3625_v23  ;;  %v3659_v26 = vmul.f32 %v5915_v24, %v3629_v8  ;;  %v6704_v63 = vld [vmem:[#allocation37_spill] sm:$0xff] }
 0x681   : > { %v3626_v31 = vsel %vm1309_vm7, %v6050_v25, %v3620_v48  ;;  %v3630_v41 = vsel %vm1309_vm7, %v3620_v48, %v6050_v25  ;;  %v3710_v24 = vsel %vm1360_vm5, %v6052_v10, %v3703_v33  ;;  %v3714_v57 = vsel %vm1360_vm5, %v3703_v33, %v6052_v10  ;;  %v6705_v8 = vld [vmem:[#allocation49_spill] sm:$0xff] }
 0x682   : > { %v3603_v18 = vadd.f32 %v3595_v40, %v3518_v28  ;;  %v3604_v12 = vadd.f32 %v3596_v20, %v3519_v58  ;;  %v3660_v19 = vmul.f32 %v5924_v49, %v3626_v31  ;;  %v3661_v13 = vmul.f32 %v5924_v49, %v3630_v41  ;;  %v6706_v40 = vld [vmem:[#allocation38_spill] sm:$0xff] }
 0x683   : > { %v3678_v32 = vmul.f32 %v6122_v62, %v3658_v47  ;;  %v3679_v36 = vmul.f32 %v6125_v37, %v3659_v26  ;;  %v3705_v46 = vpop.permute.xlu1 %3704  ;;  %v3743_v16 = vmul.f32 %v5940_v61, %v3710_v24  ;;  %v3744_v49 = vmul.f32 %v5940_v61, %v3714_v57  ;;  %v3788_v27 = vpop.permute.xlu0 %3787 }
 0x684   : > { %v3680_v25 = vmul.f32 %v6122_v62, %v3660_v19  ;;  %v3681_v54 = vmul.f32 %v6125_v37, %v3661_v13  ;;  %v3711_v45 = vsel %vm1360_vm5, %v6054_v56, %v3705_v46  ;;  %v3715_v10 = vsel %vm1360_vm5, %v3705_v46, %v6054_v56 }
 0x685   : > { %v3686_v7 = vadd.f32 %v3678_v32, %v3601_v11  ;;  %v3687_v43 = vadd.f32 %v3679_v36, %v3602_v38  ;;  %v3763_v2 = vmul.f32 %v6133_v39, %v3743_v16  ;;  %v3764_v4 = vmul.f32 %v6136_v0, %v3744_v49  ;;  %v6707_v32 = vld [vmem:[#allocation42_spill] sm:$0xff] }
 0x686   : > { %v3688_v60 = vadd.f32 %v3680_v25, %v3603_v18  ;;  %v3689_v22 = vadd.f32 %v3681_v54, %v3604_v12  ;;  %v3745_v42 = vmul.f32 %v5946_v14, %v3711_v45  ;;  %v3746_v61 = vmul.f32 %v5946_v14, %v3715_v10  ;;  %v6708_v54 = vld [vmem:[#allocation47_spill] sm:$0xff] }
 0x687   : > { %v3795_v29 = vsel %vm1411_vm8, %v6056_v35, %v3788_v27  ;;  %v3799_v51 = vsel %vm1411_vm8, %v3788_v27, %v6056_v35  ;;  %v3790_v53 = vpop.permute.xlu1 %3789  ;;  %v3771_v56 = vadd.f32 %v3763_v2, %v3686_v7  ;;  %v3772_v50 = vadd.f32 %v3764_v4, %v3687_v43  ;;  %v3157_v38 = vpop.permute.xlu0 %3156  ;;  %v6709_v27 = vld [vmem:[#allocation44_spill] sm:$0xff] }
 0x688   : > { %v3828_v1 = vmul.f32 %v6704_v63, %v3795_v29  ;;  %v3829_v11 = vmul.f32 %v6704_v63, %v3799_v51  ;;  %v3765_v23 = vmul.f32 %v6133_v39, %v3745_v42  ;;  %v3766_v14 = vmul.f32 %v6136_v0, %v3746_v61 }
 0x689   : > { %v3796_v48 = vsel %vm1411_vm8, %v6705_v8, %v3790_v53  ;;  %v3800_v35 = vsel %vm1411_vm8, %v3790_v53, %v6705_v8 }
 0x68a   : > { %v3848_v58 = vmul.f32 %v6145_v15, %v3828_v1  ;;  %v3849_v28 = vmul.f32 %v6148_v9, %v3829_v11  ;;  %v3830_v20 = vmul.f32 %v6706_v40, %v3796_v48  ;;  %v3831_v33 = vmul.f32 %v6706_v40, %v3800_v35 }
 0x68b   : > { %v3773_v47 = vadd.f32 %v3765_v23, %v3688_v60  ;;  %v3774_v26 = vadd.f32 %v3766_v14, %v3689_v22  ;;  %v3159_v31 = vpop.permute.xlu1 %3158  ;;  %v3233_v13 = vpop.permute.xlu0 %3232  ;;  %v6710_v22 = vld [vmem:[#allocation48_spill] sm:$0xff] }
 0x68c   : > { %v3856_v41 = vadd.f32 %v3848_v58, %v3771_v56  ;;  %v3857_v18 = vadd.f32 %v3849_v28, %v3772_v50  ;;  %v3850_v12 = vmul.f32 %v6145_v15, %v3830_v20  ;;  %v3851_v19 = vmul.f32 %v6148_v9, %v3831_v33 }
 0x68e   : > { %v3888_v36 = vmul.f32 %v6707_v32, %v3856_v41  ;;  %v3889_v24 = vmul.f32 %v6707_v32, %v3857_v18  ;;  %v3858_v57 = vadd.f32 %v3850_v12, %v3773_v47  ;;  %v3859_v46 = vadd.f32 %v3851_v19, %v3774_v26  ;;  %v6711_v12 = vld [vmem:[#allocation31_spill] sm:$0xff] }
 0x68f   : > { %v3235_v25 = vpop.permute.xlu1 %3234  ;;  %v3318_v45 = vpop.permute.xlu0 %3317  ;;  %v6712_v19 = vld [vmem:[#allocation27_spill] sm:$0xff] }
 0x690   : > { %v3920_v16 = vadd.f32 %v6708_v54, %v3888_v36  ;;  %v3921_v49 = vadd.f32 %v6708_v54, %v3889_v24  ;;  %v3890_v7 = vmul.f32 %v6709_v27, %v3858_v57  ;;  %v3891_v43 = vmul.f32 %v6709_v27, %v3859_v46  ;;  %v6713_v36 = vld [vmem:[#allocation40_spill] sm:$0xff]  ;;  %v6714_v24 = vld [vmem:[#allocation19_spill] sm:$0xff] }
 0x691   : > { %v6348_v32 = vmul.f32 %v6712_v19, %v6711_v12 }
 0x692   : > { %v3937_v10 = vrot.slane %v3920_v16, 4  ;;  %v3938_v60 = vrot.slane %v3921_v49, 4  ;;  %v6297_v2 = vadd.f32 %v6710_v22, %v3890_v7  ;;  %v6300_v4 = vadd.f32 %v6710_v22, %v3891_v43  ;;  %v6716_v49 = vld [vmem:[#allocation23_spill] sm:$0xff]  ;;  %v6717_v43 = vld [vmem:[#allocation32_spill] sm:$0xff] }
 0x693   : > { %v3320_v42 = vpop.permute.xlu1 %3319  ;;  %v6304_v61 = vpop.permute.xlu0 %3402  ;;  %v6719_v22 = vld [vmem:[#allocation43_spill] sm:$0xff] }
 0x694   : > { %3959 = vst [vmem:[%s4910_s0 + $0x20] sm:$0xf0] %v3937_v10  ;;  %3960 = vst [vmem:[%s4910_s0 + $0x28] sm:$0xf0] %v3938_v60  ;;  %v3939_v29 = vrot.slane %v6297_v2, 4  ;;  %v3941_v51 = vrot.slane %v6300_v4, 4 }
 0x696   : > { %v3942_v53 = vsel %vm3936_vm11, %v3938_v60, %v3941_v51  ;;  %v3940_v56 = vsel %vm3936_vm11, %v3937_v10, %v3939_v29  ;;  %v6718_v10 = vld [vmem:[#allocation28_spill] sm:$0xff] }
 0x697   : > { %v6314_v50 = vpop.permute.xlu1 %3404  ;;  %3962 = vst [vmem:[%s4910_s0 + $0x38] sm:$0xff] %v3942_v53  ;;  %3961 = vst [vmem:[%s4910_s0 + $0x30] sm:$0xff] %v3940_v56  ;;  %v6318_v63 = vpop.permute.xlu0 %3528  ;;  %v6362_v60 = vmul.f32 %v6718_v10, %v6717_v43  ;;  %v6366_v53 = vmul.f32 %v6718_v10, %v6719_v22 }
 0x69b   : > { %v6320_v1 = vpop.permute.xlu1 %3530  ;;  %v6322_v11 = vpop.permute.xlu0 %3613 }
 0x69f   : > { %v6324_v23 = vpop.permute.xlu1 %3615  ;;  %v6326_v14 = vpop.permute.xlu0 %3698 }
 0x6a3   : > { %v6328_v8 = vpop.permute.xlu1 %3700  ;;  %v6330_v48 = vpop.permute.xlu0 %3783 }
 0x6a7   : > { %v6332_v35 = vpop.permute.xlu1 %3785  ;;  %v3165_v58 = vpop.permute.xlu0 %3164 }
 0x6a8   : > { %v3170_v28 = vsel %vm1039_vm2, %v3157_v38, %v3165_v58  ;;  %v3174_v40 = vsel %vm1039_vm2, %v3165_v58, %v3157_v38  ;;  %v6352_v38 = vmul.f32 %v6712_v19, %v6713_v36  ;;  %v6721_v36 = vld [vmem:[#allocation20_spill] sm:$0xff] }
 0x6a9   : > { %v3204_v57 = vmul.f32 %v6714_v24, %v3174_v40  ;;  %v3205_v46 = vmul.f32 %v6714_v24, %v3170_v28 }
 0x6ab   : > { %v3167_v20 = vpop.permute.xlu1 %3166  ;;  %v3241_v26 = vpop.permute.xlu0 %3240  ;;  %v3224_v12 = vmul.f32 %v6082_v34, %v3204_v57  ;;  %v3225_v19 = vmul.f32 %v6085_v30, %v3205_v46 }
 0x6ac   : > { %v3171_v33 = vsel %vm1039_vm2, %v3159_v31, %v3167_v20  ;;  %v3175_v47 = vsel %vm1039_vm2, %v3167_v20, %v3159_v31  ;;  %v3246_v41 = vsel %vm1084_vm3, %v3233_v13, %v3241_v26  ;;  %v3250_v18 = vsel %vm1084_vm3, %v3241_v26, %v3233_v13  ;;  %v6715_v31 = vld [vmem:[#allocation24_spill] sm:$0xff] }
 0x6ad   : > { %v3281_v54 = vmul.f32 %v6715_v31, %v3250_v18  ;;  %v3282_v16 = vmul.f32 %v6715_v31, %v3246_v41  ;;  %v3206_v27 = vmul.f32 %v6716_v49, %v3175_v47  ;;  %v3207_v13 = vmul.f32 %v6716_v49, %v3171_v33  ;;  %v6720_v33 = vld [vmem:[#allocation22_spill] sm:$0xff] }
 0x6af   : > { %v3243_v7 = vpop.permute.xlu1 %3242  ;;  %v3301_v56 = vmul.f32 %v6088_v44, %v3281_v54  ;;  %v3302_v58 = vmul.f32 %v6091_v3, %v3282_v16  ;;  %v3326_v20 = vpop.permute.xlu0 %3325  ;;  %v3227_v54 = vmul.f32 %v6085_v30, %v3207_v13 }
 0x6b0   : > { %v3247_v28 = vsel %vm1084_vm3, %v3235_v25, %v3243_v7  ;;  %v3251_v40 = vsel %vm1084_vm3, %v3243_v7, %v3235_v25  ;;  %v3331_v41 = vsel %vm1135_vm1, %v3318_v45, %v3326_v20  ;;  %v3335_v18 = vsel %vm1135_vm1, %v3326_v20, %v3318_v45 }
 0x6b1   : > { %v3283_v47 = vmul.f32 %v6720_v33, %v3251_v40  ;;  %v3284_v26 = vmul.f32 %v6720_v33, %v3247_v28  ;;  %v3366_v24 = vmul.f32 %v6721_v36, %v3335_v18  ;;  %v3367_v31 = vmul.f32 %v6721_v36, %v3331_v41 }
 0x6b2   : > { %v3226_v25 = vmul.f32 %v6082_v34, %v3206_v27  ;;  %v3309_v22 = vadd.f32 %v3301_v56, %v3224_v12  ;;  %v3310_v34 = vadd.f32 %v3302_v58, %v3225_v19  ;;  %v6722_v27 = vld [vmem:[#allocation21_spill] sm:$0xff] }
 0x6b3   : > { %v3303_v16 = vmul.f32 %v6088_v44, %v3283_v47  ;;  %v3304_v49 = vmul.f32 %v6091_v3, %v3284_v26  ;;  %v3328_v7 = vpop.permute.xlu1 %3327  ;;  %v3386_v43 = vmul.f32 %v6095_v55, %v3366_v24  ;;  %v3387_v45 = vmul.f32 %v6098_v6, %v3367_v31  ;;  %v3411_v10 = vpop.permute.xlu0 %3410  ;;  %v6723_v56 = vld [vmem:[#allocation25_spill] sm:$0xff]  ;;  %v6724_v24 = vld [vmem:[#allocation26_spill] sm:$0xff] }
 0x6b4   : > { %v3332_v57 = vsel %vm1135_vm1, %v3320_v42, %v3328_v7  ;;  %v3336_v46 = vsel %vm1135_vm1, %v3328_v7, %v3320_v42  ;;  %v3416_v28 = vsel %vm1186_vm4, %v6304_v61, %v3411_v10  ;;  %v3420_v40 = vsel %vm1186_vm4, %v3411_v10, %v6304_v61  ;;  %v6725_v7 = vld [vmem:[#allocation29_spill] sm:$0xff] }
 0x6b5   : > { %v3368_v30 = vmul.f32 %v6722_v27, %v3336_v46  ;;  %v3369_v44 = vmul.f32 %v6722_v27, %v3332_v57  ;;  %v3311_v13 = vadd.f32 %v3303_v16, %v3226_v25  ;;  %v3312_v3 = vadd.f32 %v3304_v49, %v3227_v54 }
 0x6b6   : > { %v3451_v58 = vmul.f32 %v6723_v56, %v3420_v40  ;;  %v3452_v33 = vmul.f32 %v6723_v56, %v3416_v28  ;;  %v3394_v26 = vadd.f32 %v3386_v43, %v3309_v22  ;;  %v3395_v41 = vadd.f32 %v3387_v45, %v3310_v34 }
 0x6b7   : > { %v3388_v20 = vmul.f32 %v6095_v55, %v3368_v30  ;;  %v3389_v42 = vmul.f32 %v6098_v6, %v3369_v44  ;;  %v3413_v47 = vpop.permute.xlu1 %3412  ;;  %v3537_v61 = vpop.permute.xlu0 %3536 }
 0x6b8   : > { %v3417_v18 = vsel %vm1186_vm4, %v6314_v50, %v3413_v47  ;;  %v3421_v12 = vsel %vm1186_vm4, %v3413_v47, %v6314_v50  ;;  %v3471_v6 = vmul.f32 %v6101_v17, %v3451_v58  ;;  %v3472_v36 = vmul.f32 %v6104_v21, %v3452_v33  ;;  %v6727_v47 = vld [vmem:[#allocation33_spill] sm:$0xff] }
 0x6b9   : > { %v3396_v19 = vadd.f32 %v3388_v20, %v3311_v13  ;;  %v3397_v55 = vadd.f32 %v3389_v42, %v3312_v3  ;;  %v3453_v31 = vmul.f32 %v6724_v24, %v3421_v12  ;;  %v3454_v25 = vmul.f32 %v6724_v24, %v3417_v18 }
 0x6ba   : > { %v3542_v54 = vsel %vm1258_vm6, %v6318_v63, %v3537_v61  ;;  %v3546_v16 = vsel %vm1258_vm6, %v3537_v61, %v6318_v63  ;;  %v3479_v50 = vadd.f32 %v3471_v6, %v3394_v26  ;;  %v3480_v49 = vadd.f32 %v3472_v36, %v3395_v41 }
 0x6bb   : > { %v3577_v43 = vmul.f32 %v6725_v7, %v3542_v54  ;;  %v3578_v45 = vmul.f32 %v6725_v7, %v3546_v16  ;;  %v3539_v57 = vpop.permute.xlu1 %3538  ;;  %v3473_v46 = vmul.f32 %v6101_v17, %v3453_v31  ;;  %v3474_v10 = vmul.f32 %v6104_v21, %v3454_v25  ;;  %v3622_v63 = vpop.permute.xlu0 %3621  ;;  %v6726_v21 = vld [vmem:[#allocation30_spill] sm:$0xff]  ;;  %v6729_v31 = vld [vmem:[#allocation35_spill] sm:$0xff] }
 0x6bc   : > { %v3543_v22 = vsel %vm1258_vm6, %v6320_v1, %v3539_v57  ;;  %v3547_v34 = vsel %vm1258_vm6, %v3539_v57, %v6320_v1  ;;  %v3520_v27 = vadd.f32 %v6348_v32, %v3479_v50  ;;  %v3521_v30 = vadd.f32 %v6352_v38, %v3480_v49 }
 0x6bd   : > { %v3597_v44 = vmul.f32 %v6112_v5, %v3577_v43  ;;  %v3598_v13 = vmul.f32 %v6115_v52, %v3578_v45  ;;  %v3481_v17 = vadd.f32 %v3473_v46, %v3396_v19  ;;  %v3482_v3 = vadd.f32 %v3474_v10, %v3397_v55  ;;  %v6730_v10 = vld [vmem:[#allocation36_spill] sm:$0xff] }
 0x6be   : > { %v3579_v28 = vmul.f32 %v6726_v21, %v3543_v22  ;;  %v3580_v40 = vmul.f32 %v6726_v21, %v3547_v34  ;;  %v3627_v20 = vsel %vm1309_vm7, %v6322_v11, %v3622_v63  ;;  %v3631_v1 = vsel %vm1309_vm7, %v3622_v63, %v6322_v11  ;;  %v6732_v21 = vld [vmem:[#allocation41_spill] sm:$0xff] }
 0x6bf   : > { %v3624_v32 = vpop.permute.xlu1 %3623  ;;  %v3522_v38 = vadd.f32 %v6362_v60, %v3481_v17  ;;  %v3523_v42 = vadd.f32 %v6366_v53, %v3482_v3  ;;  %v3707_v33 = vpop.permute.xlu0 %3706  ;;  %v3662_v26 = vmul.f32 %v6727_v47, %v3627_v20  ;;  %v3663_v41 = vmul.f32 %v6727_v47, %v3631_v1  ;;  %v6728_v53 = vld [vmem:[#allocation34_spill] sm:$0xff] }
 0x6c0   : > { %v3599_v56 = vmul.f32 %v6112_v5, %v3579_v28  ;;  %v3600_v58 = vmul.f32 %v6115_v52, %v3580_v40  ;;  %v3628_v18 = vsel %vm1309_vm7, %v6324_v23, %v3624_v32  ;;  %v3632_v11 = vsel %vm1309_vm7, %v3624_v32, %v6324_v23 }
 0x6c1   : > { %v3605_v60 = vadd.f32 %v3597_v44, %v3520_v27  ;;  %v3606_v12 = vadd.f32 %v3598_v13, %v3521_v30  ;;  %v3664_v61 = vmul.f32 %v6728_v53, %v3628_v18  ;;  %v3665_v5 = vmul.f32 %v6728_v53, %v3632_v11  ;;  %v6734_v53 = vld [vmem:[#allocation46_spill] sm:$0xff] }
 0x6c2   : > { %v3682_v52 = vmul.f32 %v6122_v62, %v3662_v26  ;;  %v3683_v19 = vmul.f32 %v6125_v37, %v3663_v41  ;;  %v3712_v55 = vsel %vm1360_vm5, %v6326_v14, %v3707_v33  ;;  %v3716_v6 = vsel %vm1360_vm5, %v3707_v33, %v6326_v14  ;;  %v6733_v26 = vld [vmem:[#allocation45_spill] sm:$0xff] }
 0x6c3   : > { %v3709_v36 = vpop.permute.xlu1 %3708  ;;  %v3607_v23 = vadd.f32 %v3599_v56, %v3522_v38  ;;  %v3608_v24 = vadd.f32 %v3600_v58, %v3523_v42  ;;  %v3747_v25 = vmul.f32 %v6729_v31, %v3712_v55  ;;  %v3748_v54 = vmul.f32 %v6729_v31, %v3716_v6  ;;  %v3792_v16 = vpop.permute.xlu0 %3791 }
 0x6c4   : > { %v3684_v50 = vmul.f32 %v6122_v62, %v3664_v61  ;;  %v3685_v49 = vmul.f32 %v6125_v37, %v3665_v5  ;;  %v3713_v7 = vsel %vm1360_vm5, %v6328_v8, %v3709_v36  ;;  %v3717_v14 = vsel %vm1360_vm5, %v3709_v36, %v6328_v8  ;;  %v6731_v8 = vld [vmem:[#allocation39_spill] sm:$0xff] }
 0x6c5   : > { %v3690_v43 = vadd.f32 %v3682_v52, %v3605_v60  ;;  %v3691_v45 = vadd.f32 %v3683_v19, %v3606_v12  ;;  %v3767_v57 = vmul.f32 %v6133_v39, %v3747_v25  ;;  %v3768_v46 = vmul.f32 %v6136_v0, %v3748_v54 }
 0x6c6   : > { %v3749_v22 = vmul.f32 %v6730_v10, %v3713_v7  ;;  %v3750_v62 = vmul.f32 %v6730_v10, %v3717_v14  ;;  %v3797_v37 = vsel %vm1411_vm8, %v6330_v48, %v3792_v16  ;;  %v3801_v34 = vsel %vm1411_vm8, %v3792_v16, %v6330_v48 }
 0x6c7   : > { %v3794_v63 = vpop.permute.xlu1 %3793  ;;  %v3832_v27 = vmul.f32 %v6731_v8, %v3797_v37  ;;  %v3833_v30 = vmul.f32 %v6731_v8, %v3801_v34  ;;  %v3775_v1 = vadd.f32 %v3767_v57, %v3690_v43  ;;  %v3776_v32 = vadd.f32 %v3768_v46, %v3691_v45 }
 0x6c8   : > { %v3798_v44 = vsel %vm1411_vm8, %v6332_v35, %v3794_v63  ;;  %v3802_v13 = vsel %vm1411_vm8, %v3794_v63, %v6332_v35  ;;  %v3769_v17 = vmul.f32 %v6133_v39, %v3749_v22  ;;  %v3770_v3 = vmul.f32 %v6136_v0, %v3750_v62 }
 0x6c9   : > { %v3834_v28 = vmul.f32 %v6732_v21, %v3798_v44  ;;  %v3835_v48 = vmul.f32 %v6732_v21, %v3802_v13  ;;  %v3852_v40 = vmul.f32 %v6145_v15, %v3832_v27  ;;  %v3853_v20 = vmul.f32 %v6148_v9, %v3833_v30 }
 0x6ca   : > { %v3692_v38 = vadd.f32 %v3684_v50, %v3607_v23  ;;  %v3693_v42 = vadd.f32 %v3685_v49, %v3608_v24 }
 0x6cb   : > { %v3854_v56 = vmul.f32 %v6145_v15, %v3834_v28  ;;  %v3855_v59 = vmul.f32 %v6148_v9, %v3835_v48  ;;  %v3860_v35 = vadd.f32 %v3852_v40, %v3775_v1  ;;  %v3861_v39 = vadd.f32 %v3853_v20, %v3776_v32 }
 0x6cc   : > { %v3777_v58 = vadd.f32 %v3769_v17, %v3692_v38  ;;  %v3778_v0 = vadd.f32 %v3770_v3, %v3693_v42 }
 0x6cd   : > { %v3892_v41 = vmul.f32 %v6733_v26, %v3860_v35  ;;  %v3893_v18 = vmul.f32 %v6733_v26, %v3861_v39 }
 0x6ce   : > { %v3862_v33 = vadd.f32 %v3854_v56, %v3777_v58  ;;  %v3863_v47 = vadd.f32 %v3855_v59, %v3778_v0 }
 0x6d0   : > { %v3913_v11 = vpop.permute.xlu0 %3912  ;;  %v3894_v15 = vmul.f32 %v6734_v53, %v3862_v33  ;;  %v3895_v9 = vmul.f32 %v6734_v53, %v3863_v47 }
 0x6d1   : > { %v3924_v60 = vadd.f32 %v3913_v11, %v3892_v41  ;;  %v3925_v12 = vadd.f32 %v3913_v11, %v3893_v18 }
 0x6d3   : > { %v3943_v61 = vrot.slane %v3924_v60, 4  ;;  %v3945_v5 = vrot.slane %v3925_v12, 4 }
 0x6d4   : > { %v3918_v52 = vpop.permute.xlu1 %3917 }
 0x6d5   : > { %v3926_v19 = vadd.f32 %v3918_v52, %v3894_v15  ;;  %v3927_v55 = vadd.f32 %v3918_v52, %v3895_v9  ;;  %v3944_v6 = vsel %vm3936_vm11, %v3939_v29, %v3943_v61  ;;  %v3946_v36 = vsel %vm3936_vm11, %v3941_v51, %v3945_v5 }
 0x6d6   : > { %3963 = vst [vmem:[%s4910_s0 + $0x40] sm:$0xff] %v3944_v6  ;;  %3964 = vst [vmem:[%s4910_s0 + $0x48] sm:$0xff] %v3946_v36 }
 0x6d7   : > { %v3947_v23 = vrot.slane %v3926_v19, 4  ;;  %v3949_v24 = vrot.slane %v3927_v55, 4 }
 0x6d9   : > { %v3948_v31 = vsel %vm3936_vm11, %v3943_v61, %v3947_v23  ;;  %v3950_v25 = vsel %vm3936_vm11, %v3945_v5, %v3949_v24 }
 0x6da   : > { %3965 = vst [vmem:[%s4910_s0 + $0x50] sm:$0x3f] %v3948_v31  ;;  %3966 = vst [vmem:[%s4910_s0 + $0x58] sm:$0x3f] %v3950_v25 }
 0x6db PF: > { %s69_s7 = sadd.s32 1, %s4254_s7  }
 0x6dc   : > { %p66_p4 = scmp.ge.s32.totalorder %s69_s7, 4  }
 0x6de   :  { %68 = sbr.rel (!%p66_p4) target bundleno = 57 (0x39), region = 234 }

</bundles_post_ra>
